<compile_context>
chip_gen: v6e
topology: v6e:2x2x1
jax: 0.10.0
libtpu: 0.0.40
codegen_flags: <defaults>
</compile_context>

<pallas_src>
import numpy as np
import jax
import jax.numpy as jnp
from jax import lax
from jax.experimental import pallas as pl
from jax.experimental.pallas import tpu as pltpu

NL = 128          # number of label bins (labels must lie in [0, NL))
MAX_WIDTH = 4096  # max pixel lanes per sublane row (K of each MXU contraction)


def _chip_config():
    """Pick one-hot / accumulator dtypes and core split per TPU generation."""
    try:
        kind = jax.devices()[0].device_kind.lower()
    except Exception:
        kind = ""
    if "v7" in kind or "tpu7" in kind:
        # v7x: no integer MXU -> fp8 one-hots (0/1 exact), f32 accumulation,
        # and shard the reduction grid across the 2 TensorCores.
        fp8 = getattr(jnp, "float8_e4m3fn", jnp.bfloat16)
        return fp8, jnp.float32, 2
    if "v5" in kind or "v6" in kind:
        # v5e/v5p/v6e: int8 MXU path (higher rate than bf16), exact int32 acc,
        # single TensorCore -> no core split.
        return jnp.int8, jnp.int32, 1
    # Unknown / older chips: safe bf16 path, f32 accumulation, no core split.
    return jnp.bfloat16, jnp.float32, 1


_ONEHOT_DTYPE, _ACC_DTYPE, _NCORES = _chip_config()


def _make_hist_kernel(sub, onehot_dtype, acc_dtype, red_axis):
    """Build the joint-histogram kernel for a (sub, width) pixel block."""

    def kernel(s_ref, g_ref, n_ref):
        # The output block index is constant along the reduction axis, so
        # n_ref stays VMEM-resident across it: accumulate into it directly.
        @pl.when(pl.program_id(red_axis) == 0)
        def _init():
            n_ref[...] = jnp.zeros_like(n_ref)

        # (NL, 1) label-id column; the compares broadcast it against the
        # (1, width) pixel row, so no (NL, width) iota constant is ever
        # materialized or re-read from VMEM.
        lab = lax.broadcasted_iota(jnp.int32, (NL, 1), 0)

        def row(r, partial):
            s_row = s_ref[pl.ds(r, 1), :]                   # (1, width) pixels
            g_row = g_ref[pl.ds(r, 1), :]
            os_r = (lab == s_row).astype(onehot_dtype)      # (NL, width) one-hot S
            og_r = (lab == g_row).astype(onehot_dtype)      # (NL, width) one-hot G
            # contract width pixel lanes on the MXU: (NL,K) x (NL,K)^T -> (NL,NL)
            return partial + lax.dot_general(
                os_r, og_r, (((1,), (1,)), ((), ())),
                preferred_element_type=acc_dtype)

        # fori_loop (vs a static Python for) bounds the one-hot live ranges.
        partial = lax.fori_loop(0, sub, row,
                                jnp.zeros((NL, NL), acc_dtype), unroll=True)
        # Per-step partial <= sub*width << 2^24, so the f32 path is exact too;
        # the running histogram is int32 -> exact counts up to 2^31 pixels.
        n_ref[...] += partial.astype(jnp.int32)             # single RMW / step

    return kernel


def joint_histogram(S, G):
    """(NL, NL) int32 joint histogram N[s, g] = #{pixels: S==s and G==g}.

    NOTE: labels must lie in [0, NL); labels >= NL (or negative labels other
    than the internal -1 pad) are silently dropped from the histogram and
    would diverge from the PyTorch reference.
    """
    s = jnp.asarray(S, jnp.int32).reshape(-1)
    g = jnp.asarray(G, jnp.int32).reshape(-1)
    npix = s.shape[0]

    onehot_dtype, acc_dtype, ncores = _ONEHOT_DTYPE, _ACC_DTYPE, _NCORES

    # --- size the pixel block to the input (shapes are static under jit) ---
    width = min(MAX_WIDTH, max(128, pl.next_power_of_2(pl.cdiv(npix, 8))))
    sub_cap = 16 if jnp.dtype(onehot_dtype).itemsize == 1 else 8   # VMEM budget
    sub = sub_cap if npix >= sub_cap * width else 8
    block_pix = sub * width

    nblk = max(1, pl.cdiv(npix, block_pix))
    nblk = pl.cdiv(nblk, ncores) * ncores                # even split over cores
    pad = nblk * block_pix - npix
    s = jnp.pad(s, (0, pad), constant_values=-1).reshape(nblk * sub, width)
    g = jnp.pad(g, (0, pad), constant_values=-1).reshape(nblk * sub, width)

    if ncores == 1:
        grid = (nblk,)
        in_spec = pl.BlockSpec((sub, width), lambda i: (i, 0))
        out_spec = pl.BlockSpec((NL, NL), lambda i: (0, 0))
        out_shape = jax.ShapeDtypeStruct((NL, NL), jnp.int32)
        dims = ("arbitrary",)
        red_axis = 0
    else:
        nblk_core = nblk // ncores
        grid = (ncores, nblk_core)
        in_spec = pl.BlockSpec((sub, width),
                               lambda c, i: (c * nblk_core + i, 0))
        out_spec = pl.BlockSpec((None, NL, NL), lambda c, i: (c, 0, 0))
        out_shape = jax.ShapeDtypeStruct((ncores, NL, NL), jnp.int32)
        # Real per-TensorCore sharding of the leading axis on v7x.
        dims = (pltpu.CORE_PARALLEL, pltpu.ARBITRARY)
        red_axis = 1

    hist = pl.pallas_call(
        _make_hist_kernel(sub, onehot_dtype, acc_dtype, red_axis),
        out_shape=out_shape,
        grid_spec=pltpu.PrefetchScalarGridSpec(
            num_scalar_prefetch=0,
            grid=grid,
            in_specs=[in_spec, in_spec],
            out_specs=out_spec),
        compiler_params=pltpu.CompilerParams(
            dimension_semantics=dims,
            vmem_limit_bytes=32 * 1024 * 1024),
    )(s, g)
    if ncores > 1:
        hist = hist.sum(axis=0)        # combine per-core partial histograms
    return hist


@jax.jit
def obj_dice_loss(S, G):
    """Forward pass of ObjDiceLoss, numerically matching the PyTorch module."""
    N = joint_histogram(S, G).astype(jnp.float32)     # (NL, NL) exact counts
    areaS = N.sum(axis=1)                             # |S == s|
    areaG = N.sum(axis=0)                             # |G == g|
    labels = jnp.arange(NL)
    presS = (labels >= 1) & (areaS > 0)
    presG = (labels >= 1) & (areaG > 0)
    numS = presS.sum()
    totalAreaS = jnp.sum(jnp.where(labels >= 1, areaS, 0.0))
    totalAreaG = jnp.sum(jnp.where(labels >= 1, areaG, 0.0))

    # ---- temp1: loop over labels of S (vectorized) ----
    Nsg = N.at[:, 0].set(0.0)                         # drop g == 0 (background)
    n_max_s = Nsg.max(axis=1)                         # = N[s, gi]
    gi = jnp.argmax(Nsg, axis=1)                      # first-max (matches torch.argmax)
    exists_s = n_max_s > 0
    denom_s = areaG[gi] + areaS
    dice_s = jnp.where(exists_s,
                       2.0 * n_max_s / jnp.maximum(denom_s, 1.0), 0.0)
    omegaS = areaS / jnp.maximum(totalAreaS, 1.0)
    temp1 = jnp.sum(jnp.where(presS, omegaS * dice_s, 0.0))

    # ---- temp2: loop over labels of G (vectorized) ----
    Ngs = N.at[0, :].set(0.0)                         # drop s == 0 (background)
    n_max_g = Ngs.max(axis=0)                         # = N[si, g]
    si = jnp.argmax(Ngs, axis=0)
    exists_g = n_max_g > 0
    denom_g = areaG + areaS[si]
    dice_g = jnp.where(exists_g,
                       2.0 * n_max_g / jnp.maximum(denom_g, 1.0), 0.0)
    omegaG = areaG / jnp.maximum(totalAreaG, 1.0)
    temp2 = jnp.sum(jnp.where(presG, omegaG * dice_g, 0.0))

    obj_dice = (temp1 + temp2) / 2.0
    # NOTE: in the reference, `numS == 0 & numG == 0` parses as `numS == 0`
    # (operator precedence), and the subsequent `elif` is unreachable.
    return jnp.where(numS == 0, jnp.float32(1.0), obj_dice).astype(jnp.float32)


# ----------------------- numpy reference (mirrors the torch code) -----------
def _obj_dice_ref(S, G):
    S = np.asarray(S)
    G = np.asarray(G)
    labS = np.unique(S); labS = labS[labS != 0]
    labG = np.unique(G); labG = labG[labG != 0]
    if len(labS) == 0:            # mirrors the precedence quirk in the module
        return 1.0
    temp1 = 0.0
    totalAreaS = float(np.sum(S > 0))
    for ls in labS:
        Si = S == ls
        inter = G[Si]; inter = inter[inter != 0]
        if inter.size != 0:
            gi = int(np.argmax(np.bincount(inter)))
            Gi = G == gi
        else:
            Gi = np.zeros_like(G, bool)
        omega = float(np.sum(Si)) / totalAreaS
        d = 2.0 * float(np.sum(Gi & Si)) / (float(np.sum(Gi)) + float(np.sum(Si)))
        temp1 += omega * d
    temp2 = 0.0
    totalAreaG = float(np.sum(G > 0))
    for lg in labG:
        tGi = G == lg
        inter = S[tGi]; inter = inter[inter != 0]
        if inter.size != 0:
            si = int(np.argmax(np.bincount(inter)))
            tSi = S == si
        else:
            tSi = np.zeros_like(S, bool)
        omega = float(np.sum(tGi)) / totalAreaG
        d = 2.0 * float(np.sum(tGi & tSi)) / (float(np.sum(tGi)) + float(np.sum(tSi)))
        temp2 += omega * d
    return (temp1 + temp2) / 2.0


if __name__ == "__main__":
    key = jax.random.PRNGKey(0)
    k_noise, k_s2, k_g2 = jax.random.split(key, 3)

    # ---- test 1: structured instance blobs on a 64x64 image ----
    H = W = 64
    yy, xx = jnp.meshgrid(jnp.arange(H), jnp.arange(W), indexing="ij")
    S = jnp.zeros((H, W), jnp.int32)
    S = jnp.where((yy < 28) & (xx < 28), 1, S)
    S = jnp.where((yy < 28) & (xx >= 36), 2, S)
    S = jnp.where((yy >= 36) & (xx < 28), 3, S)
    S = jnp.where((yy >= 36) & (xx >= 36), 4, S)
    G = jnp.zeros((H, W), jnp.int32)
    G = jnp.where((yy < 30) & (xx < 30), 2, G)
    G = jnp.where((yy < 30) & (xx >= 34), 1, G)
    G = jnp.where((yy >= 34) & (xx < 30), 4, G)
    G = jnp.where((yy >= 34) & (xx >= 34), 3, G)
    noise = jax.random.bernoulli(k_noise, 0.05, (H, W))
    G = jnp.where(noise, 0, G)

    out = jax.block_until_ready(obj_dice_loss(S, G))
    ref = _obj_dice_ref(np.asarray(S), np.asarray(G))
    assert np.allclose(float(out), ref, atol=1e-5), (float(out), ref)

    # ---- test 2: random small-label maps on a non-aligned shape ----
    S2 = jax.random.randint(k_s2, (40, 72), 0, 6).astype(jnp.int32)
    G2 = jax.random.randint(k_g2, (40, 72), 0, 6).astype(jnp.int32)
    out2 = jax.block_until_ready(obj_dice_loss(S2, G2))
    ref2 = _obj_dice_ref(np.asarray(S2), np.asarray(G2))
    assert np.allclose(float(out2), ref2, atol=1e-5), (float(out2), ref2)

    print("KERNEL_OK")
</pallas_src>

<mosaic_0001>
module attributes {stable_mosaic.version = 11 : i64} {
  func.func @kernel(%arg0: i32, %arg1: memref<8x512xi32, #tpu.memory_space<vmem>>, %arg2: memref<8x512xi32, #tpu.memory_space<vmem>>, %arg3: memref<128x128xi32, #tpu.memory_space<vmem>>) attributes {dimension_semantics = [#tpu.dimension_semantics<arbitrary>], iteration_bounds = array<i64: 1>, scalar_prefetch = 0 : i64, scratch_operands = 0 : i64, tpu.core_type = #tpu.core_type<tc>, window_params = [{transform_indices = @transform_0, window_bounds = array<i64: 8, 512>}, {transform_indices = @transform_1, window_bounds = array<i64: 8, 512>}, {pipeline_mode = #tpu.pipeline_mode<synchronous>, transform_indices = @transform_2, window_bounds = array<i64: 128, 128>}]} {
    %c0_i32 = arith.constant 0 : i32
    %0 = arith.cmpi eq, %arg0, %c0_i32 : i32
    %1 = arith.extui %0 : i1 to i32
    %c0_i32_0 = arith.constant 0 : i32
    %2 = arith.cmpi ne, %1, %c0_i32_0 : i32
    scf.if %2 {
      %c0_i32_29 = arith.constant 0 : i32
      %153 = vector.broadcast %c0_i32_29 : i32 to vector<128x128xi32>
      %c0_30 = arith.constant 0 : index
      %c0_31 = arith.constant 0 : index
      %154 = vector.load %arg3[%c0_30, %c0_31] : memref<128x128xi32, #tpu.memory_space<vmem>>, vector<128x128xi32>
      tpu.vector_store %arg3[%c0_30, %c0_31], %153 {strides = array<i32>} : memref<128x128xi32, #tpu.memory_space<vmem>>, vector<128x128xi32>,
    } else {
    }
    %3 = tpu.iota {dimensions = array<i32: 0>} : vector<128x1xi32>
    %cst = arith.constant 0.000000e+00 : f32
    %4 = vector.broadcast %cst : f32 to vector<128x128xf32>
    %c0_i32_1 = arith.constant 0 : i32
    %5 = arith.index_cast %c0_i32_1 : i32 to index
    %c0 = arith.constant 0 : index
    %6 = vector.load %arg1[%5, %c0] : memref<8x512xi32, #tpu.memory_space<vmem>>, vector<1x512xi32>
    %7 = arith.index_cast %c0_i32_1 : i32 to index
    %c0_2 = arith.constant 0 : index
    %8 = vector.load %arg2[%7, %c0_2] : memref<8x512xi32, #tpu.memory_space<vmem>>, vector<1x512xi32>
    %9 = vector.broadcast %3 : vector<128x1xi32> to vector<128x512xi32>
    %10 = vector.broadcast %6 : vector<1x512xi32> to vector<128x512xi32>
    %11 = arith.cmpi eq, %9, %10 : vector<128x512xi32>
    %12 = arith.extui %11 : vector<128x512xi1> to vector<128x512xi32>
    %13 = arith.sitofp %12 : vector<128x512xi32> to vector<128x512xf32>
    %14 = arith.truncf %13 : vector<128x512xf32> to vector<128x512xbf16>
    %15 = vector.broadcast %3 : vector<128x1xi32> to vector<128x512xi32>
    %16 = vector.broadcast %8 : vector<1x512xi32> to vector<128x512xi32>
    %17 = arith.cmpi eq, %15, %16 : vector<128x512xi32>
    %18 = arith.extui %17 : vector<128x512xi1> to vector<128x512xi32>
    %19 = arith.sitofp %18 : vector<128x512xi32> to vector<128x512xf32>
    %20 = arith.truncf %19 : vector<128x512xf32> to vector<128x512xbf16>
    %cst_3 = arith.constant dense<0.000000e+00> : vector<128x128xf32>
    %21 = tpu.matmul %14, %20, %cst_3 {dimension_numbers = #tpu.dot_dimension_numbers<[1], [1], [0], [0], [0, 0, 1, 0], [], []>} : vector<128x512xbf16>, vector<128x512xbf16>, vector<128x128xf32> -> vector<128x128xf32>
    %22 = arith.addf %4, %21 : vector<128x128xf32>
    %c1_i32 = arith.constant 1 : i32
    %23 = arith.index_cast %c1_i32 : i32 to index
    %c0_4 = arith.constant 0 : index
    %24 = vector.load %arg1[%23, %c0_4] : memref<8x512xi32, #tpu.memory_space<vmem>>, vector<1x512xi32>
    %25 = arith.index_cast %c1_i32 : i32 to index
    %c0_5 = arith.constant 0 : index
    %26 = vector.load %arg2[%25, %c0_5] : memref<8x512xi32, #tpu.memory_space<vmem>>, vector<1x512xi32>
    %27 = vector.broadcast %3 : vector<128x1xi32> to vector<128x512xi32>
    %28 = vector.broadcast %24 : vector<1x512xi32> to vector<128x512xi32>
    %29 = arith.cmpi eq, %27, %28 : vector<128x512xi32>
    %30 = arith.extui %29 : vector<128x512xi1> to vector<128x512xi32>
    %31 = arith.sitofp %30 : vector<128x512xi32> to vector<128x512xf32>
    %32 = arith.truncf %31 : vector<128x512xf32> to vector<128x512xbf16>
    %33 = vector.broadcast %3 : vector<128x1xi32> to vector<128x512xi32>
    %34 = vector.broadcast %26 : vector<1x512xi32> to vector<128x512xi32>
    %35 = arith.cmpi eq, %33, %34 : vector<128x512xi32>
    %36 = arith.extui %35 : vector<128x512xi1> to vector<128x512xi32>
    %37 = arith.sitofp %36 : vector<128x512xi32> to vector<128x512xf32>
    %38 = arith.truncf %37 : vector<128x512xf32> to vector<128x512xbf16>
    %cst_6 = arith.constant dense<0.000000e+00> : vector<128x128xf32>
    %39 = tpu.matmul %32, %38, %cst_6 {dimension_numbers = #tpu.dot_dimension_numbers<[1], [1], [0], [0], [0, 0, 1, 0], [], []>} : vector<128x512xbf16>, vector<128x512xbf16>, vector<128x128xf32> -> vector<128x128xf32>
    %40 = arith.addf %22, %39 : vector<128x128xf32>
    %c2_i32 = arith.constant 2 : i32
    %41 = arith.index_cast %c2_i32 : i32 to index
    %c0_7 = arith.constant 0 : index
    %42 = vector.load %arg1[%41, %c0_7] : memref<8x512xi32, #tpu.memory_space<vmem>>, vector<1x512xi32>
    %43 = arith.index_cast %c2_i32 : i32 to index
    %c0_8 = arith.constant 0 : index
    %44 = vector.load %arg2[%43, %c0_8] : memref<8x512xi32, #tpu.memory_space<vmem>>, vector<1x512xi32>
    %45 = vector.broadcast %3 : vector<128x1xi32> to vector<128x512xi32>
    %46 = vector.broadcast %42 : vector<1x512xi32> to vector<128x512xi32>
    %47 = arith.cmpi eq, %45, %46 : vector<128x512xi32>
    %48 = arith.extui %47 : vector<128x512xi1> to vector<128x512xi32>
    %49 = arith.sitofp %48 : vector<128x512xi32> to vector<128x512xf32>
    %50 = arith.truncf %49 : vector<128x512xf32> to vector<128x512xbf16>
    %51 = vector.broadcast %3 : vector<128x1xi32> to vector<128x512xi32>
    %52 = vector.broadcast %44 : vector<1x512xi32> to vector<128x512xi32>
    %53 = arith.cmpi eq, %51, %52 : vector<128x512xi32>
    %54 = arith.extui %53 : vector<128x512xi1> to vector<128x512xi32>
    %55 = arith.sitofp %54 : vector<128x512xi32> to vector<128x512xf32>
    %56 = arith.truncf %55 : vector<128x512xf32> to vector<128x512xbf16>
    %cst_9 = arith.constant dense<0.000000e+00> : vector<128x128xf32>
    %57 = tpu.matmul %50, %56, %cst_9 {dimension_numbers = #tpu.dot_dimension_numbers<[1], [1], [0], [0], [0, 0, 1, 0], [], []>} : vector<128x512xbf16>, vector<128x512xbf16>, vector<128x128xf32> -> vector<128x128xf32>
    %58 = arith.addf %40, %57 : vector<128x128xf32>
    %c3_i32 = arith.constant 3 : i32
    %59 = arith.index_cast %c3_i32 : i32 to index
    %c0_10 = arith.constant 0 : index
    %60 = vector.load %arg1[%59, %c0_10] : memref<8x512xi32, #tpu.memory_space<vmem>>, vector<1x512xi32>
    %61 = arith.index_cast %c3_i32 : i32 to index
    %c0_11 = arith.constant 0 : index
    %62 = vector.load %arg2[%61, %c0_11] : memref<8x512xi32, #tpu.memory_space<vmem>>, vector<1x512xi32>
    %63 = vector.broadcast %3 : vector<128x1xi32> to vector<128x512xi32>
    %64 = vector.broadcast %60 : vector<1x512xi32> to vector<128x512xi32>
    %65 = arith.cmpi eq, %63, %64 : vector<128x512xi32>
    %66 = arith.extui %65 : vector<128x512xi1> to vector<128x512xi32>
    %67 = arith.sitofp %66 : vector<128x512xi32> to vector<128x512xf32>
    %68 = arith.truncf %67 : vector<128x512xf32> to vector<128x512xbf16>
    %69 = vector.broadcast %3 : vector<128x1xi32> to vector<128x512xi32>
    %70 = vector.broadcast %62 : vector<1x512xi32> to vector<128x512xi32>
    %71 = arith.cmpi eq, %69, %70 : vector<128x512xi32>
    %72 = arith.extui %71 : vector<128x512xi1> to vector<128x512xi32>
    %73 = arith.sitofp %72 : vector<128x512xi32> to vector<128x512xf32>
    %74 = arith.truncf %73 : vector<128x512xf32> to vector<128x512xbf16>
    %cst_12 = arith.constant dense<0.000000e+00> : vector<128x128xf32>
    %75 = tpu.matmul %68, %74, %cst_12 {dimension_numbers = #tpu.dot_dimension_numbers<[1], [1], [0], [0], [0, 0, 1, 0], [], []>} : vector<128x512xbf16>, vector<128x512xbf16>, vector<128x128xf32> -> vector<128x128xf32>
    %76 = arith.addf %58, %75 : vector<128x128xf32>
    %c4_i32 = arith.constant 4 : i32
    %77 = arith.index_cast %c4_i32 : i32 to index
    %c0_13 = arith.constant 0 : index
    %78 = vector.load %arg1[%77, %c0_13] : memref<8x512xi32, #tpu.memory_space<vmem>>, vector<1x512xi32>
    %79 = arith.index_cast %c4_i32 : i32 to index
    %c0_14 = arith.constant 0 : index
    %80 = vector.load %arg2[%79, %c0_14] : memref<8x512xi32, #tpu.memory_space<vmem>>, vector<1x512xi32>
    %81 = vector.broadcast %3 : vector<128x1xi32> to vector<128x512xi32>
    %82 = vector.broadcast %78 : vector<1x512xi32> to vector<128x512xi32>
    %83 = arith.cmpi eq, %81, %82 : vector<128x512xi32>
    %84 = arith.extui %83 : vector<128x512xi1> to vector<128x512xi32>
    %85 = arith.sitofp %84 : vector<128x512xi32> to vector<128x512xf32>
    %86 = arith.truncf %85 : vector<128x512xf32> to vector<128x512xbf16>
    %87 = vector.broadcast %3 : vector<128x1xi32> to vector<128x512xi32>
    %88 = vector.broadcast %80 : vector<1x512xi32> to vector<128x512xi32>
    %89 = arith.cmpi eq, %87, %88 : vector<128x512xi32>
    %90 = arith.extui %89 : vector<128x512xi1> to vector<128x512xi32>
    %91 = arith.sitofp %90 : vector<128x512xi32> to vector<128x512xf32>
    %92 = arith.truncf %91 : vector<128x512xf32> to vector<128x512xbf16>
    %cst_15 = arith.constant dense<0.000000e+00> : vector<128x128xf32>
    %93 = tpu.matmul %86, %92, %cst_15 {dimension_numbers = #tpu.dot_dimension_numbers<[1], [1], [0], [0], [0, 0, 1, 0], [], []>} : vector<128x512xbf16>, vector<128x512xbf16>, vector<128x128xf32> -> vector<128x128xf32>
    %94 = arith.addf %76, %93 : vector<128x128xf32>
    %c5_i32 = arith.constant 5 : i32
    %95 = arith.index_cast %c5_i32 : i32 to index
    %c0_16 = arith.constant 0 : index
    %96 = vector.load %arg1[%95, %c0_16] : memref<8x512xi32, #tpu.memory_space<vmem>>, vector<1x512xi32>
    %97 = arith.index_cast %c5_i32 : i32 to index
    %c0_17 = arith.constant 0 : index
    %98 = vector.load %arg2[%97, %c0_17] : memref<8x512xi32, #tpu.memory_space<vmem>>, vector<1x512xi32>
    %99 = vector.broadcast %3 : vector<128x1xi32> to vector<128x512xi32>
    %100 = vector.broadcast %96 : vector<1x512xi32> to vector<128x512xi32>
    %101 = arith.cmpi eq, %99, %100 : vector<128x512xi32>
    %102 = arith.extui %101 : vector<128x512xi1> to vector<128x512xi32>
    %103 = arith.sitofp %102 : vector<128x512xi32> to vector<128x512xf32>
    %104 = arith.truncf %103 : vector<128x512xf32> to vector<128x512xbf16>
    %105 = vector.broadcast %3 : vector<128x1xi32> to vector<128x512xi32>
    %106 = vector.broadcast %98 : vector<1x512xi32> to vector<128x512xi32>
    %107 = arith.cmpi eq, %105, %106 : vector<128x512xi32>
    %108 = arith.extui %107 : vector<128x512xi1> to vector<128x512xi32>
    %109 = arith.sitofp %108 : vector<128x512xi32> to vector<128x512xf32>
    %110 = arith.truncf %109 : vector<128x512xf32> to vector<128x512xbf16>
    %cst_18 = arith.constant dense<0.000000e+00> : vector<128x128xf32>
    %111 = tpu.matmul %104, %110, %cst_18 {dimension_numbers = #tpu.dot_dimension_numbers<[1], [1], [0], [0], [0, 0, 1, 0], [], []>} : vector<128x512xbf16>, vector<128x512xbf16>, vector<128x128xf32> -> vector<128x128xf32>
    %112 = arith.addf %94, %111 : vector<128x128xf32>
    %c6_i32 = arith.constant 6 : i32
    %113 = arith.index_cast %c6_i32 : i32 to index
    %c0_19 = arith.constant 0 : index
    %114 = vector.load %arg1[%113, %c0_19] : memref<8x512xi32, #tpu.memory_space<vmem>>, vector<1x512xi32>
    %115 = arith.index_cast %c6_i32 : i32 to index
    %c0_20 = arith.constant 0 : index
    %116 = vector.load %arg2[%115, %c0_20] : memref<8x512xi32, #tpu.memory_space<vmem>>, vector<1x512xi32>
    %117 = vector.broadcast %3 : vector<128x1xi32> to vector<128x512xi32>
    %118 = vector.broadcast %114 : vector<1x512xi32> to vector<128x512xi32>
    %119 = arith.cmpi eq, %117, %118 : vector<128x512xi32>
    %120 = arith.extui %119 : vector<128x512xi1> to vector<128x512xi32>
    %121 = arith.sitofp %120 : vector<128x512xi32> to vector<128x512xf32>
    %122 = arith.truncf %121 : vector<128x512xf32> to vector<128x512xbf16>
    %123 = vector.broadcast %3 : vector<128x1xi32> to vector<128x512xi32>
    %124 = vector.broadcast %116 : vector<1x512xi32> to vector<128x512xi32>
    %125 = arith.cmpi eq, %123, %124 : vector<128x512xi32>
    %126 = arith.extui %125 : vector<128x512xi1> to vector<128x512xi32>
    %127 = arith.sitofp %126 : vector<128x512xi32> to vector<128x512xf32>
    %128 = arith.truncf %127 : vector<128x512xf32> to vector<128x512xbf16>
    %cst_21 = arith.constant dense<0.000000e+00> : vector<128x128xf32>
    %129 = tpu.matmul %122, %128, %cst_21 {dimension_numbers = #tpu.dot_dimension_numbers<[1], [1], [0], [0], [0, 0, 1, 0], [], []>} : vector<128x512xbf16>, vector<128x512xbf16>, vector<128x128xf32> -> vector<128x128xf32>
    %130 = arith.addf %112, %129 : vector<128x128xf32>
    %c7_i32 = arith.constant 7 : i32
    %131 = arith.index_cast %c7_i32 : i32 to index
    %c0_22 = arith.constant 0 : index
    %132 = vector.load %arg1[%131, %c0_22] : memref<8x512xi32, #tpu.memory_space<vmem>>, vector<1x512xi32>
    %133 = arith.index_cast %c7_i32 : i32 to index
    %c0_23 = arith.constant 0 : index
    %134 = vector.load %arg2[%133, %c0_23] : memref<8x512xi32, #tpu.memory_space<vmem>>, vector<1x512xi32>
    %135 = vector.broadcast %3 : vector<128x1xi32> to vector<128x512xi32>
    %136 = vector.broadcast %132 : vector<1x512xi32> to vector<128x512xi32>
    %137 = arith.cmpi eq, %135, %136 : vector<128x512xi32>
    %138 = arith.extui %137 : vector<128x512xi1> to vector<128x512xi32>
    %139 = arith.sitofp %138 : vector<128x512xi32> to vector<128x512xf32>
    %140 = arith.truncf %139 : vector<128x512xf32> to vector<128x512xbf16>
    %141 = vector.broadcast %3 : vector<128x1xi32> to vector<128x512xi32>
    %142 = vector.broadcast %134 : vector<1x512xi32> to vector<128x512xi32>
    %143 = arith.cmpi eq, %141, %142 : vector<128x512xi32>
    %144 = arith.extui %143 : vector<128x512xi1> to vector<128x512xi32>
    %145 = arith.sitofp %144 : vector<128x512xi32> to vector<128x512xf32>
    %146 = arith.truncf %145 : vector<128x512xf32> to vector<128x512xbf16>
    %cst_24 = arith.constant dense<0.000000e+00> : vector<128x128xf32>
    %147 = tpu.matmul %140, %146, %cst_24 {dimension_numbers = #tpu.dot_dimension_numbers<[1], [1], [0], [0], [0, 0, 1, 0], [], []>} : vector<128x512xbf16>, vector<128x512xbf16>, vector<128x128xf32> -> vector<128x128xf32>
    %148 = arith.addf %130, %147 : vector<128x128xf32>
    %c8_i32 = arith.constant 8 : i32
    %c0_25 = arith.constant 0 : index
    %c0_26 = arith.constant 0 : index
    %149 = vector.load %arg3[%c0_25, %c0_26] : memref<128x128xi32, #tpu.memory_space<vmem>>, vector<128x128xi32>
    %150 = arith.fptosi %148 : vector<128x128xf32> to vector<128x128xi32>
    %151 = arith.addi %149, %150 : vector<128x128xi32>
    %c0_27 = arith.constant 0 : index
    %c0_28 = arith.constant 0 : index
    %152 = vector.load %arg3[%c0_27, %c0_28] : memref<128x128xi32, #tpu.memory_space<vmem>>, vector<128x128xi32>
    tpu.vector_store %arg3[%c0_27, %c0_28], %151 {strides = array<i32>} : memref<128x128xi32, #tpu.memory_space<vmem>>, vector<128x128xi32>,
    return
  }
  func.func @transform_0(%arg0: i32) -> (i32, i32) {
    %c0_i32 = arith.constant 0 : i32
    %c0_i32_0 = arith.constant 0 : i32
    return %arg0, %c0_i32 : i32, i32
  }
  func.func @transform_1(%arg0: i32) -> (i32, i32) {
    %c0_i32 = arith.constant 0 : i32
    %c0_i32_0 = arith.constant 0 : i32
    return %arg0, %c0_i32 : i32, i32
  }
  func.func @transform_2(%arg0: i32) -> (i32, i32) {
    %c0_i32 = arith.constant 0 : i32
    %c0_i32_0 = arith.constant 0 : i32
    %c0_i32_1 = arith.constant 0 : i32
    return %c0_i32, %c0_i32_0 : i32, i32
  }
}

</mosaic_0001>

<bundles_post_ra>
// kernel: obj_dice_loss.1
= control target key start
LH: loop header
LB: loop body
LE: loop exit
PB: predicated region body
PF: predicated region fallthrough
CT: control target
= control target key end

     0   :  { %v32_v0 = vlaneseq  ;;  %v7731_v15 = vmov 1.0|1.0   ;;  %v14458_v43 = vmov 0  ;;  %v14471_v49 = vmov 0  ;;  %s14443_s1 = inlined_call_operand.vmem [shape: s32[8,512], index: 1, kind: input, shape index: {}]   ;;  %s14444_s0 = inlined_call_operand.vmem [shape: s32[8,512], index: 0, kind: input, shape index: {}]   ;;  %s14445_s2 = inlined_call_operand.vmem [shape: s32[128,128], index: 2, kind: output, shape index: {}]  }
   0x1   :  { %v5764_v2 = vld [vmem:[%s14443_s1 + $0x1] ss:$8 sm:$0xf]  ;;  %v50_v31 = vld [vmem:[%s14443_s1] ss:$8 sm:$0xf] }
   0x2   :  { %v7747_v1 = vshrl.u32 %v32_v0, 7  ;;  %v7891_v22 = vld [vmem:[%s14444_s0 + $0x1] ss:$8 sm:$0xf]  ;;  %v14484_v55 = vmov 0  ;;  %v14497_v61 = vmov 0 }
   0x3   :  { %v14523_v38 = vmov 0  ;;  %v49_v42 = vld [vmem:[%s14444_s0] ss:$8 sm:$0xf]  ;;  %v14552_v54 = vmov 0  ;;  %v14565_v60 = vmov 0 }
   0x4   :  { %v7753_v3 = vadd.s32 112, %v7747_v1  ;;  %v7756_v4 = vadd.s32 120, %v7747_v1  ;;  %v7759_v5 = vsub.s32 1, %v7747_v1  ;;  %v7762_v6 = vsub.s32 3, %v7747_v1 }
   0x5   :  { %v7765_v7 = vsub.s32 0, %v7747_v1  ;;  %v7768_v8 = vsub.s32 2, %v7747_v1  ;;  %v7777_v11 = vadd.s32 96, %v7747_v1  ;;  %v7780_v12 = vadd.s32 104, %v7747_v1 }
   0x6   :  { %v7771_v9 = vrot.slane %v5764_v2, %v7759_v5  ;;  %v7774_v10 = vrot.slane %v5764_v2, %v7762_v6  ;;  %v7815_v16 = vadd.s32 80, %v7747_v1  ;;  %v7818_v17 = vadd.s32 88, %v7747_v1  ;;  %v6149_v59 = vld [vmem:[%s14444_s0 + $0x2] ss:$8 sm:$0xf] }
   0x7   :  { %v7783_v13 = vrot.slane %v5764_v2, %v7765_v7  ;;  %v7786_v14 = vrot.slane %v5764_v2, %v7768_v8  ;;  %v7841_v18 = vadd.s32 64, %v7747_v1  ;;  %v7844_v19 = vadd.s32 72, %v7747_v1  ;;  %v6407_v41 = vld [vmem:[%s14444_s0 + $0x3] ss:$8 sm:$0xf] }
   0x8   :  { %vm848_vm0 = vcmp.eq.s32.totalorder %v7753_v3, %v7771_v9  ;;  %vm852_vm1 = vcmp.eq.s32.totalorder %v7756_v4, %v7771_v9  ;;  %vm850_vm2 = vcmp.eq.s32.totalorder %v7753_v3, %v7774_v10  ;;  %vm854_vm3 = vcmp.eq.s32.totalorder %v7756_v4, %v7774_v10 }
   0x9   :  { %vm5893_vm4 = vmpackc.low %vm852_vm1, %vm848_vm0  ;;  %vm847_vm5 = vcmp.eq.s32.totalorder %v7753_v3, %v7783_v13  ;;  %vm851_vm6 = vcmp.eq.s32.totalorder %v7756_v4, %v7783_v13  ;;  %vm849_vm7 = vcmp.eq.s32.totalorder %v7753_v3, %v7786_v14  ;;  %vm853_vm8 = vcmp.eq.s32.totalorder %v7756_v4, %v7786_v14 }
   0xa   :  { %5894 = vmatprep.subr.msk.bf16.mxu0 %vm5893_vm4, %v7731_v15  ;;  %vm5957_vm9 = vmpackc.low %vm854_vm3, %vm850_vm2  ;;  %vm840_vm10 = vcmp.eq.s32.totalorder %v7777_v11, %v7771_v9  ;;  %vm844_vm11 = vcmp.eq.s32.totalorder %v7780_v12, %v7771_v9  ;;  %vm842_vm13 = vcmp.eq.s32.totalorder %v7777_v11, %v7774_v10  ;;  %vm846_vm14 = vcmp.eq.s32.totalorder %v7780_v12, %v7774_v10 }
   0xb   :  { %5958 = vmatprep.subr.msk.bf16.mxu1 %vm5957_vm9, %v7731_v15  ;;  %vm5895_vm12 = vmpackc.low %vm851_vm6, %vm847_vm5  ;;  %vm839_vm1 = vcmp.eq.s32.totalorder %v7777_v11, %v7783_v13  ;;  %vm843_vm2 = vcmp.eq.s32.totalorder %v7780_v12, %v7783_v13  ;;  %vm841_vm4 = vcmp.eq.s32.totalorder %v7777_v11, %v7786_v14  ;;  %vm845_vm5 = vcmp.eq.s32.totalorder %v7780_v12, %v7786_v14 }
   0xc   :  { %5896 = vmatpush1.bf16.xpose.msk.msra.mxu0 %vm5895_vm12, %v7731_v15  ;;  %vm5959_vm15 = vmpackc.low %vm853_vm8, %vm849_vm7  ;;  %vm832_vm6 = vcmp.eq.s32.totalorder %v7815_v16, %v7771_v9  ;;  %vm836_vm7 = vcmp.eq.s32.totalorder %v7818_v17, %v7771_v9  ;;  %vm834_vm9 = vcmp.eq.s32.totalorder %v7815_v16, %v7774_v10  ;;  %v7867_v20 = vadd.s32 48, %v7747_v1 }
   0xd   :  { %5960 = vmatpush1.bf16.xpose.msk.msra.mxu1 %vm5959_vm15, %v7731_v15  ;;  %vm5897_vm0 = vmpackc.low %vm844_vm11, %vm840_vm10  ;;  %vm838_vm10 = vcmp.eq.s32.totalorder %v7818_v17, %v7774_v10  ;;  %vm835_vm15 = vcmp.eq.s32.totalorder %v7818_v17, %v7783_v13  ;;  %v7870_v21 = vadd.s32 56, %v7747_v1  ;;  %v7898_v23 = vadd.s32 32, %v7747_v1 }
   0xe   :  { %5898 = vmatprep.subr.msk.bf16.mxu0 %vm5897_vm0, %v7731_v15  ;;  %vm5961_vm3 = vmpackc.low %vm846_vm14, %vm842_vm13  ;;  %vm831_vm14 = vcmp.eq.s32.totalorder %v7815_v16, %v7783_v13  ;;  %vm833_vm0 = vcmp.eq.s32.totalorder %v7815_v16, %v7786_v14  ;;  %v7901_v24 = vadd.s32 40, %v7747_v1  ;;  %v7905_v25 = vrot.slane %v7891_v22, %v7759_v5 }
   0xf   :  { %5962 = vmatprep.subr.msk.bf16.mxu1 %vm5961_vm3, %v7731_v15  ;;  %vm5899_vm8 = vmpackc.low %vm843_vm2, %vm839_vm1  ;;  %vm837_vm1 = vcmp.eq.s32.totalorder %v7818_v17, %v7786_v14  ;;  %vm824_vm2 = vcmp.eq.s32.totalorder %v7841_v18, %v7771_v9  ;;  %vm828_vm3 = vcmp.eq.s32.totalorder %v7844_v19, %v7771_v9  ;;  %v7913_v26 = vrot.slane %v7891_v22, %v7762_v6 }
  0x10   :  { %vm5963_vm11 = vmpackc.low %vm845_vm5, %vm841_vm4  ;;  %vm826_vm5 = vcmp.eq.s32.totalorder %v7841_v18, %v7774_v10  ;;  %v7921_v27 = vadd.s32 8, %v7747_v1  ;;  %v7948_v29 = vadd.s32 16, %v7747_v1  ;;  %v7951_v30 = vadd.s32 24, %v7747_v1 }
  0x11   :  { %vm5901_vm12 = vmpackc.low %vm836_vm7, %vm832_vm6  ;;  %vm830_vm6 = vcmp.eq.s32.totalorder %v7844_v19, %v7774_v10  ;;  %v8000_v32 = vrot.slane %v50_v31, %v7759_v5  ;;  %v8004_v33 = vrot.slane %v50_v31, %v7762_v6  ;;  %v8019_v34 = vrot.slane %v7891_v22, %v7765_v7 }
  0x12   :  { %vm5965_vm13 = vmpackc.low %vm838_vm10, %vm834_vm9  ;;  %vm823_vm10 = vcmp.eq.s32.totalorder %v7841_v18, %v7783_v13  ;;  %v8023_v35 = vrot.slane %v7891_v22, %v7768_v8  ;;  %v8034_v36 = vrot.slane %v50_v31, %v7765_v7  ;;  %v8037_v37 = vrot.slane %v50_v31, %v7768_v8 }
  0x13   :  { %vm5903_vm4 = vmpackc.low %vm835_vm15, %vm831_vm14  ;;  %vm816_vm14 = vcmp.eq.s32.totalorder %v7867_v20, %v7771_v9  ;;  %vm820_vm15 = vcmp.eq.s32.totalorder %v7870_v21, %v7771_v9  ;;  %v8580_v45 = vrot.slane %v49_v42, %v7762_v6  ;;  %v8663_v50 = vrot.slane %v49_v42, %v7768_v8 }
  0x14   :  { %5900 = vmatpush1.bf16.xpose.msk.msra.mxu0 %vm5899_vm8, %v7731_v15  ;;  %vm5967_vm7 = vmpackc.low %vm837_vm1, %vm833_vm0  ;;  %vm818_vm1 = vcmp.eq.s32.totalorder %v7867_v20, %v7774_v10  ;;  %v14591_v31 = vmov 0  ;;  %v14617_v48 = vmov 0  ;;  %v9248_v62 = vrot.slane %v6149_v59, %v7762_v6 }
  0x15   :  { %5964 = vmatpush1.bf16.xpose.msk.msra.mxu1 %vm5963_vm11, %v7731_v15  ;;  %5902 = vmatprep.subr.msk.bf16.mxu0 %vm5901_vm12, %v7731_v15  ;;  %vm5905_vm8 = vmpackc.low %vm828_vm3, %vm824_vm2  ;;  %vm827_vm11 = vcmp.eq.s32.totalorder %v7844_v19, %v7783_v13  ;;  %vm825_vm12 = vcmp.eq.s32.totalorder %v7841_v18, %v7786_v14  ;;  %vm822_vm2 = vcmp.eq.s32.totalorder %v7870_v21, %v7774_v10  ;;  %v14659_v28 = vmov 0 }
  0x16   :  { %5966 = vmatprep.subr.msk.bf16.mxu1 %vm5965_vm13, %v7731_v15  ;;  %vm5969_vm9 = vmpackc.low %vm830_vm6, %vm826_vm5  ;;  %vm829_vm13 = vcmp.eq.s32.totalorder %v7844_v19, %v7786_v14  ;;  %vm815_vm6 = vcmp.eq.s32.totalorder %v7867_v20, %v7783_v13  ;;  %v14685_v46 = vmov 0  ;;  %v14724_v2 = vmov 0 }
  0x17   :  { %vm5907_vm0 = vmpackc.low %vm827_vm11, %vm823_vm10  ;;  %vm808_vm10 = vcmp.eq.s32.totalorder %v7898_v23, %v7771_v9  ;;  %vm812_vm11 = vcmp.eq.s32.totalorder %v7901_v24, %v7771_v9  ;;  %v14766_v52 = vmov 0 }
  0x18   :  { %vm5971_vm3 = vmpackc.low %vm829_vm13, %vm825_vm12  ;;  %vm552_vm13 = vcmp.eq.s32.totalorder %v7747_v1, %v7905_v25 }
  0x19   :  { %vm5973_vm5 = vmpackc.low %vm822_vm2, %vm818_vm1  ;;  %vm558_vm1 = vcmp.eq.s32.totalorder %v7921_v27, %v7913_v26 }
  0x1a   :  { %vm5913_vm2 = vmpackc.low %vm812_vm11, %vm808_vm10  ;;  %vm809_vm10 = vcmp.eq.s32.totalorder %v7898_v23, %v7786_v14  ;;  %vm813_vm11 = vcmp.eq.s32.totalorder %v7901_v24, %v7786_v14 }
  0x1c   :  { %5904 = vmatpush1.bf16.xpose.msk.msra.mxu0 %vm5903_vm4, %v7731_v15  ;;  %vm5909_vm4 = vmpackc.low %vm820_vm15, %vm816_vm14  ;;  %vm556_vm14 = vcmp.eq.s32.totalorder %v7921_v27, %v7905_v25 }
  0x1d   :  { %5968 = vmatpush1.bf16.xpose.msk.msra.mxu1 %vm5967_vm7, %v7731_v15  ;;  %5906 = vmatprep.subr.msk.bf16.mxu0 %vm5905_vm8, %v7731_v15  ;;  %vm819_vm7 = vcmp.eq.s32.totalorder %v7870_v21, %v7783_v13  ;;  %vm817_vm8 = vcmp.eq.s32.totalorder %v7867_v20, %v7786_v14 }
  0x1e   :  { %5970 = vmatprep.subr.msk.bf16.mxu1 %vm5969_vm9, %v7731_v15  ;;  %vm821_vm9 = vcmp.eq.s32.totalorder %v7870_v21, %v7786_v14  ;;  %vm7930_vm12 = vmpackc.low %vm819_vm7, %vm815_vm6 }
  0x1f   :  { %vm5975_vm15 = vmpackc.low %vm821_vm9, %vm817_vm8  ;;  %vm807_vm8 = vcmp.eq.s32.totalorder %v7898_v23, %v7783_v13  ;;  %vm811_vm9 = vcmp.eq.s32.totalorder %v7901_v24, %v7783_v13 }
  0x24   :  { %5908 = vmatpush1.bf16.xpose.msk.msra.mxu0 %vm5907_vm0, %v7731_v15  ;;  %vm554_vm0 = vcmp.eq.s32.totalorder %v7747_v1, %v7913_v26 }
  0x25   :  { %5972 = vmatpush1.bf16.xpose.msk.msra.mxu1 %vm5971_vm3, %v7731_v15  ;;  %5910 = vmatprep.subr.msk.bf16.mxu0 %vm5909_vm4, %v7731_v15  ;;  %vm810_vm3 = vcmp.eq.s32.totalorder %v7898_v23, %v7774_v10  ;;  %vm814_vm4 = vcmp.eq.s32.totalorder %v7901_v24, %v7774_v10  ;;  %vm5989_vm6 = vmpackc.low %vm558_vm1, %vm554_vm0  ;;  %vm806_vm0 = vcmp.eq.s32.totalorder %v7951_v30, %v7774_v10 }
  0x26   :  { %5974 = vmatprep.subr.msk.bf16.mxu1 %vm5973_vm5, %v7731_v15  ;;  %vm5925_vm5 = vmpackc.low %vm556_vm14, %vm552_vm13  ;;  %5990 = vmatprep.mubr.msk.bf16.mxu1 %vm5989_vm6, %v7731_v15  ;;  %vm804_vm13 = vcmp.eq.s32.totalorder %v7951_v30, %v7771_v9  ;;  %vm801_vm6 = vcmp.eq.s32.totalorder %v7948_v29, %v7786_v14 }
  0x27   :  { %5926 = vmatprep.mubr.msk.bf16.mxu0 %vm5925_vm5, %v7731_v15  ;;  %vm5977_vm7 = vmpackc.low %vm814_vm4, %vm810_vm3  ;;  %vm799_vm4 = vcmp.eq.s32.totalorder %v7948_v29, %v7783_v13  ;;  %vm803_vm5 = vcmp.eq.s32.totalorder %v7951_v30, %v7783_v13 }
  0x28   :  { %vm5915_vm14 = vmpackc.low %vm811_vm9, %vm807_vm8  ;;  %vm792_vm8 = vcmp.eq.s32.totalorder %v7747_v1, %v7771_v9  ;;  %vm796_vm9 = vcmp.eq.s32.totalorder %v7921_v27, %v7771_v9 }
  0x29   :  { %vm5979_vm1 = vmpackc.low %vm813_vm11, %vm809_vm10  ;;  %vm794_vm11 = vcmp.eq.s32.totalorder %v7747_v1, %v7774_v10 }
  0x2a   :  { %vm5919_vm10 = vmpackc.low %vm803_vm5, %vm799_vm4  ;;  %vm364_vm4 = vcmp.eq.s32.totalorder %v7753_v3, %v8000_v32  ;;  %vm368_vm5 = vcmp.eq.s32.totalorder %v7756_v4, %v8000_v32 }
  0x2c   :  { %5912 = vmatpush1.bf16.xpose.msk.msra.mxu0 %vm7930_vm12, %v7731_v15  ;;  %vm800_vm12 = vcmp.eq.s32.totalorder %v7948_v29, %v7771_v9  ;;  %v14578_v9 = vmov 0 }
  0x2d   :  { %5976 = vmatpush1.bf16.xpose.msk.msra.mxu1 %vm5975_vm15, %v7731_v15  ;;  %5914 = vmatprep.subr.msk.bf16.mxu0 %vm5913_vm2, %v7731_v15  ;;  %vm802_vm15 = vcmp.eq.s32.totalorder %v7948_v29, %v7774_v10  ;;  %vm5917_vm2 = vmpackc.low %vm804_vm13, %vm800_vm12  ;;  %vm798_vm12 = vcmp.eq.s32.totalorder %v7921_v27, %v7774_v10  ;;  %v14510_v10 = vmov 0 }
  0x2e   :  { %5978 = vmatprep.subr.msk.bf16.mxu1 %vm5977_vm7, %v7731_v15  ;;  %vm5981_vm3 = vmpackc.low %vm806_vm0, %vm802_vm15  ;;  %vm805_vm7 = vcmp.eq.s32.totalorder %v7951_v30, %v7786_v14  ;;  %vm791_vm0 = vcmp.eq.s32.totalorder %v7747_v1, %v7783_v13 }
  0x2f   :  { %vm5983_vm13 = vmpackc.low %vm805_vm7, %vm801_vm6  ;;  %vm366_vm7 = vcmp.eq.s32.totalorder %v7753_v3, %v8004_v33 }
  0x30   :  { %vm5985_vm15 = vmpackc.low %vm798_vm12, %vm794_vm11  ;;  %vm555_vm11 = vcmp.eq.s32.totalorder %v7921_v27, %v8019_v34 }
  0x31   :  { %vm6021_vm12 = vmpackc.low %vm368_vm5, %vm364_vm4  ;;  %vm369_vm4 = vcmp.eq.s32.totalorder %v7756_v4, %v8037_v37 }
  0x34   :  { %5916 = vmatpush1.bf16.xpose.msk.msra.mxu0 %vm5915_vm14, %v7731_v15  ;;  %vm5921_vm14 = vmpackc.low %vm796_vm9, %vm792_vm8  ;;  %vm370_vm8 = vcmp.eq.s32.totalorder %v7756_v4, %v8004_v33 }
  0x35   :  { %5980 = vmatpush1.bf16.xpose.msk.msra.mxu1 %vm5979_vm1, %v7731_v15  ;;  %5918 = vmatprep.subr.msk.bf16.mxu0 %vm5917_vm2, %v7731_v15  ;;  %vm795_vm1 = vcmp.eq.s32.totalorder %v7921_v27, %v7783_v13  ;;  %vm793_vm2 = vcmp.eq.s32.totalorder %v7747_v1, %v7786_v14 }
  0x36   :  { %5982 = vmatprep.subr.msk.bf16.mxu1 %vm5981_vm3, %v7731_v15  ;;  %vm797_vm3 = vcmp.eq.s32.totalorder %v7921_v27, %v7786_v14  ;;  %vm5923_vm6 = vmpackc.low %vm795_vm1, %vm791_vm0  ;;  %vm363_vm0 = vcmp.eq.s32.totalorder %v7753_v3, %v8034_v36  ;;  %vm367_vm1 = vcmp.eq.s32.totalorder %v7756_v4, %v8034_v36 }
  0x37   :  { %vm5987_vm9 = vmpackc.low %vm797_vm3, %vm793_vm2  ;;  %vm365_vm3 = vcmp.eq.s32.totalorder %v7753_v3, %v8037_v37 }
  0x3c   :  { %5920 = vmatpush1.bf16.xpose.msk.msra.mxu0 %vm5919_vm10, %v7731_v15  ;;  %vm551_vm10 = vcmp.eq.s32.totalorder %v7747_v1, %v8019_v34 }
  0x3d   :  { %5984 = vmatpush1.bf16.xpose.msk.msra.mxu1 %vm5983_vm13, %v7731_v15  ;;  %5922 = vmatprep.subr.msk.bf16.mxu0 %vm5921_vm14, %v7731_v15  ;;  %vm553_vm13 = vcmp.eq.s32.totalorder %v7747_v1, %v8023_v35  ;;  %vm557_vm14 = vcmp.eq.s32.totalorder %v7921_v27, %v8023_v35  ;;  %vm8053_vm2 = vmpackc.low %vm555_vm11, %vm551_vm10  ;;  %vm566_vm10 = vcmp.eq.s32.totalorder %v7951_v30, %v7913_v26 }
  0x3e   :  { %5986 = vmatprep.subr.msk.bf16.mxu1 %vm5985_vm15, %v7731_v15  ;;  %vm6085_vm15 = vmpackc.low %vm370_vm8, %vm366_vm7  ;;  %vm564_vm7 = vcmp.eq.s32.totalorder %v7951_v30, %v7905_v25 }
  0x3f   :  { %vm8062_vm5 = vmpackc.low %vm557_vm14, %vm553_vm13  ;;  %vm360_vm13 = vcmp.eq.s32.totalorder %v7780_v12, %v8000_v32 }
  0x40   :  { %vm8071_vm8 = vmpackc.low %vm367_vm1, %vm363_vm0  ;;  %vm362_vm0 = vcmp.eq.s32.totalorder %v7780_v12, %v8004_v33 }
  0x41   :  { %vm8079_vm11 = vmpackc.low %vm369_vm4, %vm365_vm3  ;;  %vm559_vm3 = vcmp.eq.s32.totalorder %v7948_v29, %v8019_v34  ;;  %vm563_vm4 = vcmp.eq.s32.totalorder %v7951_v30, %v8019_v34 }
  0x44   :  { %5924 = vmatpush1.bf16.xpose.msk.msra.mxu0 %vm5923_vm6, %v7731_v15  ;;  %vm560_vm6 = vcmp.eq.s32.totalorder %v7948_v29, %v7905_v25 }
  0x45   :  { %5988 = vmatpush1.bf16.xpose.msk.msra.mxu1 %vm5987_vm9, %v7731_v15  ;;  %6022 = vmatprep.subr.msk.bf16.mxu0 %vm6021_vm12, %v7731_v15  ;;  %vm562_vm9 = vcmp.eq.s32.totalorder %v7948_v29, %v7913_v26  ;;  %vm356_vm12 = vcmp.eq.s32.totalorder %v7777_v11, %v8000_v32  ;;  %vm8087_vm14 = vmpackc.low %vm564_vm7, %vm560_vm6  ;;  %vm561_vm6 = vcmp.eq.s32.totalorder %v7948_v29, %v8023_v35 }
  0x46   :  { %6086 = vmatprep.subr.msk.bf16.mxu1 %vm6085_vm15, %v7731_v15  ;;  %vm358_vm15 = vcmp.eq.s32.totalorder %v7777_v11, %v8004_v33  ;;  %vm8095_vm1 = vmpackc.low %vm566_vm10, %vm562_vm9  ;;  %vm565_vm7 = vcmp.eq.s32.totalorder %v7951_v30, %v8023_v35 }
  0x47   :  { %v14459_v43 = vsel %vm8095_vm1, 4294967295, %v14458_v43  ;;  %vm6025_vm9 = vmpackc.low %vm360_vm13, %vm356_vm12  ;;  %vm355_vm1 = vcmp.eq.s32.totalorder %v7777_v11, %v8034_v36  ;;  %vm361_vm12 = vcmp.eq.s32.totalorder %v7780_v12, %v8037_v37 }
  0x48   :  { %vm6089_vm10 = vmpackc.low %vm362_vm0, %vm358_vm15  ;;  %vm14462_vm13 = vnez %v14459_v43  ;;  %v14604_v43 = vmov 0 }
  0x49   :  { %vm8137_vm15 = vmpackc.low %vm565_vm7, %vm561_vm6  ;;  %vm348_vm7 = vcmp.eq.s32.totalorder %v7815_v16, %v8000_v32 }
  0x4b   :  { %5928 = vmatmul.mubr.msk.bf16.vlgmr.msra.gmra.mxu0 %vm8053_vm2, %v7731_v15  ;;  %vm359_vm2 = vcmp.eq.s32.totalorder %v7780_v12, %v8034_v36 }
  0x4c   :  { %5992 = vmatmul.mubr.msk.bf16.vlgmr.msra.gmra.mxu1 %vm8062_vm5, %v7731_v15  ;;  %6024 = vmatpush1.bf16.xpose.msk.msra.mxu0 %vm8071_vm8, %v7731_v15  ;;  %vm8126_vm5 = vmpackc.low %vm563_vm4, %vm559_vm3  ;;  %vm357_vm8 = vcmp.eq.s32.totalorder %v7777_v11, %v8037_v37  ;;  %vm570_vm3 = vcmp.eq.s32.totalorder %v7898_v23, %v7913_v26  ;;  %vm574_vm4 = vcmp.eq.s32.totalorder %v7901_v24, %v7913_v26 }
  0x4d   :  { %6088 = vmatpush1.bf16.xpose.msk.msra.mxu1 %vm8079_vm11, %v7731_v15  ;;  %5930 = vmatprep.mubr.msk.bf16.mxu0 %vm8087_vm14, %v7731_v15  ;;  %vm568_vm11 = vcmp.eq.s32.totalorder %v7898_v23, %v7905_v25  ;;  %vm572_vm14 = vcmp.eq.s32.totalorder %v7901_v24, %v7905_v25  ;;  %vm8147_vm0 = vmpackc.low %vm359_vm2, %vm355_vm1  ;;  %vm354_vm2 = vcmp.eq.s32.totalorder %v7818_v17, %v8004_v33 }
  0x4e   :  { %5994 = vmatprep.mubr.msk.bf16.mxu1 %vm14462_vm13, %v7731_v15  ;;  %6026 = vmatprep.subr.msk.bf16.mxu0 %vm6025_vm9, %v7731_v15  ;;  %vm8155_vm6 = vmpackc.low %vm361_vm12, %vm357_vm8  ;;  %vm352_vm9 = vcmp.eq.s32.totalorder %v7818_v17, %v8000_v32  ;;  %vm567_vm12 = vcmp.eq.s32.totalorder %v7898_v23, %v8019_v34  ;;  %vm571_vm13 = vcmp.eq.s32.totalorder %v7901_v24, %v8019_v34 }
  0x4f   :  { %6090 = vmatprep.subr.msk.bf16.mxu1 %vm6089_vm10, %v7731_v15  ;;  %vm8163_vm1 = vmpackc.low %vm572_vm14, %vm568_vm11  ;;  %vm350_vm10 = vcmp.eq.s32.totalorder %v7815_v16, %v8004_v33  ;;  %vm569_vm11 = vcmp.eq.s32.totalorder %v7898_v23, %v8023_v35  ;;  %vm573_vm14 = vcmp.eq.s32.totalorder %v7901_v24, %v8023_v35 }
  0x50   :  { %vm8171_vm8 = vmpackc.low %vm574_vm4, %vm570_vm3 }
  0x51   :  { %v14472_v49 = vsel %vm8171_vm8, 4294967295, %v14471_v49  ;;  %vm6029_vm3 = vmpackc.low %vm352_vm9, %vm348_vm7  ;;  %vm347_vm8 = vcmp.eq.s32.totalorder %v7815_v16, %v8034_v36  ;;  %vm353_vm7 = vcmp.eq.s32.totalorder %v7818_v17, %v8037_v37 }
  0x52   :  { %vm6093_vm4 = vmpackc.low %vm354_vm2, %vm350_vm10  ;;  %vm14475_vm9 = vnez %v14472_v49 }
  0x53   :  { %5932 = vmatmul.mubr.msk.bf16.gmra.mxu0 %vm8126_vm5, %v7731_v15  ;;  %vm351_vm5 = vcmp.eq.s32.totalorder %v7818_v17, %v8034_v36  ;;  %vm8213_vm10 = vmpackc.low %vm573_vm14, %vm569_vm11  ;;  %vm340_vm14 = vcmp.eq.s32.totalorder %v7841_v18, %v8000_v32 }
  0x54   :  { %5996 = vmatmul.mubr.msk.bf16.gmra.mxu1 %vm8137_vm15, %v7731_v15  ;;  %6028 = vmatpush1.bf16.xpose.msk.msra.mxu0 %vm8147_vm0, %v7731_v15  ;;  %vm8202_vm15 = vmpackc.low %vm571_vm13, %vm567_vm12  ;;  %vm349_vm0 = vcmp.eq.s32.totalorder %v7815_v16, %v8037_v37  ;;  %vm578_vm12 = vcmp.eq.s32.totalorder %v7867_v20, %v7913_v26  ;;  %vm582_vm13 = vcmp.eq.s32.totalorder %v7870_v21, %v7913_v26 }
  0x55   :  { %6092 = vmatpush1.bf16.xpose.msk.msra.mxu1 %vm8155_vm6, %v7731_v15  ;;  %5934 = vmatprep.mubr.msk.bf16.mxu0 %vm8163_vm1, %v7731_v15  ;;  %vm576_vm6 = vcmp.eq.s32.totalorder %v7867_v20, %v7905_v25  ;;  %vm580_vm1 = vcmp.eq.s32.totalorder %v7870_v21, %v7905_v25  ;;  %vm8223_vm2 = vmpackc.low %vm351_vm5, %vm347_vm8  ;;  %vm346_vm5 = vcmp.eq.s32.totalorder %v7844_v19, %v8004_v33 }
  0x56   :  { %5998 = vmatprep.mubr.msk.bf16.mxu1 %vm14475_vm9, %v7731_v15  ;;  %6030 = vmatprep.subr.msk.bf16.mxu0 %vm6029_vm3, %v7731_v15  ;;  %vm8231_vm11 = vmpackc.low %vm353_vm7, %vm349_vm0  ;;  %vm344_vm3 = vcmp.eq.s32.totalorder %v7844_v19, %v8000_v32  ;;  %vm575_vm7 = vcmp.eq.s32.totalorder %v7867_v20, %v8019_v34  ;;  %vm579_vm9 = vcmp.eq.s32.totalorder %v7870_v21, %v8019_v34 }
  0x57   :  { %6094 = vmatprep.subr.msk.bf16.mxu1 %vm6093_vm4, %v7731_v15  ;;  %vm8239_vm8 = vmpackc.low %vm580_vm1, %vm576_vm6  ;;  %vm342_vm4 = vcmp.eq.s32.totalorder %v7841_v18, %v8004_v33  ;;  %vm577_vm6 = vcmp.eq.s32.totalorder %v7867_v20, %v8023_v35  ;;  %vm581_vm1 = vcmp.eq.s32.totalorder %v7870_v21, %v8023_v35 }
  0x58   :  { %vm8247_vm0 = vmpackc.low %vm582_vm13, %vm578_vm12 }
  0x59   :  { %v14485_v55 = vsel %vm8247_vm0, 4294967295, %v14484_v55  ;;  %vm6033_vm12 = vmpackc.low %vm344_vm3, %vm340_vm14  ;;  %vm339_vm0 = vcmp.eq.s32.totalorder %v7841_v18, %v8034_v36  ;;  %vm345_vm14 = vcmp.eq.s32.totalorder %v7844_v19, %v8037_v37 }
  0x5a   :  { %vm6097_vm13 = vmpackc.low %vm346_vm5, %vm342_vm4  ;;  %vm14488_vm3 = vnez %v14485_v55  ;;  %v14630_v55 = vmov 0 }
  0x5b   :  { %5936 = vmatmul.mubr.msk.bf16.gmra.mxu0 %vm8202_vm15, %v7731_v15  ;;  %vm343_vm15 = vcmp.eq.s32.totalorder %v7844_v19, %v8034_v36  ;;  %vm8289_vm4 = vmpackc.low %vm581_vm1, %vm577_vm6  ;;  %vm332_vm1 = vcmp.eq.s32.totalorder %v7867_v20, %v8000_v32 }
  0x5c   :  { %6000 = vmatmul.mubr.msk.bf16.gmra.mxu1 %vm8213_vm10, %v7731_v15  ;;  %6032 = vmatpush1.bf16.xpose.msk.msra.mxu0 %vm8223_vm2, %v7731_v15  ;;  %vm8278_vm10 = vmpackc.low %vm579_vm9, %vm575_vm7  ;;  %vm341_vm2 = vcmp.eq.s32.totalorder %v7841_v18, %v8037_v37  ;;  %vm586_vm7 = vcmp.eq.s32.totalorder %v7841_v18, %v7913_v26  ;;  %vm590_vm9 = vcmp.eq.s32.totalorder %v7844_v19, %v7913_v26 }
  0x5d   :  { %6096 = vmatpush1.bf16.xpose.msk.msra.mxu1 %vm8231_vm11, %v7731_v15  ;;  %5938 = vmatprep.mubr.msk.bf16.mxu0 %vm8239_vm8, %v7731_v15  ;;  %vm584_vm11 = vcmp.eq.s32.totalorder %v7841_v18, %v7905_v25  ;;  %vm588_vm8 = vcmp.eq.s32.totalorder %v7844_v19, %v7905_v25  ;;  %vm8299_vm5 = vmpackc.low %vm343_vm15, %vm339_vm0  ;;  %vm338_vm15 = vcmp.eq.s32.totalorder %v7870_v21, %v8004_v33 }
  0x5e   :  { %6002 = vmatprep.mubr.msk.bf16.mxu1 %vm14488_vm3, %v7731_v15  ;;  %6034 = vmatprep.subr.msk.bf16.mxu0 %vm6033_vm12, %v7731_v15  ;;  %vm8307_vm6 = vmpackc.low %vm345_vm14, %vm341_vm2  ;;  %vm336_vm12 = vcmp.eq.s32.totalorder %v7870_v21, %v8000_v32  ;;  %vm583_vm14 = vcmp.eq.s32.totalorder %v7841_v18, %v8019_v34  ;;  %vm587_vm3 = vcmp.eq.s32.totalorder %v7844_v19, %v8019_v34 }
  0x5f   :  { %6098 = vmatprep.subr.msk.bf16.mxu1 %vm6097_vm13, %v7731_v15  ;;  %vm8315_vm0 = vmpackc.low %vm588_vm8, %vm584_vm11  ;;  %vm334_vm13 = vcmp.eq.s32.totalorder %v7867_v20, %v8004_v33  ;;  %vm585_vm11 = vcmp.eq.s32.totalorder %v7841_v18, %v8023_v35  ;;  %vm589_vm8 = vcmp.eq.s32.totalorder %v7844_v19, %v8023_v35 }
  0x60   :  { %vm8323_vm2 = vmpackc.low %vm590_vm9, %vm586_vm7 }
  0x61   :  { %v14498_v61 = vsel %vm8323_vm2, 4294967295, %v14497_v61  ;;  %vm6037_vm7 = vmpackc.low %vm336_vm12, %vm332_vm1  ;;  %vm331_vm2 = vcmp.eq.s32.totalorder %v7867_v20, %v8034_v36  ;;  %vm337_vm1 = vcmp.eq.s32.totalorder %v7870_v21, %v8037_v37 }
  0x62   :  { %vm6101_vm9 = vmpackc.low %vm338_vm15, %vm334_vm13  ;;  %vm14501_vm12 = vnez %v14498_v61 }
  0x63   :  { %5940 = vmatmul.mubr.msk.bf16.gmra.mxu0 %vm8278_vm10, %v7731_v15  ;;  %vm335_vm10 = vcmp.eq.s32.totalorder %v7870_v21, %v8034_v36  ;;  %vm8365_vm13 = vmpackc.low %vm589_vm8, %vm585_vm11  ;;  %vm324_vm8 = vcmp.eq.s32.totalorder %v7898_v23, %v8000_v32 }
  0x64   :  { %6004 = vmatmul.mubr.msk.bf16.gmra.mxu1 %vm8289_vm4, %v7731_v15  ;;  %6036 = vmatpush1.bf16.xpose.msk.msra.mxu0 %vm8299_vm5, %v7731_v15  ;;  %vm8354_vm4 = vmpackc.low %vm587_vm3, %vm583_vm14  ;;  %vm333_vm5 = vcmp.eq.s32.totalorder %v7867_v20, %v8037_v37  ;;  %vm594_vm14 = vcmp.eq.s32.totalorder %v7815_v16, %v7913_v26  ;;  %vm598_vm3 = vcmp.eq.s32.totalorder %v7818_v17, %v7913_v26 }
  0x65   :  { %6100 = vmatpush1.bf16.xpose.msk.msra.mxu1 %vm8307_vm6, %v7731_v15  ;;  %5942 = vmatprep.mubr.msk.bf16.mxu0 %vm8315_vm0, %v7731_v15  ;;  %vm592_vm6 = vcmp.eq.s32.totalorder %v7815_v16, %v7905_v25  ;;  %vm596_vm0 = vcmp.eq.s32.totalorder %v7818_v17, %v7905_v25  ;;  %vm8375_vm15 = vmpackc.low %vm335_vm10, %vm331_vm2  ;;  %vm330_vm10 = vcmp.eq.s32.totalorder %v7901_v24, %v8004_v33 }
  0x66   :  { %6006 = vmatprep.mubr.msk.bf16.mxu1 %vm14501_vm12, %v7731_v15  ;;  %6038 = vmatprep.subr.msk.bf16.mxu0 %vm6037_vm7, %v7731_v15  ;;  %vm8383_vm11 = vmpackc.low %vm337_vm1, %vm333_vm5  ;;  %vm328_vm7 = vcmp.eq.s32.totalorder %v7901_v24, %v8000_v32  ;;  %vm591_vm1 = vcmp.eq.s32.totalorder %v7815_v16, %v8019_v34  ;;  %vm595_vm12 = vcmp.eq.s32.totalorder %v7818_v17, %v8019_v34 }
  0x67   :  { %6102 = vmatprep.subr.msk.bf16.mxu1 %vm6101_vm9, %v7731_v15  ;;  %vm8391_vm2 = vmpackc.low %vm596_vm0, %vm592_vm6  ;;  %vm326_vm9 = vcmp.eq.s32.totalorder %v7898_v23, %v8004_v33  ;;  %vm593_vm6 = vcmp.eq.s32.totalorder %v7815_v16, %v8023_v35  ;;  %vm597_vm0 = vcmp.eq.s32.totalorder %v7818_v17, %v8023_v35 }
  0x68   :  { %vm8399_vm5 = vmpackc.low %vm598_vm3, %vm594_vm14 }
  0x69   :  { %v14511_v10 = vsel %vm8399_vm5, 4294967295, %v14510_v10  ;;  %vm6041_vm14 = vmpackc.low %vm328_vm7, %vm324_vm8  ;;  %vm323_vm5 = vcmp.eq.s32.totalorder %v7898_v23, %v8034_v36  ;;  %vm329_vm8 = vcmp.eq.s32.totalorder %v7901_v24, %v8037_v37 }
  0x6a   :  { %vm6105_vm3 = vmpackc.low %vm330_vm10, %vm326_vm9  ;;  %vm14514_vm7 = vnez %v14511_v10  ;;  %v9331_v10 = vrot.slane %v6149_v59, %v7768_v8 }
  0x6b   :  { %5944 = vmatmul.mubr.msk.bf16.gmra.mxu0 %vm8354_vm4, %v7731_v15  ;;  %vm327_vm4 = vcmp.eq.s32.totalorder %v7901_v24, %v8034_v36  ;;  %vm8441_vm9 = vmpackc.low %vm597_vm0, %vm593_vm6  ;;  %vm316_vm0 = vcmp.eq.s32.totalorder %v7948_v29, %v8000_v32 }
  0x6c   :  { %6008 = vmatmul.mubr.msk.bf16.gmra.mxu1 %vm8365_vm13, %v7731_v15  ;;  %6040 = vmatpush1.bf16.xpose.msk.msra.mxu0 %vm8375_vm15, %v7731_v15  ;;  %vm8430_vm13 = vmpackc.low %vm595_vm12, %vm591_vm1  ;;  %vm325_vm15 = vcmp.eq.s32.totalorder %v7898_v23, %v8037_v37  ;;  %vm602_vm1 = vcmp.eq.s32.totalorder %v7777_v11, %v7913_v26  ;;  %vm606_vm12 = vcmp.eq.s32.totalorder %v7780_v12, %v7913_v26 }
  0x6d   :  { %6104 = vmatpush1.bf16.xpose.msk.msra.mxu1 %vm8383_vm11, %v7731_v15  ;;  %5946 = vmatprep.mubr.msk.bf16.mxu0 %vm8391_vm2, %v7731_v15  ;;  %vm600_vm11 = vcmp.eq.s32.totalorder %v7777_v11, %v7905_v25  ;;  %vm604_vm2 = vcmp.eq.s32.totalorder %v7780_v12, %v7905_v25  ;;  %vm8451_vm10 = vmpackc.low %vm327_vm4, %vm323_vm5  ;;  %vm322_vm4 = vcmp.eq.s32.totalorder %v7951_v30, %v8004_v33 }
  0x6e   :  { %6010 = vmatprep.mubr.msk.bf16.mxu1 %vm14514_vm7, %v7731_v15  ;;  %6042 = vmatprep.subr.msk.bf16.mxu0 %vm6041_vm14, %v7731_v15  ;;  %vm8459_vm6 = vmpackc.low %vm329_vm8, %vm325_vm15  ;;  %vm320_vm14 = vcmp.eq.s32.totalorder %v7951_v30, %v8000_v32  ;;  %vm599_vm8 = vcmp.eq.s32.totalorder %v7777_v11, %v8019_v34  ;;  %vm603_vm7 = vcmp.eq.s32.totalorder %v7780_v12, %v8019_v34 }
  0x6f   :  { %6106 = vmatprep.subr.msk.bf16.mxu1 %vm6105_vm3, %v7731_v15  ;;  %vm8467_vm5 = vmpackc.low %vm604_vm2, %vm600_vm11  ;;  %vm318_vm3 = vcmp.eq.s32.totalorder %v7948_v29, %v8004_v33  ;;  %vm601_vm11 = vcmp.eq.s32.totalorder %v7777_v11, %v8023_v35  ;;  %vm605_vm2 = vcmp.eq.s32.totalorder %v7780_v12, %v8023_v35 }
  0x70   :  { %vm8475_vm15 = vmpackc.low %vm606_vm12, %vm602_vm1 }
  0x71   :  { %v14524_v38 = vsel %vm8475_vm15, 4294967295, %v14523_v38  ;;  %vm6045_vm1 = vmpackc.low %vm320_vm14, %vm316_vm0  ;;  %vm315_vm15 = vcmp.eq.s32.totalorder %v7948_v29, %v8034_v36  ;;  %vm321_vm0 = vcmp.eq.s32.totalorder %v7951_v30, %v8037_v37 }
  0x72   :  { %vm6109_vm12 = vmpackc.low %vm322_vm4, %vm318_vm3  ;;  %vm14527_vm14 = vnez %v14524_v38 }
  0x73   :  { %5948 = vmatmul.mubr.msk.bf16.gmra.mxu0 %vm8430_vm13, %v7731_v15  ;;  %vm319_vm13 = vcmp.eq.s32.totalorder %v7951_v30, %v8034_v36  ;;  %vm8517_vm3 = vmpackc.low %vm605_vm2, %vm601_vm11  ;;  %vm312_vm2 = vcmp.eq.s32.totalorder %v7921_v27, %v8000_v32 }
  0x74   :  { %6012 = vmatmul.mubr.msk.bf16.gmra.mxu1 %vm8441_vm9, %v7731_v15  ;;  %6044 = vmatpush1.bf16.xpose.msk.msra.mxu0 %vm8451_vm10, %v7731_v15  ;;  %vm8506_vm9 = vmpackc.low %vm603_vm7, %vm599_vm8  ;;  %vm317_vm10 = vcmp.eq.s32.totalorder %v7948_v29, %v8037_v37  ;;  %vm610_vm8 = vcmp.eq.s32.totalorder %v7753_v3, %v7913_v26  ;;  %vm614_vm7 = vcmp.eq.s32.totalorder %v7756_v4, %v7913_v26  ;;  %v6150_v26 = vld [vmem:[%s14443_s1 + $0x2] ss:$8 sm:$0xf] }
  0x75   :  { %6108 = vmatpush1.bf16.xpose.msk.msra.mxu1 %vm8459_vm6, %v7731_v15  ;;  %5950 = vmatprep.mubr.msk.bf16.mxu0 %vm8467_vm5, %v7731_v15  ;;  %vm608_vm6 = vcmp.eq.s32.totalorder %v7753_v3, %v7905_v25  ;;  %vm612_vm5 = vcmp.eq.s32.totalorder %v7756_v4, %v7905_v25  ;;  %vm8527_vm4 = vmpackc.low %vm319_vm13, %vm315_vm15  ;;  %vm308_vm15 = vcmp.eq.s32.totalorder %v7747_v1, %v8000_v32 }
  0x76   :  { %6014 = vmatprep.mubr.msk.bf16.mxu1 %vm14527_vm14, %v7731_v15  ;;  %6046 = vmatprep.subr.msk.bf16.mxu0 %vm6045_vm1, %v7731_v15  ;;  %vm8538_vm11 = vmpackc.low %vm321_vm0, %vm317_vm10  ;;  %vm314_vm13 = vcmp.eq.s32.totalorder %v7921_v27, %v8004_v33  ;;  %vm607_vm0 = vcmp.eq.s32.totalorder %v7753_v3, %v8019_v34  ;;  %vm611_vm14 = vcmp.eq.s32.totalorder %v7756_v4, %v8019_v34 }
  0x77   :  { %6110 = vmatprep.subr.msk.bf16.mxu1 %vm6109_vm12, %v7731_v15  ;;  %vm8546_vm1 = vmpackc.low %vm612_vm5, %vm608_vm6  ;;  %vm310_vm12 = vcmp.eq.s32.totalorder %v7747_v1, %v8004_v33  ;;  %v8566_v32 = vrot.slane %v49_v42, %v7759_v5  ;;  %vm609_vm6 = vcmp.eq.s32.totalorder %v7753_v3, %v8023_v35  ;;  %vm613_vm5 = vcmp.eq.s32.totalorder %v7756_v4, %v8023_v35 }
  0x78   :  { %vm8557_vm10 = vmpackc.low %vm614_vm7, %vm610_vm8  ;;  %vm307_vm7 = vcmp.eq.s32.totalorder %v7747_v1, %v8034_v36  ;;  %v8597_v47 = vrot.slane %v6150_v26, %v7759_v5  ;;  %v8620_v49 = vrot.slane %v6150_v26, %v7762_v6  ;;  %v8685_v53 = vrot.slane %v6150_v26, %v7768_v8 }
  0x79   :  { %vm8575_vm8 = vmpackc.low %vm312_vm2, %vm308_vm15  ;;  %vm311_vm15 = vcmp.eq.s32.totalorder %v7921_v27, %v8034_v36  ;;  %v8674_v36 = vrot.slane %v6150_v26, %v7765_v7  ;;  %v9916_v25 = vrot.slane %v6407_v41, %v7762_v6 }
  0x7a   :  { %vm8631_vm2 = vmpackc.low %vm613_vm5, %vm609_vm6  ;;  %vm1720_vm6 = vcmp.eq.s32.totalorder %v7753_v3, %v8597_v47  ;;  %vm1724_vm5 = vcmp.eq.s32.totalorder %v7756_v4, %v8597_v47 }
  0x7b   :  { %5952 = vmatmul.mubr.msk.bf16.gmra.mxu0 %vm8506_vm9, %v7731_v15  ;;  %vm8588_vm9 = vmpackc.low %vm314_vm13, %vm310_vm12  ;;  %vm72_vm12 = vcmp.eq.s32.totalorder %v7921_v27, %v8566_v32 }
  0x7c   :  { %6016 = vmatmul.mubr.msk.bf16.gmra.mxu1 %vm8517_vm3, %v7731_v15  ;;  %6048 = vmatpush1.bf16.xpose.msk.msra.mxu0 %vm8527_vm4, %v7731_v15  ;;  %vm8611_vm3 = vmpackc.low %vm611_vm14, %vm607_vm0  ;;  %vm309_vm4 = vcmp.eq.s32.totalorder %v7747_v1, %v8037_v37  ;;  %vm74_vm0 = vcmp.eq.s32.totalorder %v7921_v27, %v8580_v45 }
  0x7d   :  { %6112 = vmatpush1.bf16.xpose.msk.msra.mxu1 %vm8538_vm11, %v7731_v15  ;;  %5954 = vmatprep.mubr.msk.bf16.mxu0 %vm8546_vm1, %v7731_v15  ;;  %vm313_vm11 = vcmp.eq.s32.totalorder %v7921_v27, %v8037_v37  ;;  %vm68_vm1 = vcmp.eq.s32.totalorder %v7747_v1, %v8566_v32  ;;  %v8643_v37 = vrot.slane %v49_v42, %v7765_v7  ;;  %vm8654_vm13 = vmpackc.low %vm311_vm15, %vm307_vm7  ;;  %v14672_v42 = vmov 0 }
  0x7e   :  { %6018 = vmatprep.mubr.msk.bf16.mxu1 %vm8557_vm10, %v7731_v15  ;;  %6050 = vmatprep.subr.msk.bf16.mxu0 %vm8575_vm8, %v7731_v15  ;;  %vm70_vm10 = vcmp.eq.s32.totalorder %v7747_v1, %v8580_v45  ;;  %vm8665_vm14 = vmpackc.low %vm313_vm11, %vm309_vm4  ;;  %vm1726_vm7 = vcmp.eq.s32.totalorder %v7756_v4, %v8620_v49 }
  0x7f   :  { %6114 = vmatprep.subr.msk.bf16.mxu1 %vm8588_vm9, %v7731_v15  ;;  %vm8676_vm8 = vmpackc.low %vm72_vm12, %vm68_vm1  ;;  %vm1722_vm9 = vcmp.eq.s32.totalorder %v7753_v3, %v8620_v49  ;;  %vm67_vm4 = vcmp.eq.s32.totalorder %v7747_v1, %v8643_v37  ;;  %vm71_vm11 = vcmp.eq.s32.totalorder %v7921_v27, %v8643_v37  ;;  %vm69_vm1 = vcmp.eq.s32.totalorder %v7747_v1, %v8663_v50 }
  0x80   :  { %vm8687_vm15 = vmpackc.low %vm74_vm0, %vm70_vm10  ;;  %vm73_vm12 = vcmp.eq.s32.totalorder %v7921_v27, %v8663_v50 }
  0x81   :  { %v14553_v54 = vsel %vm8687_vm15, 4294967295, %v14552_v54  ;;  %vm6279_vm10 = vmpackc.low %vm1724_vm5, %vm1720_vm6  ;;  %vm1719_vm15 = vcmp.eq.s32.totalorder %v7753_v3, %v8674_v36  ;;  %vm1725_vm6 = vcmp.eq.s32.totalorder %v7756_v4, %v8685_v53 }
  0x82   :  { %vm6343_vm0 = vmpackc.low %vm1726_vm7, %vm1722_vm9  ;;  %vm14556_vm5 = vnez %v14553_v54  ;;  %v14698_v54 = vmov 0 }
  0x83   :  { %5956 = vmatmul.mubr.msk.bf16.gmra.mxu0 %vm8611_vm3, %v7731_v15  ;;  %vm1723_vm3 = vcmp.eq.s32.totalorder %v7756_v4, %v8674_v36  ;;  %vm8729_vm9 = vmpackc.low %vm73_vm12, %vm69_vm1  ;;  %vm1712_vm12 = vcmp.eq.s32.totalorder %v7777_v11, %v8597_v47 }
  0x84   :  { %6020 = vmatmul.mubr.msk.bf16.gmra.mxu1 %vm8631_vm2, %v7731_v15  ;;  %6052 = vmatpush1.bf16.xpose.msk.msra.mxu0 %vm8654_vm13, %v7731_v15  ;;  %vm8718_vm2 = vmpackc.low %vm71_vm11, %vm67_vm4  ;;  %vm1721_vm13 = vcmp.eq.s32.totalorder %v7753_v3, %v8685_v53  ;;  %vm78_vm4 = vcmp.eq.s32.totalorder %v7948_v29, %v8580_v45  ;;  %vm82_vm11 = vcmp.eq.s32.totalorder %v7951_v30, %v8580_v45 }
  0x85   :  { %6116 = vmatpush1.bf16.xpose.msk.msra.mxu1 %vm8665_vm14, %v7731_v15  ;;  %6054 = vmatprep.mubr.msk.bf16.mxu0 %vm8676_vm8, %v7731_v15  ;;  %vm76_vm14 = vcmp.eq.s32.totalorder %v7948_v29, %v8566_v32  ;;  %vm80_vm8 = vcmp.eq.s32.totalorder %v7951_v30, %v8566_v32  ;;  %vm8739_vm7 = vmpackc.low %vm1723_vm3, %vm1719_vm15  ;;  %vm1718_vm3 = vcmp.eq.s32.totalorder %v7780_v12, %v8620_v49 }
  0x86   :  { %6118 = vmatprep.mubr.msk.bf16.mxu1 %vm14556_vm5, %v7731_v15  ;;  %6280 = vmatprep.subr.msk.bf16.mxu0 %vm6279_vm10, %v7731_v15  ;;  %vm8747_vm1 = vmpackc.low %vm1725_vm6, %vm1721_vm13  ;;  %vm1716_vm10 = vcmp.eq.s32.totalorder %v7780_v12, %v8597_v47  ;;  %vm75_vm6 = vcmp.eq.s32.totalorder %v7948_v29, %v8643_v37  ;;  %vm79_vm5 = vcmp.eq.s32.totalorder %v7951_v30, %v8643_v37 }
  0x87   :  { %6344 = vmatprep.subr.msk.bf16.mxu1 %vm6343_vm0, %v7731_v15  ;;  %vm8755_vm15 = vmpackc.low %vm80_vm8, %vm76_vm14  ;;  %vm1714_vm0 = vcmp.eq.s32.totalorder %v7777_v11, %v8620_v49  ;;  %vm77_vm14 = vcmp.eq.s32.totalorder %v7948_v29, %v8663_v50  ;;  %vm81_vm8 = vcmp.eq.s32.totalorder %v7951_v30, %v8663_v50 }
  0x88   :  { %vm8763_vm13 = vmpackc.low %vm82_vm11, %vm78_vm4 }
  0x89   :  { %v14566_v60 = vsel %vm8763_vm13, 4294967295, %v14565_v60  ;;  %vm6283_vm4 = vmpackc.low %vm1716_vm10, %vm1712_vm12  ;;  %vm1711_vm13 = vcmp.eq.s32.totalorder %v7777_v11, %v8674_v36  ;;  %vm1717_vm12 = vcmp.eq.s32.totalorder %v7780_v12, %v8685_v53 }
  0x8a   :  { %vm6347_vm11 = vmpackc.low %vm1718_vm3, %vm1714_vm0  ;;  %vm14569_vm10 = vnez %v14566_v60  ;;  %v14711_v60 = vmov 0 }
  0x8b   :  { %6056 = vmatmul.mubr.msk.bf16.vlgmr.msra.gmra.mxu0 %vm8718_vm2, %v7731_v15  ;;  %vm1715_vm2 = vcmp.eq.s32.totalorder %v7780_v12, %v8674_v36  ;;  %vm8805_vm0 = vmpackc.low %vm81_vm8, %vm77_vm14  ;;  %vm1704_vm8 = vcmp.eq.s32.totalorder %v7815_v16, %v8597_v47 }
  0x8c   :  { %6120 = vmatmul.mubr.msk.bf16.vlgmr.msra.gmra.mxu1 %vm8729_vm9, %v7731_v15  ;;  %6282 = vmatpush1.bf16.xpose.msk.msra.mxu0 %vm8739_vm7, %v7731_v15  ;;  %vm8794_vm9 = vmpackc.low %vm79_vm5, %vm75_vm6  ;;  %vm1713_vm7 = vcmp.eq.s32.totalorder %v7777_v11, %v8685_v53  ;;  %vm86_vm6 = vcmp.eq.s32.totalorder %v7898_v23, %v8580_v45  ;;  %vm90_vm5 = vcmp.eq.s32.totalorder %v7901_v24, %v8580_v45 }
  0x8d   :  { %6346 = vmatpush1.bf16.xpose.msk.msra.mxu1 %vm8747_vm1, %v7731_v15  ;;  %6058 = vmatprep.mubr.msk.bf16.mxu0 %vm8755_vm15, %v7731_v15  ;;  %vm84_vm1 = vcmp.eq.s32.totalorder %v7898_v23, %v8566_v32  ;;  %vm88_vm15 = vcmp.eq.s32.totalorder %v7901_v24, %v8566_v32  ;;  %vm8815_vm3 = vmpackc.low %vm1715_vm2, %vm1711_vm13  ;;  %vm1710_vm2 = vcmp.eq.s32.totalorder %v7818_v17, %v8620_v49 }
  0x8e   :  { %6122 = vmatprep.mubr.msk.bf16.mxu1 %vm14569_vm10, %v7731_v15  ;;  %6284 = vmatprep.subr.msk.bf16.mxu0 %vm6283_vm4, %v7731_v15  ;;  %vm8823_vm14 = vmpackc.low %vm1717_vm12, %vm1713_vm7  ;;  %vm1708_vm4 = vcmp.eq.s32.totalorder %v7818_v17, %v8597_v47  ;;  %vm83_vm12 = vcmp.eq.s32.totalorder %v7898_v23, %v8643_v37  ;;  %vm87_vm10 = vcmp.eq.s32.totalorder %v7901_v24, %v8643_v37 }
  0x8f   :  { %6348 = vmatprep.subr.msk.bf16.mxu1 %vm6347_vm11, %v7731_v15  ;;  %vm8831_vm13 = vmpackc.low %vm88_vm15, %vm84_vm1  ;;  %vm1706_vm11 = vcmp.eq.s32.totalorder %v7815_v16, %v8620_v49  ;;  %vm85_vm1 = vcmp.eq.s32.totalorder %v7898_v23, %v8663_v50  ;;  %vm89_vm15 = vcmp.eq.s32.totalorder %v7901_v24, %v8663_v50 }
  0x90   :  { %vm8839_vm7 = vmpackc.low %vm90_vm5, %vm86_vm6 }
  0x91   :  { %v14579_v9 = vsel %vm8839_vm7, 4294967295, %v14578_v9  ;;  %vm6287_vm6 = vmpackc.low %vm1708_vm4, %vm1704_vm8  ;;  %vm1703_vm7 = vcmp.eq.s32.totalorder %v7815_v16, %v8674_v36  ;;  %vm1709_vm8 = vcmp.eq.s32.totalorder %v7818_v17, %v8685_v53 }
  0x92   :  { %vm6351_vm5 = vmpackc.low %vm1710_vm2, %vm1706_vm11  ;;  %vm14582_vm4 = vnez %v14579_v9 }
  0x93   :  { %6060 = vmatmul.mubr.msk.bf16.gmra.mxu0 %vm8794_vm9, %v7731_v15  ;;  %vm1707_vm9 = vcmp.eq.s32.totalorder %v7818_v17, %v8674_v36  ;;  %vm8881_vm11 = vmpackc.low %vm89_vm15, %vm85_vm1  ;;  %vm1696_vm15 = vcmp.eq.s32.totalorder %v7841_v18, %v8597_v47 }
  0x94   :  { %6124 = vmatmul.mubr.msk.bf16.gmra.mxu1 %vm8805_vm0, %v7731_v15  ;;  %6286 = vmatpush1.bf16.xpose.msk.msra.mxu0 %vm8815_vm3, %v7731_v15  ;;  %vm8870_vm0 = vmpackc.low %vm87_vm10, %vm83_vm12  ;;  %vm1705_vm3 = vcmp.eq.s32.totalorder %v7815_v16, %v8685_v53  ;;  %vm94_vm12 = vcmp.eq.s32.totalorder %v7867_v20, %v8580_v45  ;;  %vm98_vm10 = vcmp.eq.s32.totalorder %v7870_v21, %v8580_v45 }
  0x95   :  { %6350 = vmatpush1.bf16.xpose.msk.msra.mxu1 %vm8823_vm14, %v7731_v15  ;;  %6062 = vmatprep.mubr.msk.bf16.mxu0 %vm8831_vm13, %v7731_v15  ;;  %vm92_vm14 = vcmp.eq.s32.totalorder %v7867_v20, %v8566_v32  ;;  %vm96_vm13 = vcmp.eq.s32.totalorder %v7870_v21, %v8566_v32  ;;  %vm8891_vm2 = vmpackc.low %vm1707_vm9, %vm1703_vm7  ;;  %vm1702_vm9 = vcmp.eq.s32.totalorder %v7844_v19, %v8620_v49 }
  0x96   :  { %6126 = vmatprep.mubr.msk.bf16.mxu1 %vm14582_vm4, %v7731_v15  ;;  %6288 = vmatprep.subr.msk.bf16.mxu0 %vm6287_vm6, %v7731_v15  ;;  %vm8899_vm1 = vmpackc.low %vm1709_vm8, %vm1705_vm3  ;;  %vm1700_vm6 = vcmp.eq.s32.totalorder %v7844_v19, %v8597_v47  ;;  %vm91_vm8 = vcmp.eq.s32.totalorder %v7867_v20, %v8643_v37  ;;  %vm95_vm4 = vcmp.eq.s32.totalorder %v7870_v21, %v8643_v37 }
  0x97   :  { %6352 = vmatprep.subr.msk.bf16.mxu1 %vm6351_vm5, %v7731_v15  ;;  %vm8907_vm7 = vmpackc.low %vm96_vm13, %vm92_vm14  ;;  %vm1698_vm5 = vcmp.eq.s32.totalorder %v7841_v18, %v8620_v49  ;;  %vm93_vm14 = vcmp.eq.s32.totalorder %v7867_v20, %v8663_v50  ;;  %vm97_vm13 = vcmp.eq.s32.totalorder %v7870_v21, %v8663_v50 }
  0x98   :  { %vm8915_vm3 = vmpackc.low %vm98_vm10, %vm94_vm12 }
  0x99   :  { %v14592_v31 = vsel %vm8915_vm3, 4294967295, %v14591_v31  ;;  %vm6291_vm12 = vmpackc.low %vm1700_vm6, %vm1696_vm15  ;;  %vm1695_vm3 = vcmp.eq.s32.totalorder %v7841_v18, %v8674_v36  ;;  %vm1701_vm15 = vcmp.eq.s32.totalorder %v7844_v19, %v8685_v53 }
  0x9a   :  { %vm6355_vm10 = vmpackc.low %vm1702_vm9, %vm1698_vm5  ;;  %vm14595_vm6 = vnez %v14592_v31  ;;  %v14737_v31 = vmov 0 }
  0x9b   :  { %6064 = vmatmul.mubr.msk.bf16.gmra.mxu0 %vm8870_vm0, %v7731_v15  ;;  %vm1699_vm0 = vcmp.eq.s32.totalorder %v7844_v19, %v8674_v36  ;;  %vm8957_vm5 = vmpackc.low %vm97_vm13, %vm93_vm14  ;;  %vm1688_vm13 = vcmp.eq.s32.totalorder %v7867_v20, %v8597_v47 }
  0x9c   :  { %6128 = vmatmul.mubr.msk.bf16.gmra.mxu1 %vm8881_vm11, %v7731_v15  ;;  %6290 = vmatpush1.bf16.xpose.msk.msra.mxu0 %vm8891_vm2, %v7731_v15  ;;  %vm8946_vm11 = vmpackc.low %vm95_vm4, %vm91_vm8  ;;  %vm1697_vm2 = vcmp.eq.s32.totalorder %v7841_v18, %v8685_v53  ;;  %vm102_vm8 = vcmp.eq.s32.totalorder %v7841_v18, %v8580_v45  ;;  %vm106_vm4 = vcmp.eq.s32.totalorder %v7844_v19, %v8580_v45 }
  0x9d   :  { %6354 = vmatpush1.bf16.xpose.msk.msra.mxu1 %vm8899_vm1, %v7731_v15  ;;  %6066 = vmatprep.mubr.msk.bf16.mxu0 %vm8907_vm7, %v7731_v15  ;;  %vm100_vm1 = vcmp.eq.s32.totalorder %v7841_v18, %v8566_v32  ;;  %vm104_vm7 = vcmp.eq.s32.totalorder %v7844_v19, %v8566_v32  ;;  %vm8967_vm9 = vmpackc.low %vm1699_vm0, %vm1695_vm3  ;;  %vm1694_vm0 = vcmp.eq.s32.totalorder %v7870_v21, %v8620_v49 }
  0x9e   :  { %6130 = vmatprep.mubr.msk.bf16.mxu1 %vm14595_vm6, %v7731_v15  ;;  %6292 = vmatprep.subr.msk.bf16.mxu0 %vm6291_vm12, %v7731_v15  ;;  %vm8975_vm14 = vmpackc.low %vm1701_vm15, %vm1697_vm2  ;;  %vm1692_vm12 = vcmp.eq.s32.totalorder %v7870_v21, %v8597_v47  ;;  %vm99_vm15 = vcmp.eq.s32.totalorder %v7841_v18, %v8643_v37  ;;  %vm103_vm6 = vcmp.eq.s32.totalorder %v7844_v19, %v8643_v37 }
  0x9f   :  { %6356 = vmatprep.subr.msk.bf16.mxu1 %vm6355_vm10, %v7731_v15  ;;  %vm8983_vm3 = vmpackc.low %vm104_vm7, %vm100_vm1  ;;  %vm1690_vm10 = vcmp.eq.s32.totalorder %v7867_v20, %v8620_v49  ;;  %vm101_vm1 = vcmp.eq.s32.totalorder %v7841_v18, %v8663_v50  ;;  %vm105_vm7 = vcmp.eq.s32.totalorder %v7844_v19, %v8663_v50 }
  0xa0   :  { %vm8991_vm2 = vmpackc.low %vm106_vm4, %vm102_vm8 }
  0xa1   :  { %v14605_v43 = vsel %vm8991_vm2, 4294967295, %v14604_v43  ;;  %vm6295_vm8 = vmpackc.low %vm1692_vm12, %vm1688_vm13  ;;  %vm1687_vm2 = vcmp.eq.s32.totalorder %v7867_v20, %v8674_v36  ;;  %vm1693_vm13 = vcmp.eq.s32.totalorder %v7870_v21, %v8685_v53 }
  0xa2   :  { %vm6359_vm4 = vmpackc.low %vm1694_vm0, %vm1690_vm10  ;;  %vm14608_vm12 = vnez %v14605_v43 }
  0xa3   :  { %6068 = vmatmul.mubr.msk.bf16.gmra.mxu0 %vm8946_vm11, %v7731_v15  ;;  %vm1691_vm11 = vcmp.eq.s32.totalorder %v7870_v21, %v8674_v36  ;;  %vm9033_vm10 = vmpackc.low %vm105_vm7, %vm101_vm1  ;;  %vm1680_vm7 = vcmp.eq.s32.totalorder %v7898_v23, %v8597_v47 }
  0xa4   :  { %6132 = vmatmul.mubr.msk.bf16.gmra.mxu1 %vm8957_vm5, %v7731_v15  ;;  %6294 = vmatpush1.bf16.xpose.msk.msra.mxu0 %vm8967_vm9, %v7731_v15  ;;  %vm9022_vm5 = vmpackc.low %vm103_vm6, %vm99_vm15  ;;  %vm1689_vm9 = vcmp.eq.s32.totalorder %v7867_v20, %v8685_v53  ;;  %vm110_vm15 = vcmp.eq.s32.totalorder %v7815_v16, %v8580_v45  ;;  %vm114_vm6 = vcmp.eq.s32.totalorder %v7818_v17, %v8580_v45 }
  0xa5   :  { %6358 = vmatpush1.bf16.xpose.msk.msra.mxu1 %vm8975_vm14, %v7731_v15  ;;  %6070 = vmatprep.mubr.msk.bf16.mxu0 %vm8983_vm3, %v7731_v15  ;;  %vm108_vm14 = vcmp.eq.s32.totalorder %v7815_v16, %v8566_v32  ;;  %vm112_vm3 = vcmp.eq.s32.totalorder %v7818_v17, %v8566_v32  ;;  %vm9043_vm0 = vmpackc.low %vm1691_vm11, %vm1687_vm2  ;;  %vm1686_vm11 = vcmp.eq.s32.totalorder %v7901_v24, %v8620_v49 }
  0xa6   :  { %6134 = vmatprep.mubr.msk.bf16.mxu1 %vm14608_vm12, %v7731_v15  ;;  %6296 = vmatprep.subr.msk.bf16.mxu0 %vm6295_vm8, %v7731_v15  ;;  %vm9051_vm1 = vmpackc.low %vm1693_vm13, %vm1689_vm9  ;;  %vm1684_vm8 = vcmp.eq.s32.totalorder %v7901_v24, %v8597_v47  ;;  %vm107_vm13 = vcmp.eq.s32.totalorder %v7815_v16, %v8643_v37  ;;  %vm111_vm12 = vcmp.eq.s32.totalorder %v7818_v17, %v8643_v37 }
  0xa7   :  { %6360 = vmatprep.subr.msk.bf16.mxu1 %vm6359_vm4, %v7731_v15  ;;  %vm9059_vm2 = vmpackc.low %vm112_vm3, %vm108_vm14  ;;  %vm1682_vm4 = vcmp.eq.s32.totalorder %v7898_v23, %v8620_v49  ;;  %vm109_vm14 = vcmp.eq.s32.totalorder %v7815_v16, %v8663_v50  ;;  %vm113_vm3 = vcmp.eq.s32.totalorder %v7818_v17, %v8663_v50 }
  0xa8   :  { %vm9067_vm9 = vmpackc.low %vm114_vm6, %vm110_vm15 }
  0xa9   :  { %v14618_v48 = vsel %vm9067_vm9, 4294967295, %v14617_v48  ;;  %vm6299_vm15 = vmpackc.low %vm1684_vm8, %vm1680_vm7  ;;  %vm1679_vm9 = vcmp.eq.s32.totalorder %v7898_v23, %v8674_v36  ;;  %vm1685_vm7 = vcmp.eq.s32.totalorder %v7901_v24, %v8685_v53 }
  0xaa   :  { %vm6363_vm6 = vmpackc.low %vm1686_vm11, %vm1682_vm4  ;;  %vm14621_vm8 = vnez %v14618_v48  ;;  %v9999_v48 = vrot.slane %v6407_v41, %v7768_v8 }
  0xab   :  { %6072 = vmatmul.mubr.msk.bf16.gmra.mxu0 %vm9022_vm5, %v7731_v15  ;;  %vm1683_vm5 = vcmp.eq.s32.totalorder %v7901_v24, %v8674_v36  ;;  %vm9109_vm4 = vmpackc.low %vm113_vm3, %vm109_vm14  ;;  %vm1672_vm3 = vcmp.eq.s32.totalorder %v7948_v29, %v8597_v47 }
  0xac   :  { %6136 = vmatmul.mubr.msk.bf16.gmra.mxu1 %vm9033_vm10, %v7731_v15  ;;  %6298 = vmatpush1.bf16.xpose.msk.msra.mxu0 %vm9043_vm0, %v7731_v15  ;;  %vm9098_vm10 = vmpackc.low %vm111_vm12, %vm107_vm13  ;;  %vm1681_vm0 = vcmp.eq.s32.totalorder %v7898_v23, %v8685_v53  ;;  %vm118_vm13 = vcmp.eq.s32.totalorder %v7777_v11, %v8580_v45  ;;  %vm122_vm12 = vcmp.eq.s32.totalorder %v7780_v12, %v8580_v45 }
  0xad   :  { %6362 = vmatpush1.bf16.xpose.msk.msra.mxu1 %vm9051_vm1, %v7731_v15  ;;  %6074 = vmatprep.mubr.msk.bf16.mxu0 %vm9059_vm2, %v7731_v15  ;;  %vm116_vm1 = vcmp.eq.s32.totalorder %v7777_v11, %v8566_v32  ;;  %vm120_vm2 = vcmp.eq.s32.totalorder %v7780_v12, %v8566_v32  ;;  %vm9119_vm11 = vmpackc.low %vm1683_vm5, %vm1679_vm9  ;;  %vm1678_vm5 = vcmp.eq.s32.totalorder %v7951_v30, %v8620_v49 }
  0xae   :  { %6138 = vmatprep.mubr.msk.bf16.mxu1 %vm14621_vm8, %v7731_v15  ;;  %6300 = vmatprep.subr.msk.bf16.mxu0 %vm6299_vm15, %v7731_v15  ;;  %vm9127_vm14 = vmpackc.low %vm1685_vm7, %vm1681_vm0  ;;  %vm1676_vm15 = vcmp.eq.s32.totalorder %v7951_v30, %v8597_v47  ;;  %vm115_vm7 = vcmp.eq.s32.totalorder %v7777_v11, %v8643_v37  ;;  %vm119_vm8 = vcmp.eq.s32.totalorder %v7780_v12, %v8643_v37 }
  0xaf   :  { %6364 = vmatprep.subr.msk.bf16.mxu1 %vm6363_vm6, %v7731_v15  ;;  %vm9135_vm9 = vmpackc.low %vm120_vm2, %vm116_vm1  ;;  %vm1674_vm6 = vcmp.eq.s32.totalorder %v7948_v29, %v8620_v49  ;;  %vm117_vm1 = vcmp.eq.s32.totalorder %v7777_v11, %v8663_v50  ;;  %vm121_vm2 = vcmp.eq.s32.totalorder %v7780_v12, %v8663_v50 }
  0xb0   :  { %vm9143_vm0 = vmpackc.low %vm122_vm12, %vm118_vm13 }
  0xb1   :  { %v14631_v55 = vsel %vm9143_vm0, 4294967295, %v14630_v55  ;;  %vm6303_vm13 = vmpackc.low %vm1676_vm15, %vm1672_vm3  ;;  %vm1671_vm0 = vcmp.eq.s32.totalorder %v7948_v29, %v8674_v36  ;;  %vm1677_vm3 = vcmp.eq.s32.totalorder %v7951_v30, %v8685_v53 }
  0xb2   :  { %vm6367_vm12 = vmpackc.low %vm1678_vm5, %vm1674_vm6  ;;  %vm14634_vm15 = vnez %v14631_v55 }
  0xb3   :  { %6076 = vmatmul.mubr.msk.bf16.gmra.mxu0 %vm9098_vm10, %v7731_v15  ;;  %vm1675_vm10 = vcmp.eq.s32.totalorder %v7951_v30, %v8674_v36  ;;  %vm9185_vm6 = vmpackc.low %vm121_vm2, %vm117_vm1  ;;  %vm1668_vm2 = vcmp.eq.s32.totalorder %v7921_v27, %v8597_v47 }
  0xb4   :  { %6140 = vmatmul.mubr.msk.bf16.gmra.mxu1 %vm9109_vm4, %v7731_v15  ;;  %6302 = vmatpush1.bf16.xpose.msk.msra.mxu0 %vm9119_vm11, %v7731_v15  ;;  %vm9174_vm4 = vmpackc.low %vm119_vm8, %vm115_vm7  ;;  %vm1673_vm11 = vcmp.eq.s32.totalorder %v7948_v29, %v8685_v53  ;;  %vm126_vm7 = vcmp.eq.s32.totalorder %v7753_v3, %v8580_v45  ;;  %vm130_vm8 = vcmp.eq.s32.totalorder %v7756_v4, %v8580_v45  ;;  %v6408_v45 = vld [vmem:[%s14443_s1 + $0x3] ss:$8 sm:$0xf] }
  0xb5   :  { %6366 = vmatpush1.bf16.xpose.msk.msra.mxu1 %vm9127_vm14, %v7731_v15  ;;  %6078 = vmatprep.mubr.msk.bf16.mxu0 %vm9135_vm9, %v7731_v15  ;;  %vm124_vm14 = vcmp.eq.s32.totalorder %v7753_v3, %v8566_v32  ;;  %vm128_vm9 = vcmp.eq.s32.totalorder %v7756_v4, %v8566_v32  ;;  %vm9195_vm5 = vmpackc.low %vm1675_vm10, %vm1671_vm0  ;;  %vm1664_vm0 = vcmp.eq.s32.totalorder %v7747_v1, %v8597_v47 }
  0xb6   :  { %6142 = vmatprep.mubr.msk.bf16.mxu1 %vm14634_vm15, %v7731_v15  ;;  %6304 = vmatprep.subr.msk.bf16.mxu0 %vm6303_vm13, %v7731_v15  ;;  %vm9206_vm1 = vmpackc.low %vm1677_vm3, %vm1673_vm11  ;;  %vm1670_vm10 = vcmp.eq.s32.totalorder %v7921_v27, %v8620_v49  ;;  %vm123_vm3 = vcmp.eq.s32.totalorder %v7753_v3, %v8643_v37  ;;  %vm127_vm15 = vcmp.eq.s32.totalorder %v7756_v4, %v8643_v37 }
  0xb7   :  { %6368 = vmatprep.subr.msk.bf16.mxu1 %vm6367_vm12, %v7731_v15  ;;  %vm9214_vm13 = vmpackc.low %vm128_vm9, %vm124_vm14  ;;  %vm1666_vm12 = vcmp.eq.s32.totalorder %v7747_v1, %v8620_v49  ;;  %v9234_v47 = vrot.slane %v6149_v59, %v7759_v5  ;;  %vm125_vm14 = vcmp.eq.s32.totalorder %v7753_v3, %v8663_v50  ;;  %vm129_vm9 = vcmp.eq.s32.totalorder %v7756_v4, %v8663_v50 }
  0xb8   :  { %vm9225_vm11 = vmpackc.low %vm130_vm8, %vm126_vm7  ;;  %vm1663_vm8 = vcmp.eq.s32.totalorder %v7747_v1, %v8674_v36  ;;  %v9265_v0 = vrot.slane %v6408_v45, %v7759_v5  ;;  %v9288_v9 = vrot.slane %v6408_v45, %v7762_v6  ;;  %v9353_v22 = vrot.slane %v6408_v45, %v7768_v8 }
  0xb9   :  { %vm9243_vm7 = vmpackc.low %vm1668_vm2, %vm1664_vm0  ;;  %vm1667_vm0 = vcmp.eq.s32.totalorder %v7921_v27, %v8674_v36  ;;  %v9342_v36 = vrot.slane %v6408_v45, %v7765_v7 }
  0xba   :  { %vm9299_vm2 = vmpackc.low %vm129_vm9, %vm125_vm14  ;;  %vm2414_vm14 = vcmp.eq.s32.totalorder %v7753_v3, %v9265_v0  ;;  %vm2418_vm9 = vcmp.eq.s32.totalorder %v7756_v4, %v9265_v0 }
  0xbb   :  { %6080 = vmatmul.mubr.msk.bf16.gmra.mxu0 %vm9174_vm4, %v7731_v15  ;;  %vm9256_vm4 = vmpackc.low %vm1670_vm10, %vm1666_vm12  ;;  %vm1428_vm12 = vcmp.eq.s32.totalorder %v7921_v27, %v9234_v47 }
  0xbc   :  { %6144 = vmatmul.mubr.msk.bf16.gmra.mxu1 %vm9185_vm6, %v7731_v15  ;;  %6306 = vmatpush1.bf16.xpose.msk.msra.mxu0 %vm9195_vm5, %v7731_v15  ;;  %vm9279_vm6 = vmpackc.low %vm127_vm15, %vm123_vm3  ;;  %vm1665_vm5 = vcmp.eq.s32.totalorder %v7747_v1, %v8685_v53  ;;  %vm1430_vm3 = vcmp.eq.s32.totalorder %v7921_v27, %v9248_v62 }
  0xbd   :  { %6370 = vmatpush1.bf16.xpose.msk.msra.mxu1 %vm9206_vm1, %v7731_v15  ;;  %6082 = vmatprep.mubr.msk.bf16.mxu0 %vm9214_vm13, %v7731_v15  ;;  %vm1669_vm1 = vcmp.eq.s32.totalorder %v7921_v27, %v8685_v53  ;;  %vm1424_vm13 = vcmp.eq.s32.totalorder %v7747_v1, %v9234_v47  ;;  %v9311_v53 = vrot.slane %v6149_v59, %v7765_v7  ;;  %vm9322_vm10 = vmpackc.low %vm1667_vm0, %vm1663_vm8 }
  0xbe   :  { %6146 = vmatprep.mubr.msk.bf16.mxu1 %vm9225_vm11, %v7731_v15  ;;  %6308 = vmatprep.subr.msk.bf16.mxu0 %vm9243_vm7, %v7731_v15  ;;  %vm1426_vm11 = vcmp.eq.s32.totalorder %v7747_v1, %v9248_v62  ;;  %vm9333_vm15 = vmpackc.low %vm1669_vm1, %vm1665_vm5  ;;  %vm2420_vm8 = vcmp.eq.s32.totalorder %v7756_v4, %v9288_v9 }
  0xbf   :  { %6372 = vmatprep.subr.msk.bf16.mxu1 %vm9256_vm4, %v7731_v15  ;;  %vm9344_vm7 = vmpackc.low %vm1428_vm12, %vm1424_vm13  ;;  %vm2416_vm4 = vcmp.eq.s32.totalorder %v7753_v3, %v9288_v9  ;;  %vm1423_vm5 = vcmp.eq.s32.totalorder %v7747_v1, %v9311_v53  ;;  %vm1427_vm1 = vcmp.eq.s32.totalorder %v7921_v27, %v9311_v53  ;;  %vm1425_vm13 = vcmp.eq.s32.totalorder %v7747_v1, %v9331_v10 }
  0xc0   :  { %vm9355_vm0 = vmpackc.low %vm1430_vm3, %vm1426_vm11  ;;  %vm1429_vm12 = vcmp.eq.s32.totalorder %v7921_v27, %v9331_v10 }
  0xc1   :  { %v14660_v28 = vsel %vm9355_vm0, 4294967295, %v14659_v28  ;;  %vm6537_vm11 = vmpackc.low %vm2418_vm9, %vm2414_vm14  ;;  %vm2413_vm0 = vcmp.eq.s32.totalorder %v7753_v3, %v9342_v36  ;;  %vm2419_vm14 = vcmp.eq.s32.totalorder %v7756_v4, %v9353_v22 }
  0xc2   :  { %vm6601_vm3 = vmpackc.low %vm2420_vm8, %vm2416_vm4  ;;  %vm14663_vm9 = vnez %v14660_v28 }
  0xc3   :  { %6084 = vmatmul.mubr.msk.bf16.gmra.mxu0 %vm9279_vm6, %v7731_v15  ;;  %vm2417_vm6 = vcmp.eq.s32.totalorder %v7756_v4, %v9342_v36  ;;  %vm9397_vm4 = vmpackc.low %vm1429_vm12, %vm1425_vm13  ;;  %vm2406_vm12 = vcmp.eq.s32.totalorder %v7777_v11, %v9265_v0 }
  0xc4   :  { %6148 = vmatmul.mubr.msk.bf16.gmra.mxu1 %vm9299_vm2, %v7731_v15  ;;  %6310 = vmatpush1.bf16.xpose.msk.msra.mxu0 %vm9322_vm10, %v7731_v15  ;;  %vm9386_vm2 = vmpackc.low %vm1427_vm1, %vm1423_vm5  ;;  %vm2415_vm10 = vcmp.eq.s32.totalorder %v7753_v3, %v9353_v22  ;;  %vm1434_vm5 = vcmp.eq.s32.totalorder %v7948_v29, %v9248_v62  ;;  %vm1438_vm1 = vcmp.eq.s32.totalorder %v7951_v30, %v9248_v62 }
  0xc5   :  { %6374 = vmatpush1.bf16.xpose.msk.msra.mxu1 %vm9333_vm15, %v7731_v15  ;;  %6312 = vmatprep.mubr.msk.bf16.mxu0 %vm9344_vm7, %v7731_v15  ;;  %vm1432_vm15 = vcmp.eq.s32.totalorder %v7948_v29, %v9234_v47  ;;  %vm1436_vm7 = vcmp.eq.s32.totalorder %v7951_v30, %v9234_v47  ;;  %vm9407_vm8 = vmpackc.low %vm2417_vm6, %vm2413_vm0  ;;  %vm2412_vm6 = vcmp.eq.s32.totalorder %v7780_v12, %v9288_v9 }
  0xc6   :  { %6376 = vmatprep.mubr.msk.bf16.mxu1 %vm14663_vm9, %v7731_v15  ;;  %6538 = vmatprep.subr.msk.bf16.mxu0 %vm6537_vm11, %v7731_v15  ;;  %vm9415_vm13 = vmpackc.low %vm2419_vm14, %vm2415_vm10  ;;  %vm2410_vm11 = vcmp.eq.s32.totalorder %v7780_v12, %v9265_v0  ;;  %vm1431_vm14 = vcmp.eq.s32.totalorder %v7948_v29, %v9311_v53  ;;  %vm1435_vm9 = vcmp.eq.s32.totalorder %v7951_v30, %v9311_v53 }
  0xc7   :  { %6602 = vmatprep.subr.msk.bf16.mxu1 %vm6601_vm3, %v7731_v15  ;;  %vm9423_vm0 = vmpackc.low %vm1436_vm7, %vm1432_vm15  ;;  %vm2408_vm3 = vcmp.eq.s32.totalorder %v7777_v11, %v9288_v9  ;;  %vm1433_vm15 = vcmp.eq.s32.totalorder %v7948_v29, %v9331_v10  ;;  %vm1437_vm7 = vcmp.eq.s32.totalorder %v7951_v30, %v9331_v10 }
  0xc8   :  { %vm9431_vm10 = vmpackc.low %vm1438_vm1, %vm1434_vm5 }
  0xc9   :  { %v14673_v42 = vsel %vm9431_vm10, 4294967295, %v14672_v42  ;;  %vm6541_vm5 = vmpackc.low %vm2410_vm11, %vm2406_vm12  ;;  %vm2405_vm10 = vcmp.eq.s32.totalorder %v7777_v11, %v9342_v36  ;;  %vm2411_vm12 = vcmp.eq.s32.totalorder %v7780_v12, %v9353_v22 }
  0xca   :  { %vm6605_vm1 = vmpackc.low %vm2412_vm6, %vm2408_vm3  ;;  %vm14676_vm11 = vnez %v14673_v42 }
  0xcb   :  { %6314 = vmatmul.mubr.msk.bf16.vlgmr.msra.gmra.mxu0 %vm9386_vm2, %v7731_v15  ;;  %vm2409_vm2 = vcmp.eq.s32.totalorder %v7780_v12, %v9342_v36  ;;  %vm9473_vm3 = vmpackc.low %vm1437_vm7, %vm1433_vm15  ;;  %vm2398_vm7 = vcmp.eq.s32.totalorder %v7815_v16, %v9265_v0 }
  0xcc   :  { %6378 = vmatmul.mubr.msk.bf16.vlgmr.msra.gmra.mxu1 %vm9397_vm4, %v7731_v15  ;;  %6540 = vmatpush1.bf16.xpose.msk.msra.mxu0 %vm9407_vm8, %v7731_v15  ;;  %vm9462_vm4 = vmpackc.low %vm1435_vm9, %vm1431_vm14  ;;  %vm2407_vm8 = vcmp.eq.s32.totalorder %v7777_v11, %v9353_v22  ;;  %vm1442_vm14 = vcmp.eq.s32.totalorder %v7898_v23, %v9248_v62  ;;  %vm1446_vm9 = vcmp.eq.s32.totalorder %v7901_v24, %v9248_v62 }
  0xcd   :  { %6604 = vmatpush1.bf16.xpose.msk.msra.mxu1 %vm9415_vm13, %v7731_v15  ;;  %6316 = vmatprep.mubr.msk.bf16.mxu0 %vm9423_vm0, %v7731_v15  ;;  %vm1440_vm13 = vcmp.eq.s32.totalorder %v7898_v23, %v9234_v47  ;;  %vm1444_vm0 = vcmp.eq.s32.totalorder %v7901_v24, %v9234_v47  ;;  %vm9483_vm6 = vmpackc.low %vm2409_vm2, %vm2405_vm10  ;;  %vm2404_vm2 = vcmp.eq.s32.totalorder %v7818_v17, %v9288_v9 }
  0xce   :  { %6380 = vmatprep.mubr.msk.bf16.mxu1 %vm14676_vm11, %v7731_v15  ;;  %6542 = vmatprep.subr.msk.bf16.mxu0 %vm6541_vm5, %v7731_v15  ;;  %vm9491_vm15 = vmpackc.low %vm2411_vm12, %vm2407_vm8  ;;  %vm2402_vm5 = vcmp.eq.s32.totalorder %v7818_v17, %v9265_v0  ;;  %vm1439_vm12 = vcmp.eq.s32.totalorder %v7898_v23, %v9311_v53  ;;  %vm1443_vm11 = vcmp.eq.s32.totalorder %v7901_v24, %v9311_v53 }
  0xcf   :  { %6606 = vmatprep.subr.msk.bf16.mxu1 %vm6605_vm1, %v7731_v15  ;;  %vm9499_vm10 = vmpackc.low %vm1444_vm0, %vm1440_vm13  ;;  %vm2400_vm1 = vcmp.eq.s32.totalorder %v7815_v16, %v9288_v9  ;;  %vm1441_vm13 = vcmp.eq.s32.totalorder %v7898_v23, %v9331_v10  ;;  %vm1445_vm0 = vcmp.eq.s32.totalorder %v7901_v24, %v9331_v10 }
  0xd0   :  { %vm9507_vm8 = vmpackc.low %vm1446_vm9, %vm1442_vm14 }
  0xd1   :  { %v14686_v46 = vsel %vm9507_vm8, 4294967295, %v14685_v46  ;;  %vm6545_vm14 = vmpackc.low %vm2402_vm5, %vm2398_vm7  ;;  %vm2397_vm8 = vcmp.eq.s32.totalorder %v7815_v16, %v9342_v36  ;;  %vm2403_vm7 = vcmp.eq.s32.totalorder %v7818_v17, %v9353_v22 }
  0xd2   :  { %vm6609_vm9 = vmpackc.low %vm2404_vm2, %vm2400_vm1  ;;  %vm14689_vm5 = vnez %v14686_v46 }
  0xd3   :  { %6318 = vmatmul.mubr.msk.bf16.gmra.mxu0 %vm9462_vm4, %v7731_v15  ;;  %vm2401_vm4 = vcmp.eq.s32.totalorder %v7818_v17, %v9342_v36  ;;  %vm9549_vm1 = vmpackc.low %vm1445_vm0, %vm1441_vm13  ;;  %vm2390_vm0 = vcmp.eq.s32.totalorder %v7841_v18, %v9265_v0 }
  0xd4   :  { %6382 = vmatmul.mubr.msk.bf16.gmra.mxu1 %vm9473_vm3, %v7731_v15  ;;  %6544 = vmatpush1.bf16.xpose.msk.msra.mxu0 %vm9483_vm6, %v7731_v15  ;;  %vm9538_vm3 = vmpackc.low %vm1443_vm11, %vm1439_vm12  ;;  %vm2399_vm6 = vcmp.eq.s32.totalorder %v7815_v16, %v9353_v22  ;;  %vm1450_vm12 = vcmp.eq.s32.totalorder %v7867_v20, %v9248_v62  ;;  %vm1454_vm11 = vcmp.eq.s32.totalorder %v7870_v21, %v9248_v62 }
  0xd5   :  { %6608 = vmatpush1.bf16.xpose.msk.msra.mxu1 %vm9491_vm15, %v7731_v15  ;;  %6320 = vmatprep.mubr.msk.bf16.mxu0 %vm9499_vm10, %v7731_v15  ;;  %vm1448_vm15 = vcmp.eq.s32.totalorder %v7867_v20, %v9234_v47  ;;  %vm1452_vm10 = vcmp.eq.s32.totalorder %v7870_v21, %v9234_v47  ;;  %vm9559_vm2 = vmpackc.low %vm2401_vm4, %vm2397_vm8  ;;  %vm2396_vm4 = vcmp.eq.s32.totalorder %v7844_v19, %v9288_v9 }
  0xd6   :  { %6384 = vmatprep.mubr.msk.bf16.mxu1 %vm14689_vm5, %v7731_v15  ;;  %6546 = vmatprep.subr.msk.bf16.mxu0 %vm6545_vm14, %v7731_v15  ;;  %vm9567_vm13 = vmpackc.low %vm2403_vm7, %vm2399_vm6  ;;  %vm2394_vm14 = vcmp.eq.s32.totalorder %v7844_v19, %v9265_v0  ;;  %vm1447_vm7 = vcmp.eq.s32.totalorder %v7867_v20, %v9311_v53  ;;  %vm1451_vm5 = vcmp.eq.s32.totalorder %v7870_v21, %v9311_v53 }
  0xd7   :  { %6610 = vmatprep.subr.msk.bf16.mxu1 %vm6609_vm9, %v7731_v15  ;;  %vm9575_vm8 = vmpackc.low %vm1452_vm10, %vm1448_vm15  ;;  %vm2392_vm9 = vcmp.eq.s32.totalorder %v7841_v18, %v9288_v9  ;;  %vm1449_vm15 = vcmp.eq.s32.totalorder %v7867_v20, %v9331_v10  ;;  %vm1453_vm10 = vcmp.eq.s32.totalorder %v7870_v21, %v9331_v10 }
  0xd8   :  { %vm9583_vm6 = vmpackc.low %vm1454_vm11, %vm1450_vm12 }
  0xd9   :  { %v14699_v54 = vsel %vm9583_vm6, 4294967295, %v14698_v54  ;;  %vm6549_vm12 = vmpackc.low %vm2394_vm14, %vm2390_vm0  ;;  %vm2389_vm6 = vcmp.eq.s32.totalorder %v7841_v18, %v9342_v36  ;;  %vm2395_vm0 = vcmp.eq.s32.totalorder %v7844_v19, %v9353_v22 }
  0xda   :  { %vm6613_vm11 = vmpackc.low %vm2396_vm4, %vm2392_vm9  ;;  %vm14702_vm14 = vnez %v14699_v54 }
  0xdb   :  { %6322 = vmatmul.mubr.msk.bf16.gmra.mxu0 %vm9538_vm3, %v7731_v15  ;;  %vm2393_vm3 = vcmp.eq.s32.totalorder %v7844_v19, %v9342_v36  ;;  %vm9625_vm9 = vmpackc.low %vm1453_vm10, %vm1449_vm15  ;;  %vm2382_vm10 = vcmp.eq.s32.totalorder %v7867_v20, %v9265_v0 }
  0xdc   :  { %6386 = vmatmul.mubr.msk.bf16.gmra.mxu1 %vm9549_vm1, %v7731_v15  ;;  %6548 = vmatpush1.bf16.xpose.msk.msra.mxu0 %vm9559_vm2, %v7731_v15  ;;  %vm9614_vm1 = vmpackc.low %vm1451_vm5, %vm1447_vm7  ;;  %vm2391_vm2 = vcmp.eq.s32.totalorder %v7841_v18, %v9353_v22  ;;  %vm1458_vm7 = vcmp.eq.s32.totalorder %v7841_v18, %v9248_v62  ;;  %vm1462_vm5 = vcmp.eq.s32.totalorder %v7844_v19, %v9248_v62 }
  0xdd   :  { %6612 = vmatpush1.bf16.xpose.msk.msra.mxu1 %vm9567_vm13, %v7731_v15  ;;  %6324 = vmatprep.mubr.msk.bf16.mxu0 %vm9575_vm8, %v7731_v15  ;;  %vm1456_vm13 = vcmp.eq.s32.totalorder %v7841_v18, %v9234_v47  ;;  %vm1460_vm8 = vcmp.eq.s32.totalorder %v7844_v19, %v9234_v47  ;;  %vm9635_vm4 = vmpackc.low %vm2393_vm3, %vm2389_vm6  ;;  %vm2388_vm3 = vcmp.eq.s32.totalorder %v7870_v21, %v9288_v9 }
  0xde   :  { %6388 = vmatprep.mubr.msk.bf16.mxu1 %vm14702_vm14, %v7731_v15  ;;  %6550 = vmatprep.subr.msk.bf16.mxu0 %vm6549_vm12, %v7731_v15  ;;  %vm9643_vm15 = vmpackc.low %vm2395_vm0, %vm2391_vm2  ;;  %vm2386_vm12 = vcmp.eq.s32.totalorder %v7870_v21, %v9265_v0  ;;  %vm1455_vm0 = vcmp.eq.s32.totalorder %v7841_v18, %v9311_v53  ;;  %vm1459_vm14 = vcmp.eq.s32.totalorder %v7844_v19, %v9311_v53 }
  0xdf   :  { %6614 = vmatprep.subr.msk.bf16.mxu1 %vm6613_vm11, %v7731_v15  ;;  %vm9651_vm6 = vmpackc.low %vm1460_vm8, %vm1456_vm13  ;;  %vm2384_vm11 = vcmp.eq.s32.totalorder %v7867_v20, %v9288_v9  ;;  %vm1457_vm13 = vcmp.eq.s32.totalorder %v7841_v18, %v9331_v10  ;;  %vm1461_vm8 = vcmp.eq.s32.totalorder %v7844_v19, %v9331_v10 }
  0xe0   :  { %vm9659_vm2 = vmpackc.low %vm1462_vm5, %vm1458_vm7 }
  0xe1   :  { %v14712_v60 = vsel %vm9659_vm2, 4294967295, %v14711_v60  ;;  %vm6553_vm7 = vmpackc.low %vm2386_vm12, %vm2382_vm10  ;;  %vm2381_vm2 = vcmp.eq.s32.totalorder %v7867_v20, %v9342_v36  ;;  %vm2387_vm10 = vcmp.eq.s32.totalorder %v7870_v21, %v9353_v22 }
  0xe2   :  { %vm6617_vm5 = vmpackc.low %vm2388_vm3, %vm2384_vm11  ;;  %vm14715_vm12 = vnez %v14712_v60 }
  0xe3   :  { %6326 = vmatmul.mubr.msk.bf16.gmra.mxu0 %vm9614_vm1, %v7731_v15  ;;  %vm2385_vm1 = vcmp.eq.s32.totalorder %v7870_v21, %v9342_v36  ;;  %vm9701_vm11 = vmpackc.low %vm1461_vm8, %vm1457_vm13  ;;  %vm2374_vm8 = vcmp.eq.s32.totalorder %v7898_v23, %v9265_v0 }
  0xe4   :  { %6390 = vmatmul.mubr.msk.bf16.gmra.mxu1 %vm9625_vm9, %v7731_v15  ;;  %6552 = vmatpush1.bf16.xpose.msk.msra.mxu0 %vm9635_vm4, %v7731_v15  ;;  %vm9690_vm9 = vmpackc.low %vm1459_vm14, %vm1455_vm0  ;;  %vm2383_vm4 = vcmp.eq.s32.totalorder %v7867_v20, %v9353_v22  ;;  %vm1466_vm0 = vcmp.eq.s32.totalorder %v7815_v16, %v9248_v62  ;;  %vm1470_vm14 = vcmp.eq.s32.totalorder %v7818_v17, %v9248_v62 }
  0xe5   :  { %6616 = vmatpush1.bf16.xpose.msk.msra.mxu1 %vm9643_vm15, %v7731_v15  ;;  %6328 = vmatprep.mubr.msk.bf16.mxu0 %vm9651_vm6, %v7731_v15  ;;  %vm1464_vm15 = vcmp.eq.s32.totalorder %v7815_v16, %v9234_v47  ;;  %vm1468_vm6 = vcmp.eq.s32.totalorder %v7818_v17, %v9234_v47  ;;  %vm9711_vm3 = vmpackc.low %vm2385_vm1, %vm2381_vm2  ;;  %vm2380_vm1 = vcmp.eq.s32.totalorder %v7901_v24, %v9288_v9 }
  0xe6   :  { %6392 = vmatprep.mubr.msk.bf16.mxu1 %vm14715_vm12, %v7731_v15  ;;  %6554 = vmatprep.subr.msk.bf16.mxu0 %vm6553_vm7, %v7731_v15  ;;  %vm9719_vm13 = vmpackc.low %vm2387_vm10, %vm2383_vm4  ;;  %vm2378_vm7 = vcmp.eq.s32.totalorder %v7901_v24, %v9265_v0  ;;  %vm1463_vm10 = vcmp.eq.s32.totalorder %v7815_v16, %v9311_v53  ;;  %vm1467_vm12 = vcmp.eq.s32.totalorder %v7818_v17, %v9311_v53 }
  0xe7   :  { %6618 = vmatprep.subr.msk.bf16.mxu1 %vm6617_vm5, %v7731_v15  ;;  %vm9727_vm2 = vmpackc.low %vm1468_vm6, %vm1464_vm15  ;;  %vm2376_vm5 = vcmp.eq.s32.totalorder %v7898_v23, %v9288_v9  ;;  %vm1465_vm15 = vcmp.eq.s32.totalorder %v7815_v16, %v9331_v10  ;;  %vm1469_vm6 = vcmp.eq.s32.totalorder %v7818_v17, %v9331_v10 }
  0xe8   :  { %vm9735_vm4 = vmpackc.low %vm1470_vm14, %vm1466_vm0 }
  0xe9   :  { %v14725_v2 = vsel %vm9735_vm4, 4294967295, %v14724_v2  ;;  %vm6557_vm0 = vmpackc.low %vm2378_vm7, %vm2374_vm8  ;;  %vm2373_vm4 = vcmp.eq.s32.totalorder %v7898_v23, %v9342_v36  ;;  %vm2379_vm8 = vcmp.eq.s32.totalorder %v7901_v24, %v9353_v22 }
  0xea   :  { %vm6621_vm14 = vmpackc.low %vm2380_vm1, %vm2376_vm5  ;;  %vm14728_vm7 = vnez %v14725_v2 }
  0xeb   :  { %6330 = vmatmul.mubr.msk.bf16.gmra.mxu0 %vm9690_vm9, %v7731_v15  ;;  %vm2377_vm9 = vcmp.eq.s32.totalorder %v7901_v24, %v9342_v36  ;;  %vm9777_vm5 = vmpackc.low %vm1469_vm6, %vm1465_vm15  ;;  %vm2366_vm6 = vcmp.eq.s32.totalorder %v7948_v29, %v9265_v0 }
  0xec   :  { %6394 = vmatmul.mubr.msk.bf16.gmra.mxu1 %vm9701_vm11, %v7731_v15  ;;  %6556 = vmatpush1.bf16.xpose.msk.msra.mxu0 %vm9711_vm3, %v7731_v15  ;;  %vm9766_vm11 = vmpackc.low %vm1467_vm12, %vm1463_vm10  ;;  %vm2375_vm3 = vcmp.eq.s32.totalorder %v7898_v23, %v9353_v22  ;;  %vm1474_vm10 = vcmp.eq.s32.totalorder %v7777_v11, %v9248_v62  ;;  %vm1478_vm12 = vcmp.eq.s32.totalorder %v7780_v12, %v9248_v62 }
  0xed   :  { %6620 = vmatpush1.bf16.xpose.msk.msra.mxu1 %vm9719_vm13, %v7731_v15  ;;  %6332 = vmatprep.mubr.msk.bf16.mxu0 %vm9727_vm2, %v7731_v15  ;;  %vm1472_vm13 = vcmp.eq.s32.totalorder %v7777_v11, %v9234_v47  ;;  %vm1476_vm2 = vcmp.eq.s32.totalorder %v7780_v12, %v9234_v47  ;;  %vm9787_vm1 = vmpackc.low %vm2377_vm9, %vm2373_vm4  ;;  %vm2372_vm9 = vcmp.eq.s32.totalorder %v7951_v30, %v9288_v9 }
  0xee   :  { %6396 = vmatprep.mubr.msk.bf16.mxu1 %vm14728_vm7, %v7731_v15  ;;  %6558 = vmatprep.subr.msk.bf16.mxu0 %vm6557_vm0, %v7731_v15  ;;  %vm9795_vm15 = vmpackc.low %vm2379_vm8, %vm2375_vm3  ;;  %vm2370_vm0 = vcmp.eq.s32.totalorder %v7951_v30, %v9265_v0  ;;  %vm1471_vm8 = vcmp.eq.s32.totalorder %v7777_v11, %v9311_v53  ;;  %vm1475_vm7 = vcmp.eq.s32.totalorder %v7780_v12, %v9311_v53 }
  0xef   :  { %6622 = vmatprep.subr.msk.bf16.mxu1 %vm6621_vm14, %v7731_v15  ;;  %vm9803_vm4 = vmpackc.low %vm1476_vm2, %vm1472_vm13  ;;  %vm2368_vm14 = vcmp.eq.s32.totalorder %v7948_v29, %v9288_v9  ;;  %vm1473_vm13 = vcmp.eq.s32.totalorder %v7777_v11, %v9331_v10  ;;  %vm1477_vm2 = vcmp.eq.s32.totalorder %v7780_v12, %v9331_v10 }
  0xf0   :  { %vm9811_vm3 = vmpackc.low %vm1478_vm12, %vm1474_vm10 }
  0xf1   :  { %v14738_v31 = vsel %vm9811_vm3, 4294967295, %v14737_v31  ;;  %vm6561_vm10 = vmpackc.low %vm2370_vm0, %vm2366_vm6  ;;  %vm2365_vm3 = vcmp.eq.s32.totalorder %v7948_v29, %v9342_v36  ;;  %vm2371_vm6 = vcmp.eq.s32.totalorder %v7951_v30, %v9353_v22 }
  0xf2   :  { %vm6625_vm12 = vmpackc.low %vm2372_vm9, %vm2368_vm14  ;;  %vm14741_vm0 = vnez %v14738_v31 }
  0xf3   :  { %6334 = vmatmul.mubr.msk.bf16.gmra.mxu0 %vm9766_vm11, %v7731_v15  ;;  %vm2369_vm11 = vcmp.eq.s32.totalorder %v7951_v30, %v9342_v36  ;;  %vm9853_vm14 = vmpackc.low %vm1477_vm2, %vm1473_vm13  ;;  %vm2362_vm2 = vcmp.eq.s32.totalorder %v7921_v27, %v9265_v0 }
  0xf4   :  { %6398 = vmatmul.mubr.msk.bf16.gmra.mxu1 %vm9777_vm5, %v7731_v15  ;;  %6560 = vmatpush1.bf16.xpose.msk.msra.mxu0 %vm9787_vm1, %v7731_v15  ;;  %vm9842_vm5 = vmpackc.low %vm1475_vm7, %vm1471_vm8  ;;  %vm2367_vm1 = vcmp.eq.s32.totalorder %v7948_v29, %v9353_v22  ;;  %vm1482_vm8 = vcmp.eq.s32.totalorder %v7753_v3, %v9248_v62  ;;  %vm1486_vm7 = vcmp.eq.s32.totalorder %v7756_v4, %v9248_v62  ;;  %v6666_v62 = vld [vmem:[%s14443_s1 + $0x4] ss:$8 sm:$0xf] }
  0xf5   :  { %6624 = vmatpush1.bf16.xpose.msk.msra.mxu1 %vm9795_vm15, %v7731_v15  ;;  %6336 = vmatprep.mubr.msk.bf16.mxu0 %vm9803_vm4, %v7731_v15  ;;  %vm1480_vm15 = vcmp.eq.s32.totalorder %v7753_v3, %v9234_v47  ;;  %vm1484_vm4 = vcmp.eq.s32.totalorder %v7756_v4, %v9234_v47  ;;  %vm9863_vm9 = vmpackc.low %vm2369_vm11, %vm2365_vm3  ;;  %vm2358_vm3 = vcmp.eq.s32.totalorder %v7747_v1, %v9265_v0 }
  0xf6   :  { %6400 = vmatprep.mubr.msk.bf16.mxu1 %vm14741_vm0, %v7731_v15  ;;  %6562 = vmatprep.subr.msk.bf16.mxu0 %vm6561_vm10, %v7731_v15  ;;  %vm9874_vm13 = vmpackc.low %vm2371_vm6, %vm2367_vm1  ;;  %vm2364_vm11 = vcmp.eq.s32.totalorder %v7921_v27, %v9288_v9  ;;  %vm1479_vm6 = vcmp.eq.s32.totalorder %v7753_v3, %v9311_v53  ;;  %vm1483_vm0 = vcmp.eq.s32.totalorder %v7756_v4, %v9311_v53 }
  0xf7   :  { %6626 = vmatprep.subr.msk.bf16.mxu1 %vm6625_vm12, %v7731_v15  ;;  %vm9882_vm10 = vmpackc.low %vm1484_vm4, %vm1480_vm15  ;;  %vm2360_vm12 = vcmp.eq.s32.totalorder %v7747_v1, %v9288_v9  ;;  %v9902_v0 = vrot.slane %v6407_v41, %v7759_v5  ;;  %vm1481_vm15 = vcmp.eq.s32.totalorder %v7753_v3, %v9331_v10  ;;  %vm1485_vm4 = vcmp.eq.s32.totalorder %v7756_v4, %v9331_v10 }
  0xf8   :  { %vm9893_vm1 = vmpackc.low %vm1486_vm7, %vm1482_vm8  ;;  %vm2357_vm7 = vcmp.eq.s32.totalorder %v7747_v1, %v9342_v36  ;;  %v9933_v44 = vrot.slane %v6666_v62, %v7759_v5  ;;  %v9956_v46 = vrot.slane %v6666_v62, %v7762_v6  ;;  %v10021_v51 = vrot.slane %v6666_v62, %v7768_v8 }
  0xf9   :  { %vm9911_vm8 = vmpackc.low %vm2362_vm2, %vm2358_vm3  ;;  %vm2361_vm3 = vcmp.eq.s32.totalorder %v7921_v27, %v9342_v36  ;;  %v10010_v36 = vrot.slane %v6666_v62, %v7765_v7 }
  0xfa   :  { %vm9967_vm2 = vmpackc.low %vm1485_vm4, %vm1481_vm15  ;;  %vm3108_vm15 = vcmp.eq.s32.totalorder %v7753_v3, %v9933_v44  ;;  %vm3112_vm4 = vcmp.eq.s32.totalorder %v7756_v4, %v9933_v44 }
  0xfb   :  { %6338 = vmatmul.mubr.msk.bf16.gmra.mxu0 %vm9842_vm5, %v7731_v15  ;;  %vm9924_vm5 = vmpackc.low %vm2364_vm11, %vm2360_vm12  ;;  %vm2122_vm12 = vcmp.eq.s32.totalorder %v7921_v27, %v9902_v0 }
  0xfc   :  { %6402 = vmatmul.mubr.msk.bf16.gmra.mxu1 %vm9853_vm14, %v7731_v15  ;;  %6564 = vmatpush1.bf16.xpose.msk.msra.mxu0 %vm9863_vm9, %v7731_v15  ;;  %vm9947_vm14 = vmpackc.low %vm1483_vm0, %vm1479_vm6  ;;  %vm2359_vm9 = vcmp.eq.s32.totalorder %v7747_v1, %v9353_v22  ;;  %vm2124_vm6 = vcmp.eq.s32.totalorder %v7921_v27, %v9916_v25 }
  0xfd   :  { %6628 = vmatpush1.bf16.xpose.msk.msra.mxu1 %vm9874_vm13, %v7731_v15  ;;  %6340 = vmatprep.mubr.msk.bf16.mxu0 %vm9882_vm10, %v7731_v15  ;;  %vm2363_vm13 = vcmp.eq.s32.totalorder %v7921_v27, %v9353_v22  ;;  %vm2118_vm10 = vcmp.eq.s32.totalorder %v7747_v1, %v9902_v0  ;;  %v9979_v22 = vrot.slane %v6407_v41, %v7765_v7  ;;  %vm9990_vm11 = vmpackc.low %vm2361_vm3, %vm2357_vm7 }
  0xfe   :  { %6404 = vmatprep.mubr.msk.bf16.mxu1 %vm9893_vm1, %v7731_v15  ;;  %6566 = vmatprep.subr.msk.bf16.mxu0 %vm9911_vm8, %v7731_v15  ;;  %vm2120_vm1 = vcmp.eq.s32.totalorder %v7747_v1, %v9916_v25  ;;  %vm10001_vm0 = vmpackc.low %vm2363_vm13, %vm2359_vm9  ;;  %vm3114_vm7 = vcmp.eq.s32.totalorder %v7756_v4, %v9956_v46 }
  0xff   :  { %6630 = vmatprep.subr.msk.bf16.mxu1 %vm9924_vm5, %v7731_v15  ;;  %vm10012_vm8 = vmpackc.low %vm2122_vm12, %vm2118_vm10  ;;  %vm3110_vm5 = vcmp.eq.s32.totalorder %v7753_v3, %v9956_v46  ;;  %vm2117_vm9 = vcmp.eq.s32.totalorder %v7747_v1, %v9979_v22  ;;  %vm2121_vm13 = vcmp.eq.s32.totalorder %v7921_v27, %v9979_v22  ;;  %vm2119_vm10 = vcmp.eq.s32.totalorder %v7747_v1, %v9999_v48 }
 0x100   :  { %vm10023_vm3 = vmpackc.low %vm2124_vm6, %vm2120_vm1  ;;  %vm2123_vm12 = vcmp.eq.s32.totalorder %v7921_v27, %v9999_v48 }
 0x101   :  { %v14767_v52 = vsel %vm10023_vm3, 4294967295, %v14766_v52  ;;  %vm6795_vm1 = vmpackc.low %vm3112_vm4, %vm3108_vm15  ;;  %vm3107_vm3 = vcmp.eq.s32.totalorder %v7753_v3, %v10010_v36  ;;  %vm3113_vm15 = vcmp.eq.s32.totalorder %v7756_v4, %v10021_v51 }
 0x102   :  { %vm6859_vm6 = vmpackc.low %vm3114_vm7, %vm3110_vm5  ;;  %vm14770_vm4 = vnez %v14767_v52 }
 0x103   :  { %6342 = vmatmul.mubr.msk.bf16.gmra.mxu0 %vm9947_vm14, %v7731_v15  ;;  %vm3111_vm14 = vcmp.eq.s32.totalorder %v7756_v4, %v10010_v36  ;;  %vm10065_vm5 = vmpackc.low %vm2123_vm12, %vm2119_vm10  ;;  %vm3100_vm12 = vcmp.eq.s32.totalorder %v7777_v11, %v9933_v44 }
 0x104   :  { %6406 = vmatmul.mubr.msk.bf16.gmra.mxu1 %vm9967_vm2, %v7731_v15  ;;  %6568 = vmatpush1.bf16.xpose.msk.msra.mxu0 %vm9990_vm11, %v7731_v15  ;;  %vm10054_vm2 = vmpackc.low %vm2121_vm13, %vm2117_vm9  ;;  %vm3109_vm11 = vcmp.eq.s32.totalorder %v7753_v3, %v10021_v51  ;;  %vm2128_vm9 = vcmp.eq.s32.totalorder %v7948_v29, %v9916_v25  ;;  %vm2132_vm13 = vcmp.eq.s32.totalorder %v7951_v30, %v9916_v25 }
 0x105   :  { %6632 = vmatpush1.bf16.xpose.msk.msra.mxu1 %vm10001_vm0, %v7731_v15  ;;  %6570 = vmatprep.mubr.msk.bf16.mxu0 %vm10012_vm8, %v7731_v15  ;;  %vm2126_vm0 = vcmp.eq.s32.totalorder %v7948_v29, %v9902_v0  ;;  %vm2130_vm8 = vcmp.eq.s32.totalorder %v7951_v30, %v9902_v0  ;;  %vm10075_vm7 = vmpackc.low %vm3111_vm14, %vm3107_vm3  ;;  %vm3106_vm14 = vcmp.eq.s32.totalorder %v7780_v12, %v9956_v46 }
 0x106   :  { %6634 = vmatprep.mubr.msk.bf16.mxu1 %vm14770_vm4, %v7731_v15  ;;  %6796 = vmatprep.subr.msk.bf16.mxu0 %vm6795_vm1, %v7731_v15  ;;  %vm10083_vm10 = vmpackc.low %vm3113_vm15, %vm3109_vm11  ;;  %vm3104_vm1 = vcmp.eq.s32.totalorder %v7780_v12, %v9933_v44  ;;  %vm2125_vm15 = vcmp.eq.s32.totalorder %v7948_v29, %v9979_v22  ;;  %vm2129_vm4 = vcmp.eq.s32.totalorder %v7951_v30, %v9979_v22 }
 0x107   :  { %6860 = vmatprep.subr.msk.bf16.mxu1 %vm6859_vm6, %v7731_v15  ;;  %vm10091_vm3 = vmpackc.low %vm2130_vm8, %vm2126_vm0  ;;  %vm3102_vm6 = vcmp.eq.s32.totalorder %v7777_v11, %v9956_v46  ;;  %vm2127_vm0 = vcmp.eq.s32.totalorder %v7948_v29, %v9999_v48  ;;  %vm2131_vm8 = vcmp.eq.s32.totalorder %v7951_v30, %v9999_v48 }
 0x108   :  { %vm10099_vm11 = vmpackc.low %vm2132_vm13, %vm2128_vm9  ;;  %vm3099_vm13 = vcmp.eq.s32.totalorder %v7777_v11, %v10010_v36 }
 0x109   :  { %vm10114_vm9 = vmpackc.low %vm3104_vm1, %vm3100_vm12  ;;  %vm3103_vm12 = vcmp.eq.s32.totalorder %v7780_v12, %v10010_v36 }
 0x10a   :  { %vm10163_vm1 = vmpackc.low %vm2131_vm8, %vm2127_vm0  ;;  %vm3092_vm0 = vcmp.eq.s32.totalorder %v7815_v16, %v9933_v44  ;;  %vm3096_vm8 = vcmp.eq.s32.totalorder %v7818_v17, %v9933_v44 }
 0x10b   :  { %v1049_v60 = vpop.f32.mrf.mxu0  ;;  %6572 = vmatmul.mubr.msk.bf16.vlgmr.msra.gmra.mxu0 %vm10054_vm2, %v7731_v15  ;;  %vm10124_vm2 = vmpackc.low %vm3106_vm14, %vm3102_vm6  ;;  %vm2138_vm6 = vcmp.eq.s32.totalorder %v7901_v24, %v9902_v0 }
 0x10c   :  { %v1146_v45 = vpop.f32.mrf.mxu1  ;;  %6636 = vmatmul.mubr.msk.bf16.vlgmr.msra.gmra.mxu1 %vm10065_vm5, %v7731_v15  ;;  %6798 = vmatpush1.bf16.xpose.msk.msra.mxu0 %vm10075_vm7, %v7731_v15  ;;  %vm10146_vm5 = vmpackc.low %vm2129_vm4, %vm2125_vm15  ;;  %vm3101_vm7 = vcmp.eq.s32.totalorder %v7777_v11, %v10021_v51  ;;  %vm2140_vm15 = vcmp.eq.s32.totalorder %v7901_v24, %v9916_v25 }
 0x10d   :  { %v10132_v49 = vadd.f32 %v1146_v45, %v1049_v60  ;;  %6862 = vmatpush1.bf16.xpose.msk.msra.mxu1 %vm10083_vm10, %v7731_v15  ;;  %v1051_v63 = vpop.f32.mrf.mxu0  ;;  %6574 = vmatprep.mubr.msk.bf16.mxu0 %vm10091_vm3, %v7731_v15  ;;  %vm3105_vm10 = vcmp.eq.s32.totalorder %v7780_v12, %v10021_v51  ;;  %vm2134_vm3 = vcmp.eq.s32.totalorder %v7898_v23, %v9902_v0  ;;  %vm10183_vm14 = vmpackc.low %vm3103_vm12, %vm3099_vm13 }
 0x10e   :  { %v1148_v37 = vpop.f32.mrf.mxu1  ;;  %6638 = vmatprep.mubr.msk.bf16.mxu1 %vm10099_vm11, %v7731_v15  ;;  %6800 = vmatprep.subr.msk.bf16.mxu0 %vm10114_vm9, %v7731_v15  ;;  %vm2136_vm11 = vcmp.eq.s32.totalorder %v7898_v23, %v9916_v25  ;;  %vm10191_vm4 = vmpackc.low %vm3105_vm10, %vm3101_vm7  ;;  %vm3098_vm13 = vcmp.eq.s32.totalorder %v7818_v17, %v9956_v46  ;;  %vm2133_vm7 = vcmp.eq.s32.totalorder %v7898_v23, %v9979_v22 }
 0x10f   :  { %v1052_v13 = vpop.f32.mrf.mxu0  ;;  %6864 = vmatprep.subr.msk.bf16.mxu1 %vm10124_vm2, %v7731_v15  ;;  %vm10201_vm9 = vmpackc.low %vm2138_vm6, %vm2134_vm3  ;;  %vm3094_vm2 = vcmp.eq.s32.totalorder %v7815_v16, %v9956_v46  ;;  %vm2137_vm10 = vcmp.eq.s32.totalorder %v7901_v24, %v9979_v22  ;;  %vm2135_vm3 = vcmp.eq.s32.totalorder %v7898_v23, %v9999_v48  ;;  %vm2139_vm6 = vcmp.eq.s32.totalorder %v7901_v24, %v9999_v48 }
 0x110   :  { %v1149_v28 = vpop.f32.mrf.mxu1  ;;  %vm10209_vm12 = vmpackc.low %vm2140_vm15, %vm2136_vm11  ;;  %vm3091_vm15 = vcmp.eq.s32.totalorder %v7815_v16, %v10010_v36 }
 0x111   :  { %v10199_v38 = vadd.f32 %v1149_v28, %v1052_v13  ;;  %v1054_v39 = vpop.f32.mrf.mxu0  ;;  %vm10227_vm11 = vmpackc.low %vm3096_vm8, %vm3092_vm0  ;;  %vm3095_vm0 = vcmp.eq.s32.totalorder %v7818_v17, %v10010_v36 }
 0x112   :  { %v1151_v41 = vpop.f32.mrf.mxu1  ;;  %vm10276_vm8 = vmpackc.low %vm2139_vm6, %vm2135_vm3  ;;  %vm3084_vm3 = vcmp.eq.s32.totalorder %v7841_v18, %v9933_v44  ;;  %vm3088_vm6 = vcmp.eq.s32.totalorder %v7844_v19, %v9933_v44 }
 0x113   :  { %v1057_v47 = vpop.f32.mrf.mxu0  ;;  %6576 = vmatmul.mubr.msk.bf16.gmra.mxu0 %vm10146_vm5, %v7731_v15  ;;  %vm10237_vm5 = vmpackc.low %vm3098_vm13, %vm3094_vm2  ;;  %vm2146_vm2 = vcmp.eq.s32.totalorder %v7870_v21, %v9902_v0 }
 0x114   :  { %v1154_v43 = vpop.f32.mrf.mxu1  ;;  %6640 = vmatmul.mubr.msk.bf16.gmra.mxu1 %vm10163_vm1, %v7731_v15  ;;  %6802 = vmatpush1.bf16.xpose.msk.msra.mxu0 %vm10183_vm14, %v7731_v15  ;;  %vm10259_vm1 = vmpackc.low %vm2137_vm10, %vm2133_vm7  ;;  %vm3093_vm14 = vcmp.eq.s32.totalorder %v7815_v16, %v10021_v51  ;;  %vm2148_vm7 = vcmp.eq.s32.totalorder %v7870_v21, %v9916_v25 }
 0x115   :  { %v10245_v26 = vadd.f32 %v1154_v43, %v1057_v47  ;;  %6866 = vmatpush1.bf16.xpose.msk.msra.mxu1 %vm10191_vm4, %v7731_v15  ;;  %v1059_v33 = vpop.f32.mrf.mxu0  ;;  %6578 = vmatprep.mubr.msk.bf16.mxu0 %vm10201_vm9, %v7731_v15  ;;  %vm3097_vm4 = vcmp.eq.s32.totalorder %v7818_v17, %v10021_v51  ;;  %vm2142_vm9 = vcmp.eq.s32.totalorder %v7867_v20, %v9902_v0  ;;  %vm10296_vm13 = vmpackc.low %vm3095_vm0, %vm3091_vm15 }
 0x116   :  { %v1156_v10 = vpop.f32.mrf.mxu1  ;;  %6642 = vmatprep.mubr.msk.bf16.mxu1 %vm10209_vm12, %v7731_v15  ;;  %6804 = vmatprep.subr.msk.bf16.mxu0 %vm10227_vm11, %v7731_v15  ;;  %vm2144_vm12 = vcmp.eq.s32.totalorder %v7867_v20, %v9916_v25  ;;  %vm10304_vm10 = vmpackc.low %vm3097_vm4, %vm3093_vm14  ;;  %vm3090_vm15 = vcmp.eq.s32.totalorder %v7844_v19, %v9956_v46  ;;  %vm2141_vm14 = vcmp.eq.s32.totalorder %v7867_v20, %v9979_v22 }
 0x117   :  { %v1060_v35 = vpop.f32.mrf.mxu0  ;;  %6868 = vmatprep.subr.msk.bf16.mxu1 %vm10237_vm5, %v7731_v15  ;;  %vm10314_vm11 = vmpackc.low %vm2146_vm2, %vm2142_vm9  ;;  %vm3086_vm5 = vcmp.eq.s32.totalorder %v7841_v18, %v9956_v46  ;;  %vm2145_vm4 = vcmp.eq.s32.totalorder %v7870_v21, %v9979_v22  ;;  %vm2143_vm9 = vcmp.eq.s32.totalorder %v7867_v20, %v9999_v48  ;;  %vm2147_vm2 = vcmp.eq.s32.totalorder %v7870_v21, %v9999_v48 }
 0x118   :  { %v1157_v54 = vpop.f32.mrf.mxu1  ;;  %vm10322_vm0 = vmpackc.low %vm2148_vm7, %vm2144_vm12  ;;  %vm3083_vm7 = vcmp.eq.s32.totalorder %v7841_v18, %v10010_v36 }
 0x119   :  { %v10312_v56 = vadd.f32 %v1157_v54, %v1060_v35  ;;  %v1062_v57 = vpop.f32.mrf.mxu0  ;;  %vm10340_vm12 = vmpackc.low %vm3088_vm6, %vm3084_vm3  ;;  %vm3087_vm3 = vcmp.eq.s32.totalorder %v7844_v19, %v10010_v36 }
 0x11a   :  { %v1159_v59 = vpop.f32.mrf.mxu1  ;;  %vm10389_vm6 = vmpackc.low %vm2147_vm2, %vm2143_vm9  ;;  %vm3076_vm9 = vcmp.eq.s32.totalorder %v7867_v20, %v9933_v44  ;;  %vm3080_vm2 = vcmp.eq.s32.totalorder %v7870_v21, %v9933_v44 }
 0x11b   :  { %v1065_v32 = vpop.f32.mrf.mxu0  ;;  %6580 = vmatmul.mubr.msk.bf16.gmra.mxu0 %vm10259_vm1, %v7731_v15  ;;  %vm10350_vm1 = vmpackc.low %vm3090_vm15, %vm3086_vm5  ;;  %vm2154_vm5 = vcmp.eq.s32.totalorder %v7844_v19, %v9902_v0 }
 0x11c   :  { %v1162_v61 = vpop.f32.mrf.mxu1  ;;  %6644 = vmatmul.mubr.msk.bf16.gmra.mxu1 %vm10276_vm8, %v7731_v15  ;;  %6806 = vmatpush1.bf16.xpose.msk.msra.mxu0 %vm10296_vm13, %v7731_v15  ;;  %vm10372_vm8 = vmpackc.low %vm2145_vm4, %vm2141_vm14  ;;  %vm3085_vm13 = vcmp.eq.s32.totalorder %v7841_v18, %v10021_v51  ;;  %vm2156_vm14 = vcmp.eq.s32.totalorder %v7844_v19, %v9916_v25 }
 0x11d   :  { %v10358_v2 = vadd.f32 %v1162_v61, %v1065_v32  ;;  %6870 = vmatpush1.bf16.xpose.msk.msra.mxu1 %vm10304_vm10, %v7731_v15  ;;  %v1067_v37 = vpop.f32.mrf.mxu0  ;;  %6582 = vmatprep.mubr.msk.bf16.mxu0 %vm10314_vm11, %v7731_v15  ;;  %vm3089_vm10 = vcmp.eq.s32.totalorder %v7844_v19, %v10021_v51  ;;  %vm2150_vm11 = vcmp.eq.s32.totalorder %v7841_v18, %v9902_v0  ;;  %vm10409_vm15 = vmpackc.low %vm3087_vm3, %vm3083_vm7 }
 0x11e   :  { %v1164_v13 = vpop.f32.mrf.mxu1  ;;  %6646 = vmatprep.mubr.msk.bf16.mxu1 %vm10322_vm0, %v7731_v15  ;;  %6808 = vmatprep.subr.msk.bf16.mxu0 %vm10340_vm12, %v7731_v15  ;;  %vm2152_vm0 = vcmp.eq.s32.totalorder %v7841_v18, %v9916_v25  ;;  %vm10417_vm4 = vmpackc.low %vm3089_vm10, %vm3085_vm13  ;;  %vm3082_vm7 = vcmp.eq.s32.totalorder %v7870_v21, %v9956_v46  ;;  %vm2149_vm13 = vcmp.eq.s32.totalorder %v7841_v18, %v9979_v22 }
 0x11f   :  { %v1068_v28 = vpop.f32.mrf.mxu0  ;;  %6872 = vmatprep.subr.msk.bf16.mxu1 %vm10350_vm1, %v7731_v15  ;;  %vm10427_vm12 = vmpackc.low %vm2154_vm5, %vm2150_vm11  ;;  %vm3078_vm1 = vcmp.eq.s32.totalorder %v7867_v20, %v9956_v46  ;;  %vm2153_vm10 = vcmp.eq.s32.totalorder %v7844_v19, %v9979_v22  ;;  %vm2151_vm11 = vcmp.eq.s32.totalorder %v7841_v18, %v9999_v48  ;;  %vm2155_vm5 = vcmp.eq.s32.totalorder %v7844_v19, %v9999_v48 }
 0x120   :  { %v1165_v39 = vpop.f32.mrf.mxu1  ;;  %vm10435_vm3 = vmpackc.low %vm2156_vm14, %vm2152_vm0  ;;  %vm3075_vm14 = vcmp.eq.s32.totalorder %v7867_v20, %v10010_v36 }
 0x121   :  { %v10425_v41 = vadd.f32 %v1165_v39, %v1068_v28  ;;  %v1070_v42 = vpop.f32.mrf.mxu0  ;;  %vm10453_vm0 = vmpackc.low %vm3080_vm2, %vm3076_vm9  ;;  %vm3079_vm9 = vcmp.eq.s32.totalorder %v7870_v21, %v10010_v36 }
 0x122   :  { %v1167_v62 = vpop.f32.mrf.mxu1  ;;  %vm10502_vm2 = vmpackc.low %vm2155_vm5, %vm2151_vm11  ;;  %vm3068_vm11 = vcmp.eq.s32.totalorder %v7898_v23, %v9933_v44  ;;  %vm3072_vm5 = vcmp.eq.s32.totalorder %v7901_v24, %v9933_v44 }
 0x123   :  { %v1073_v9 = vpop.f32.mrf.mxu0  ;;  %6584 = vmatmul.mubr.msk.bf16.gmra.mxu0 %vm10372_vm8, %v7731_v15  ;;  %vm10463_vm8 = vmpackc.low %vm3082_vm7, %vm3078_vm1  ;;  %vm2162_vm1 = vcmp.eq.s32.totalorder %v7818_v17, %v9902_v0 }
 0x124   :  { %v1170_v53 = vpop.f32.mrf.mxu1  ;;  %6648 = vmatmul.mubr.msk.bf16.gmra.mxu1 %vm10389_vm6, %v7731_v15  ;;  %6810 = vmatpush1.bf16.xpose.msk.msra.mxu0 %vm10409_vm15, %v7731_v15  ;;  %vm10485_vm6 = vmpackc.low %vm2153_vm10, %vm2149_vm13  ;;  %vm3077_vm15 = vcmp.eq.s32.totalorder %v7867_v20, %v10021_v51  ;;  %vm2164_vm13 = vcmp.eq.s32.totalorder %v7818_v17, %v9916_v25 }
 0x125   :  { %v10471_v34 = vadd.f32 %v1170_v53, %v1073_v9  ;;  %6874 = vmatpush1.bf16.xpose.msk.msra.mxu1 %vm10417_vm4, %v7731_v15  ;;  %v1075_v35 = vpop.f32.mrf.mxu0  ;;  %6586 = vmatprep.mubr.msk.bf16.mxu0 %vm10427_vm12, %v7731_v15  ;;  %vm3081_vm4 = vcmp.eq.s32.totalorder %v7870_v21, %v10021_v51  ;;  %vm2158_vm12 = vcmp.eq.s32.totalorder %v7815_v16, %v9902_v0  ;;  %vm10522_vm7 = vmpackc.low %vm3079_vm9, %vm3075_vm14 }
 0x126   :  { %v1172_v54 = vpop.f32.mrf.mxu1  ;;  %6650 = vmatprep.mubr.msk.bf16.mxu1 %vm10435_vm3, %v7731_v15  ;;  %6812 = vmatprep.subr.msk.bf16.mxu0 %vm10453_vm0, %v7731_v15  ;;  %vm2160_vm3 = vcmp.eq.s32.totalorder %v7815_v16, %v9916_v25  ;;  %vm10530_vm10 = vmpackc.low %vm3081_vm4, %vm3077_vm15  ;;  %vm3074_vm14 = vcmp.eq.s32.totalorder %v7901_v24, %v9956_v46  ;;  %vm2157_vm15 = vcmp.eq.s32.totalorder %v7815_v16, %v9979_v22 }
 0x127   :  { %v1076_v57 = vpop.f32.mrf.mxu0  ;;  %6876 = vmatprep.subr.msk.bf16.mxu1 %vm10463_vm8, %v7731_v15  ;;  %vm10540_vm0 = vmpackc.low %vm2162_vm1, %vm2158_vm12  ;;  %vm3070_vm8 = vcmp.eq.s32.totalorder %v7898_v23, %v9956_v46  ;;  %vm2161_vm4 = vcmp.eq.s32.totalorder %v7818_v17, %v9979_v22  ;;  %vm2159_vm12 = vcmp.eq.s32.totalorder %v7815_v16, %v9999_v48  ;;  %vm2163_vm1 = vcmp.eq.s32.totalorder %v7818_v17, %v9999_v48 }
 0x128   :  { %v1173_v59 = vpop.f32.mrf.mxu1  ;;  %vm10548_vm9 = vmpackc.low %vm2164_vm13, %vm2160_vm3  ;;  %vm3067_vm13 = vcmp.eq.s32.totalorder %v7898_v23, %v10010_v36 }
 0x129   :  { %v10538_v32 = vadd.f32 %v1173_v59, %v1076_v57  ;;  %v1078_v45 = vpop.f32.mrf.mxu0  ;;  %vm10566_vm3 = vmpackc.low %vm3072_vm5, %vm3068_vm11  ;;  %vm3071_vm11 = vcmp.eq.s32.totalorder %v7901_v24, %v10010_v36 }
 0x12a   :  { %v1175_v63 = vpop.f32.mrf.mxu1  ;;  %vm10615_vm5 = vmpackc.low %vm2163_vm1, %vm2159_vm12  ;;  %vm3060_vm12 = vcmp.eq.s32.totalorder %v7948_v29, %v9933_v44  ;;  %vm3064_vm1 = vcmp.eq.s32.totalorder %v7951_v30, %v9933_v44 }
 0x12b   :  { %v1081_v50 = vpop.f32.mrf.mxu0  ;;  %6588 = vmatmul.mubr.msk.bf16.gmra.mxu0 %vm10485_vm6, %v7731_v15  ;;  %vm10576_vm6 = vmpackc.low %vm3074_vm14, %vm3070_vm8  ;;  %vm2170_vm8 = vcmp.eq.s32.totalorder %v7780_v12, %v9902_v0 }
 0x12c   :  { %v1178_v14 = vpop.f32.mrf.mxu1  ;;  %6652 = vmatmul.mubr.msk.bf16.gmra.mxu1 %vm10502_vm2, %v7731_v15  ;;  %6814 = vmatpush1.bf16.xpose.msk.msra.mxu0 %vm10522_vm7, %v7731_v15  ;;  %vm10598_vm2 = vmpackc.low %vm2161_vm4, %vm2157_vm15  ;;  %vm3069_vm7 = vcmp.eq.s32.totalorder %v7898_v23, %v10021_v51  ;;  %vm2172_vm15 = vcmp.eq.s32.totalorder %v7780_v12, %v9916_v25 }
 0x12d   :  { %v10584_v31 = vadd.f32 %v1178_v14, %v1081_v50  ;;  %6878 = vmatpush1.bf16.xpose.msk.msra.mxu1 %vm10530_vm10, %v7731_v15  ;;  %v1083_v39 = vpop.f32.mrf.mxu0  ;;  %6590 = vmatprep.mubr.msk.bf16.mxu0 %vm10540_vm0, %v7731_v15  ;;  %vm3073_vm10 = vcmp.eq.s32.totalorder %v7901_v24, %v10021_v51  ;;  %vm2166_vm0 = vcmp.eq.s32.totalorder %v7777_v11, %v9902_v0  ;;  %vm10635_vm14 = vmpackc.low %vm3071_vm11, %vm3067_vm13 }
 0x12e   :  { %v1180_v42 = vpop.f32.mrf.mxu1  ;;  %6654 = vmatprep.mubr.msk.bf16.mxu1 %vm10548_vm9, %v7731_v15  ;;  %6816 = vmatprep.subr.msk.bf16.mxu0 %vm10566_vm3, %v7731_v15  ;;  %vm2168_vm9 = vcmp.eq.s32.totalorder %v7777_v11, %v9916_v25  ;;  %vm10643_vm4 = vmpackc.low %vm3073_vm10, %vm3069_vm7  ;;  %vm3066_vm13 = vcmp.eq.s32.totalorder %v7951_v30, %v9956_v46  ;;  %vm2165_vm7 = vcmp.eq.s32.totalorder %v7777_v11, %v9979_v22 }
 0x12f   :  { %v1084_v62 = vpop.f32.mrf.mxu0  ;;  %6880 = vmatprep.subr.msk.bf16.mxu1 %vm10576_vm6, %v7731_v15  ;;  %vm10653_vm3 = vmpackc.low %vm2170_vm8, %vm2166_vm0  ;;  %vm3062_vm6 = vcmp.eq.s32.totalorder %v7948_v29, %v9956_v46  ;;  %vm2169_vm10 = vcmp.eq.s32.totalorder %v7780_v12, %v9979_v22  ;;  %vm2167_vm0 = vcmp.eq.s32.totalorder %v7777_v11, %v9999_v48  ;;  %vm2171_vm8 = vcmp.eq.s32.totalorder %v7780_v12, %v9999_v48  ;;  %v6924_v42 = vld [vmem:[%s14443_s1 + $0x5] ss:$8 sm:$0xf] }
 0x130   :  { %v1181_v9 = vpop.f32.mrf.mxu1  ;;  %vm10661_vm11 = vmpackc.low %vm2172_vm15, %vm2168_vm9  ;;  %vm3059_vm15 = vcmp.eq.s32.totalorder %v7948_v29, %v10010_v36  ;;  %v10860_v57 = vrot.slane %v6924_v42, %v7762_v6  ;;  %v10920_v37 = vrot.slane %v6924_v42, %v7765_v7 }
 0x131   :  { %v10651_v53 = vadd.f32 %v1181_v9, %v1084_v62  ;;  %v1086_v10 = vpop.f32.mrf.mxu0  ;;  %vm10679_vm9 = vmpackc.low %vm3064_vm1, %vm3060_vm12  ;;  %vm3063_vm12 = vcmp.eq.s32.totalorder %v7951_v30, %v10010_v36 }
 0x132   :  { %v1183_v52 = vpop.f32.mrf.mxu1  ;;  %vm10728_vm1 = vmpackc.low %vm2171_vm8, %vm2167_vm0  ;;  %vm3052_vm0 = vcmp.eq.s32.totalorder %v7747_v1, %v9933_v44  ;;  %vm3056_vm8 = vcmp.eq.s32.totalorder %v7921_v27, %v9933_v44 }
 0x133   :  { %v1089_v55 = vpop.f32.mrf.mxu0  ;;  %6592 = vmatmul.mubr.msk.bf16.gmra.mxu0 %vm10598_vm2, %v7731_v15  ;;  %vm10689_vm2 = vmpackc.low %vm3066_vm13, %vm3062_vm6  ;;  %vm2178_vm6 = vcmp.eq.s32.totalorder %v7756_v4, %v9902_v0  ;;  %v10837_v52 = vrot.slane %v6924_v42, %v7759_v5 }
 0x134   :  { %v1186_v58 = vpop.f32.mrf.mxu1  ;;  %6656 = vmatmul.mubr.msk.bf16.gmra.mxu1 %vm10615_vm5, %v7731_v15  ;;  %6818 = vmatpush1.bf16.xpose.msk.msra.mxu0 %vm10635_vm14, %v7731_v15  ;;  %vm10711_vm5 = vmpackc.low %vm2169_vm10, %vm2165_vm7  ;;  %vm3061_vm14 = vcmp.eq.s32.totalorder %v7948_v29, %v10021_v51  ;;  %vm2180_vm7 = vcmp.eq.s32.totalorder %v7756_v4, %v9916_v25 }
 0x135   :  { %v10697_v60 = vadd.f32 %v1186_v58, %v1089_v55  ;;  %6882 = vmatpush1.bf16.xpose.msk.msra.mxu1 %vm10643_vm4, %v7731_v15  ;;  %v1091_v45 = vpop.f32.mrf.mxu0  ;;  %6594 = vmatprep.mubr.msk.bf16.mxu0 %vm10653_vm3, %v7731_v15  ;;  %vm3065_vm4 = vcmp.eq.s32.totalorder %v7951_v30, %v10021_v51  ;;  %vm2174_vm3 = vcmp.eq.s32.totalorder %v7753_v3, %v9902_v0  ;;  %vm10748_vm13 = vmpackc.low %vm3063_vm12, %vm3059_vm15  ;;  %v6665_v0 = vld [vmem:[%s14444_s0 + $0x4] ss:$8 sm:$0xf] }
 0x136   :  { %v1188_v63 = vpop.f32.mrf.mxu1  ;;  %6658 = vmatprep.mubr.msk.bf16.mxu1 %vm10661_vm11, %v7731_v15  ;;  %6820 = vmatprep.subr.msk.bf16.mxu0 %vm10679_vm9, %v7731_v15  ;;  %vm2176_vm11 = vcmp.eq.s32.totalorder %v7753_v3, %v9916_v25  ;;  %vm10762_vm10 = vmpackc.low %vm3065_vm4, %vm3061_vm14  ;;  %vm3058_vm15 = vcmp.eq.s32.totalorder %v7921_v27, %v9956_v46  ;;  %vm2173_vm14 = vcmp.eq.s32.totalorder %v7753_v3, %v9979_v22 }
 0x137   :  { %v1092_v50 = vpop.f32.mrf.mxu0  ;;  %6884 = vmatprep.subr.msk.bf16.mxu1 %vm10689_vm2, %v7731_v15  ;;  %vm10772_vm9 = vmpackc.low %vm2178_vm6, %vm2174_vm3  ;;  %vm3054_vm2 = vcmp.eq.s32.totalorder %v7747_v1, %v9956_v46  ;;  %vm2177_vm4 = vcmp.eq.s32.totalorder %v7756_v4, %v9979_v22  ;;  %v10792_v43 = vrot.slane %v6665_v0, %v7759_v5  ;;  %vm2175_vm3 = vcmp.eq.s32.totalorder %v7753_v3, %v9999_v48 }
 0x138   :  { %v1189_v14 = vpop.f32.mrf.mxu1  ;;  %vm10783_vm12 = vmpackc.low %vm2180_vm7, %vm2176_vm11  ;;  %vm2179_vm6 = vcmp.eq.s32.totalorder %v7756_v4, %v9999_v48  ;;  %vm3051_vm7 = vcmp.eq.s32.totalorder %v7747_v1, %v10010_v36  ;;  %v10814_v10 = vrot.slane %v6665_v0, %v7762_v6  ;;  %v10879_v59 = vrot.slane %v6665_v0, %v7765_v7 }
 0x139   :  { %v10770_v39 = vadd.f32 %v1189_v14, %v1092_v50  ;;  %v1094_v25 = vpop.f32.mrf.mxu0  ;;  %vm10807_vm11 = vmpackc.low %vm3056_vm8, %vm3052_vm0  ;;  %vm3055_vm0 = vcmp.eq.s32.totalorder %v7921_v27, %v10010_v36  ;;  %vm3057_vm8 = vcmp.eq.s32.totalorder %v7921_v27, %v10021_v51  ;;  %v10899_v61 = vrot.slane %v6665_v0, %v7768_v8 }
 0x13a   :  { %v1191_v47 = vpop.f32.mrf.mxu1  ;;  %v10936_v0 = vrot.slane %v6924_v42, %v7768_v8 }
 0x13b   :  { %v1097_v9 = vpop.f32.mrf.mxu0  ;;  %6596 = vmatmul.mubr.msk.bf16.gmra.mxu0 %vm10711_vm5, %v7731_v15  ;;  %vm10828_vm5 = vmpackc.low %vm3058_vm15, %vm3054_vm2  ;;  %vm2816_vm2 = vcmp.eq.s32.totalorder %v7921_v27, %v10792_v43 }
 0x13c   :  { %v1194_v35 = vpop.f32.mrf.mxu1  ;;  %6660 = vmatmul.mubr.msk.bf16.gmra.mxu1 %vm10728_vm1, %v7731_v15  ;;  %6822 = vmatpush1.bf16.xpose.msk.msra.mxu0 %vm10748_vm13, %v7731_v15  ;;  %vm3053_vm1 = vcmp.eq.s32.totalorder %v7747_v1, %v10021_v51  ;;  %vm10853_vm13 = vmpackc.low %vm2177_vm4, %vm2173_vm14  ;;  %vm2818_vm14 = vcmp.eq.s32.totalorder %v7921_v27, %v10814_v10 }
 0x13d   :  { %v10839_v54 = vadd.f32 %v1194_v35, %v1097_v9  ;;  %6886 = vmatpush1.bf16.xpose.msk.msra.mxu1 %vm10762_vm10, %v7731_v15  ;;  %v1099_v46 = vpop.f32.mrf.mxu0  ;;  %6598 = vmatprep.mubr.msk.bf16.mxu0 %vm10772_vm9, %v7731_v15  ;;  %vm10871_vm10 = vmpackc.low %vm2179_vm6, %vm2175_vm3  ;;  %vm2812_vm9 = vcmp.eq.s32.totalorder %v7747_v1, %v10792_v43  ;;  %vm3802_vm3 = vcmp.eq.s32.totalorder %v7753_v3, %v10837_v52 }
 0x13e   :  { %v1196_v58 = vpop.f32.mrf.mxu1  ;;  %6662 = vmatprep.mubr.msk.bf16.mxu1 %vm10783_vm12, %v7731_v15  ;;  %6824 = vmatprep.subr.msk.bf16.mxu0 %vm10807_vm11, %v7731_v15  ;;  %vm10894_vm15 = vmpackc.low %vm3055_vm0, %vm3051_vm7  ;;  %vm2814_vm12 = vcmp.eq.s32.totalorder %v7747_v1, %v10814_v10  ;;  %vm3806_vm6 = vcmp.eq.s32.totalorder %v7756_v4, %v10837_v52  ;;  %vm3804_vm7 = vcmp.eq.s32.totalorder %v7753_v3, %v10860_v57 }
 0x13f   :  { %v1100_v45 = vpop.f32.mrf.mxu0  ;;  %6888 = vmatprep.subr.msk.bf16.mxu1 %vm10828_vm5, %v7731_v15  ;;  %vm10911_vm4 = vmpackc.low %vm3057_vm8, %vm3053_vm1  ;;  %vm3808_vm5 = vcmp.eq.s32.totalorder %v7756_v4, %v10860_v57  ;;  %vm2811_vm1 = vcmp.eq.s32.totalorder %v7747_v1, %v10879_v59  ;;  %vm2815_vm8 = vcmp.eq.s32.totalorder %v7921_v27, %v10879_v59 }
 0x140   :  { %v1197_v63 = vpop.f32.mrf.mxu1  ;;  %vm10927_vm11 = vmpackc.low %vm2816_vm2, %vm2812_vm9  ;;  %vm2813_vm9 = vcmp.eq.s32.totalorder %v7747_v1, %v10899_v61  ;;  %vm2817_vm2 = vcmp.eq.s32.totalorder %v7921_v27, %v10899_v61 }
 0x141   :  { %v10922_v50 = vadd.f32 %v1197_v63, %v1100_v45  ;;  %v1102_v13 = vpop.f32.mrf.mxu0  ;;  %vm10938_vm0 = vmpackc.low %vm2818_vm14, %vm2814_vm12  ;;  %vm3801_vm14 = vcmp.eq.s32.totalorder %v7753_v3, %v10920_v37 }
 0x142   :  { %v1199_v14 = vpop.f32.mrf.mxu1  ;;  %vm10959_vm12 = vmpackc.low %vm3806_vm6, %vm3802_vm3  ;;  %vm3805_vm3 = vcmp.eq.s32.totalorder %v7756_v4, %v10920_v37 }
 0x143   :  { %v1105_v25 = vpop.f32.mrf.mxu0  ;;  %6600 = vmatmul.mubr.msk.bf16.gmra.mxu0 %vm10853_vm13, %v7731_v15  ;;  %vm10972_vm13 = vmpackc.low %vm3808_vm5, %vm3804_vm7  ;;  %vm2824_vm7 = vcmp.eq.s32.totalorder %v7951_v30, %v10792_v43 }
 0x144   :  { %v1202_v42 = vpop.f32.mrf.mxu1  ;;  %6664 = vmatmul.mubr.msk.bf16.gmra.mxu1 %vm10871_vm10, %v7731_v15  ;;  %6826 = vmatpush1.bf16.xpose.msk.msra.mxu0 %vm10894_vm15, %v7731_v15  ;;  %vm10994_vm10 = vmpackc.low %vm2815_vm8, %vm2811_vm1  ;;  %vm3803_vm15 = vcmp.eq.s32.totalorder %v7753_v3, %v10936_v0  ;;  %vm2826_vm1 = vcmp.eq.s32.totalorder %v7951_v30, %v10814_v10 }
 0x145   :  { %v10980_v62 = vadd.f32 %v1202_v42, %v1105_v25  ;;  %6890 = vmatpush1.bf16.xpose.msk.msra.mxu1 %vm10911_vm4, %v7731_v15  ;;  %v1107_v9 = vpop.f32.mrf.mxu0  ;;  %6828 = vmatprep.mubr.msk.bf16.mxu0 %vm10927_vm11, %v7731_v15  ;;  %vm3807_vm4 = vcmp.eq.s32.totalorder %v7756_v4, %v10936_v0  ;;  %vm11011_vm6 = vmpackc.low %vm2817_vm2, %vm2813_vm9  ;;  %vm2820_vm11 = vcmp.eq.s32.totalorder %v7948_v29, %v10792_v43 }
 0x146   :  { %v1204_v35 = vpop.f32.mrf.mxu1  ;;  %6892 = vmatprep.mubr.msk.bf16.mxu1 %vm10938_vm0, %v7731_v15  ;;  %7054 = vmatprep.subr.msk.bf16.mxu0 %vm10959_vm12, %v7731_v15  ;;  %vm11031_vm5 = vmpackc.low %vm3805_vm3, %vm3801_vm14  ;;  %vm2822_vm0 = vcmp.eq.s32.totalorder %v7948_v29, %v10814_v10  ;;  %vm3794_vm9 = vcmp.eq.s32.totalorder %v7777_v11, %v10837_v52  ;;  %vm3798_vm2 = vcmp.eq.s32.totalorder %v7780_v12, %v10837_v52 }
 0x147   :  { %v1108_v46 = vpop.f32.mrf.mxu0  ;;  %7118 = vmatprep.subr.msk.bf16.mxu1 %vm10972_vm13, %v7731_v15  ;;  %vm11039_vm8 = vmpackc.low %vm3807_vm4, %vm3803_vm15  ;;  %vm3796_vm13 = vcmp.eq.s32.totalorder %v7777_v11, %v10860_v57  ;;  %vm3800_vm14 = vcmp.eq.s32.totalorder %v7780_v12, %v10860_v57  ;;  %vm2819_vm15 = vcmp.eq.s32.totalorder %v7948_v29, %v10879_v59  ;;  %vm2823_vm4 = vcmp.eq.s32.totalorder %v7951_v30, %v10879_v59 }
 0x148   :  { %v1205_v58 = vpop.f32.mrf.mxu1  ;;  %vm11049_vm12 = vmpackc.low %vm2824_vm7, %vm2820_vm11  ;;  %vm2821_vm11 = vcmp.eq.s32.totalorder %v7948_v29, %v10899_v61  ;;  %vm2825_vm7 = vcmp.eq.s32.totalorder %v7951_v30, %v10899_v61 }
 0x149   :  { %v11047_v45 = vadd.f32 %v1205_v58, %v1108_v46  ;;  %v1110_v48 = vpop.f32.mrf.mxu0  ;;  %vm11057_vm3 = vmpackc.low %vm2826_vm1, %vm2822_vm0  ;;  %vm3793_vm1 = vcmp.eq.s32.totalorder %v7777_v11, %v10920_v37 }
 0x14a   :  { %v1207_v36 = vpop.f32.mrf.mxu1  ;;  %vm11075_vm0 = vmpackc.low %vm3798_vm2, %vm3794_vm9  ;;  %vm3797_vm9 = vcmp.eq.s32.totalorder %v7780_v12, %v10920_v37 }
 0x14b   :  { %v1243_v51 = vpop.f32.mrf.mxu0  ;;  %6830 = vmatmul.mubr.msk.bf16.vlgmr.msra.gmra.mxu0 %vm10994_vm10, %v7731_v15  ;;  %vm11089_vm10 = vmpackc.low %vm3800_vm14, %vm3796_vm13  ;;  %vm2832_vm13 = vcmp.eq.s32.totalorder %v7901_v24, %v10792_v43 }
 0x14c   :  { %v1244_v28 = vadd.f32 %v1243_v51, %v10132_v49  ;;  %v1340_v25 = vpop.f32.mrf.mxu1  ;;  %6894 = vmatmul.mubr.msk.bf16.vlgmr.msra.gmra.mxu1 %vm11011_vm6, %v7731_v15  ;;  %7056 = vmatpush1.bf16.xpose.msk.msra.mxu0 %vm11031_vm5, %v7731_v15  ;;  %vm11109_vm6 = vmpackc.low %vm2823_vm4, %vm2819_vm15  ;;  %vm3795_vm5 = vcmp.eq.s32.totalorder %v7777_v11, %v10936_v0  ;;  %vm2834_vm15 = vcmp.eq.s32.totalorder %v7901_v24, %v10814_v10 }
 0x14d   :  { %7120 = vmatpush1.bf16.xpose.msk.msra.mxu1 %vm11039_vm8, %v7731_v15  ;;  %v1245_v49 = vpop.f32.mrf.mxu0  ;;  %6832 = vmatprep.mubr.msk.bf16.mxu0 %vm11049_vm12, %v7731_v15  ;;  %vm3799_vm8 = vcmp.eq.s32.totalorder %v7780_v12, %v10936_v0  ;;  %vm11128_vm2 = vmpackc.low %vm2825_vm7, %vm2821_vm11  ;;  %vm2828_vm12 = vcmp.eq.s32.totalorder %v7898_v23, %v10792_v43  ;;  %vm3786_vm11 = vcmp.eq.s32.totalorder %v7815_v16, %v10837_v52 }
 0x14e   :  { %v11117_v47 = vadd.f32 %v1340_v25, %v1244_v28  ;;  %v1342_v9 = vpop.f32.mrf.mxu1  ;;  %6896 = vmatprep.mubr.msk.bf16.mxu1 %vm11057_vm3, %v7731_v15  ;;  %7058 = vmatprep.subr.msk.bf16.mxu0 %vm11075_vm0, %v7731_v15  ;;  %vm11148_vm14 = vmpackc.low %vm3797_vm9, %vm3793_vm1  ;;  %vm2830_vm3 = vcmp.eq.s32.totalorder %v7898_v23, %v10814_v10  ;;  %vm3790_vm7 = vcmp.eq.s32.totalorder %v7818_v17, %v10837_v52 }
 0x14f   :  { %v1246_v35 = vpop.f32.mrf.mxu0  ;;  %7122 = vmatprep.subr.msk.bf16.mxu1 %vm11089_vm10, %v7731_v15  ;;  %vm11163_vm4 = vmpackc.low %vm3799_vm8, %vm3795_vm5  ;;  %vm3788_vm10 = vcmp.eq.s32.totalorder %v7815_v16, %v10860_v57  ;;  %vm3792_vm1 = vcmp.eq.s32.totalorder %v7818_v17, %v10860_v57  ;;  %vm2827_vm5 = vcmp.eq.s32.totalorder %v7898_v23, %v10879_v59  ;;  %vm2831_vm8 = vcmp.eq.s32.totalorder %v7901_v24, %v10879_v59 }
 0x150   :  { %v1247_v46 = vadd.f32 %v1246_v35, %v10199_v38  ;;  %v1343_v55 = vpop.f32.mrf.mxu1  ;;  %vm11171_vm0 = vmpackc.low %vm2832_vm13, %vm2828_vm12  ;;  %vm2829_vm12 = vcmp.eq.s32.totalorder %v7898_v23, %v10899_v61  ;;  %vm2833_vm13 = vcmp.eq.s32.totalorder %v7901_v24, %v10899_v61 }
 0x151   :  { %v1248_v22 = vpop.f32.mrf.mxu0  ;;  %vm11181_vm9 = vmpackc.low %vm2834_vm15, %vm2830_vm3  ;;  %vm3785_vm15 = vcmp.eq.s32.totalorder %v7815_v16, %v10920_v37 }
 0x152   :  { %v11179_v48 = vadd.f32 %v1343_v55, %v1247_v46  ;;  %v1345_v63 = vpop.f32.mrf.mxu1  ;;  %vm11199_vm3 = vmpackc.low %vm3790_vm7, %vm3786_vm11  ;;  %vm3787_vm11 = vcmp.eq.s32.totalorder %v7815_v16, %v10936_v0 }
 0x153   :  { %v1251_v13 = vpop.f32.mrf.mxu0  ;;  %6834 = vmatmul.mubr.msk.bf16.gmra.mxu0 %vm11109_vm6, %v7731_v15  ;;  %vm11216_vm6 = vmpackc.low %vm3792_vm1, %vm3788_vm10  ;;  %vm2840_vm10 = vcmp.eq.s32.totalorder %v7870_v21, %v10792_v43 }
 0x154   :  { %v1252_v14 = vadd.f32 %v1251_v13, %v10245_v26  ;;  %v1348_v28 = vpop.f32.mrf.mxu1  ;;  %6898 = vmatmul.mubr.msk.bf16.gmra.mxu1 %vm11128_vm2, %v7731_v15  ;;  %7060 = vmatpush1.bf16.xpose.msk.msra.mxu0 %vm11148_vm14, %v7731_v15  ;;  %vm3789_vm2 = vcmp.eq.s32.totalorder %v7818_v17, %v10920_v37  ;;  %vm11236_vm14 = vmpackc.low %vm2831_vm8, %vm2827_vm5  ;;  %vm2842_vm5 = vcmp.eq.s32.totalorder %v7870_v21, %v10814_v10 }
 0x155   :  { %7124 = vmatpush1.bf16.xpose.msk.msra.mxu1 %vm11163_vm4, %v7731_v15  ;;  %v1253_v26 = vpop.f32.mrf.mxu0  ;;  %6836 = vmatprep.mubr.msk.bf16.mxu0 %vm11171_vm0, %v7731_v15  ;;  %vm3791_vm4 = vcmp.eq.s32.totalorder %v7818_v17, %v10936_v0  ;;  %vm11255_vm7 = vmpackc.low %vm2833_vm13, %vm2829_vm12  ;;  %vm2836_vm0 = vcmp.eq.s32.totalorder %v7867_v20, %v10792_v43  ;;  %vm3778_vm12 = vcmp.eq.s32.totalorder %v7841_v18, %v10837_v52 }
 0x156   :  { %v11244_v49 = vadd.f32 %v1348_v28, %v1252_v14  ;;  %v1350_v42 = vpop.f32.mrf.mxu1  ;;  %6900 = vmatprep.mubr.msk.bf16.mxu1 %vm11181_vm9, %v7731_v15  ;;  %7062 = vmatprep.subr.msk.bf16.mxu0 %vm11199_vm3, %v7731_v15  ;;  %vm11275_vm1 = vmpackc.low %vm3789_vm2, %vm3785_vm15  ;;  %vm2838_vm9 = vcmp.eq.s32.totalorder %v7867_v20, %v10814_v10  ;;  %vm3782_vm13 = vcmp.eq.s32.totalorder %v7844_v19, %v10837_v52 }
 0x157   :  { %v1254_v33 = vpop.f32.mrf.mxu0  ;;  %7126 = vmatprep.subr.msk.bf16.mxu1 %vm11216_vm6, %v7731_v15  ;;  %vm11290_vm8 = vmpackc.low %vm3791_vm4, %vm3787_vm11  ;;  %vm3780_vm6 = vcmp.eq.s32.totalorder %v7841_v18, %v10860_v57  ;;  %vm3784_vm15 = vcmp.eq.s32.totalorder %v7844_v19, %v10860_v57  ;;  %vm2835_vm11 = vcmp.eq.s32.totalorder %v7867_v20, %v10879_v59  ;;  %vm2839_vm4 = vcmp.eq.s32.totalorder %v7870_v21, %v10879_v59 }
 0x158   :  { %v1255_v44 = vadd.f32 %v1254_v33, %v10312_v56  ;;  %v1351_v46 = vpop.f32.mrf.mxu1  ;;  %vm11298_vm3 = vmpackc.low %vm2840_vm10, %vm2836_vm0  ;;  %vm2837_vm0 = vcmp.eq.s32.totalorder %v7867_v20, %v10899_v61  ;;  %vm2841_vm10 = vcmp.eq.s32.totalorder %v7870_v21, %v10899_v61 }
 0x159   :  { %v1256_v58 = vpop.f32.mrf.mxu0  ;;  %vm11308_vm2 = vmpackc.low %vm2842_vm5, %vm2838_vm9  ;;  %vm3777_vm5 = vcmp.eq.s32.totalorder %v7841_v18, %v10920_v37 }
 0x15a   :  { %v11306_v22 = vadd.f32 %v1351_v46, %v1255_v44  ;;  %v1353_v38 = vpop.f32.mrf.mxu1  ;;  %vm11326_vm9 = vmpackc.low %vm3782_vm13, %vm3778_vm12  ;;  %vm3779_vm12 = vcmp.eq.s32.totalorder %v7841_v18, %v10936_v0 }
 0x15b   :  { %v1259_v36 = vpop.f32.mrf.mxu0  ;;  %6838 = vmatmul.mubr.msk.bf16.gmra.mxu0 %vm11236_vm14, %v7731_v15  ;;  %vm11343_vm14 = vmpackc.low %vm3784_vm15, %vm3780_vm6  ;;  %vm2848_vm6 = vcmp.eq.s32.totalorder %v7844_v19, %v10792_v43 }
 0x15c   :  { %v1260_v51 = vadd.f32 %v1259_v36, %v10358_v2  ;;  %v1356_v14 = vpop.f32.mrf.mxu1  ;;  %6902 = vmatmul.mubr.msk.bf16.gmra.mxu1 %vm11255_vm7, %v7731_v15  ;;  %7064 = vmatpush1.bf16.xpose.msk.msra.mxu0 %vm11275_vm1, %v7731_v15  ;;  %vm3781_vm7 = vcmp.eq.s32.totalorder %v7844_v19, %v10920_v37  ;;  %vm11363_vm1 = vmpackc.low %vm2839_vm4, %vm2835_vm11  ;;  %vm2850_vm11 = vcmp.eq.s32.totalorder %v7844_v19, %v10814_v10 }
 0x15d   :  { %7128 = vmatpush1.bf16.xpose.msk.msra.mxu1 %vm11290_vm8, %v7731_v15  ;;  %v1261_v2 = vpop.f32.mrf.mxu0  ;;  %6840 = vmatprep.mubr.msk.bf16.mxu0 %vm11298_vm3, %v7731_v15  ;;  %vm3783_vm8 = vcmp.eq.s32.totalorder %v7844_v19, %v10936_v0  ;;  %vm11382_vm13 = vmpackc.low %vm2841_vm10, %vm2837_vm0  ;;  %vm2844_vm3 = vcmp.eq.s32.totalorder %v7841_v18, %v10792_v43  ;;  %vm3770_vm0 = vcmp.eq.s32.totalorder %v7867_v20, %v10837_v52 }
 0x15e   :  { %v11371_v26 = vadd.f32 %v1356_v14, %v1260_v51  ;;  %v1358_v40 = vpop.f32.mrf.mxu1  ;;  %6904 = vmatprep.mubr.msk.bf16.mxu1 %vm11308_vm2, %v7731_v15  ;;  %7066 = vmatprep.subr.msk.bf16.mxu0 %vm11326_vm9, %v7731_v15  ;;  %vm11402_vm15 = vmpackc.low %vm3781_vm7, %vm3777_vm5  ;;  %vm2846_vm2 = vcmp.eq.s32.totalorder %v7841_v18, %v10814_v10  ;;  %vm3774_vm10 = vcmp.eq.s32.totalorder %v7870_v21, %v10837_v52 }
 0x15f   :  { %v1262_v9 = vpop.f32.mrf.mxu0  ;;  %7130 = vmatprep.subr.msk.bf16.mxu1 %vm11343_vm14, %v7731_v15  ;;  %vm11417_vm4 = vmpackc.low %vm3783_vm8, %vm3779_vm12  ;;  %vm3772_vm14 = vcmp.eq.s32.totalorder %v7867_v20, %v10860_v57  ;;  %vm3776_vm5 = vcmp.eq.s32.totalorder %v7870_v21, %v10860_v57  ;;  %vm2843_vm12 = vcmp.eq.s32.totalorder %v7841_v18, %v10879_v59  ;;  %vm2847_vm8 = vcmp.eq.s32.totalorder %v7844_v19, %v10879_v59 }
 0x160   :  { %v1263_v35 = vadd.f32 %v1262_v9, %v10425_v41  ;;  %v1359_v44 = vpop.f32.mrf.mxu1  ;;  %vm11425_vm9 = vmpackc.low %vm2848_vm6, %vm2844_vm3  ;;  %vm2845_vm3 = vcmp.eq.s32.totalorder %v7841_v18, %v10899_v61  ;;  %vm2849_vm6 = vcmp.eq.s32.totalorder %v7844_v19, %v10899_v61 }
 0x161   :  { %v1264_v55 = vpop.f32.mrf.mxu0  ;;  %vm11435_vm7 = vmpackc.low %vm2850_vm11, %vm2846_vm2  ;;  %vm3769_vm11 = vcmp.eq.s32.totalorder %v7867_v20, %v10920_v37 }
 0x162   :  { %v11433_v58 = vadd.f32 %v1359_v44, %v1263_v35  ;;  %v1361_v56 = vpop.f32.mrf.mxu1  ;;  %vm11453_vm2 = vmpackc.low %vm3774_vm10, %vm3770_vm0  ;;  %vm3771_vm0 = vcmp.eq.s32.totalorder %v7867_v20, %v10936_v0 }
 0x163   :  { %v1267_v63 = vpop.f32.mrf.mxu0  ;;  %6842 = vmatmul.mubr.msk.bf16.gmra.mxu0 %vm11363_vm1, %v7731_v15  ;;  %vm11470_vm1 = vmpackc.low %vm3776_vm5, %vm3772_vm14  ;;  %vm2856_vm14 = vcmp.eq.s32.totalorder %v7818_v17, %v10792_v43 }
 0x164   :  { %v1268_v13 = vadd.f32 %v1267_v63, %v10471_v34  ;;  %v1364_v51 = vpop.f32.mrf.mxu1  ;;  %6906 = vmatmul.mubr.msk.bf16.gmra.mxu1 %vm11382_vm13, %v7731_v15  ;;  %7068 = vmatpush1.bf16.xpose.msk.msra.mxu0 %vm11402_vm15, %v7731_v15  ;;  %vm3773_vm13 = vcmp.eq.s32.totalorder %v7870_v21, %v10920_v37  ;;  %vm11490_vm15 = vmpackc.low %vm2847_vm8, %vm2843_vm12  ;;  %vm2858_vm12 = vcmp.eq.s32.totalorder %v7818_v17, %v10814_v10 }
 0x165   :  { %7132 = vmatpush1.bf16.xpose.msk.msra.mxu1 %vm11417_vm4, %v7731_v15  ;;  %v1269_v34 = vpop.f32.mrf.mxu0  ;;  %6844 = vmatprep.mubr.msk.bf16.mxu0 %vm11425_vm9, %v7731_v15  ;;  %vm3775_vm4 = vcmp.eq.s32.totalorder %v7870_v21, %v10936_v0  ;;  %vm11509_vm10 = vmpackc.low %vm2849_vm6, %vm2845_vm3  ;;  %vm2852_vm9 = vcmp.eq.s32.totalorder %v7815_v16, %v10792_v43  ;;  %vm3762_vm3 = vcmp.eq.s32.totalorder %v7898_v23, %v10837_v52 }
 0x166   :  { %v11498_v2 = vadd.f32 %v1364_v51, %v1268_v13  ;;  %v1366_v25 = vpop.f32.mrf.mxu1  ;;  %6908 = vmatprep.mubr.msk.bf16.mxu1 %vm11435_vm7, %v7731_v15  ;;  %7070 = vmatprep.subr.msk.bf16.mxu0 %vm11453_vm2, %v7731_v15  ;;  %vm11529_vm5 = vmpackc.low %vm3773_vm13, %vm3769_vm11  ;;  %vm2854_vm7 = vcmp.eq.s32.totalorder %v7815_v16, %v10814_v10  ;;  %vm3766_vm6 = vcmp.eq.s32.totalorder %v7901_v24, %v10837_v52 }
 0x167   :  { %v1270_v42 = vpop.f32.mrf.mxu0  ;;  %7134 = vmatprep.subr.msk.bf16.mxu1 %vm11470_vm1, %v7731_v15  ;;  %vm11544_vm8 = vmpackc.low %vm3775_vm4, %vm3771_vm0  ;;  %vm3764_vm1 = vcmp.eq.s32.totalorder %v7898_v23, %v10860_v57  ;;  %vm3768_vm11 = vcmp.eq.s32.totalorder %v7901_v24, %v10860_v57  ;;  %vm2851_vm0 = vcmp.eq.s32.totalorder %v7815_v16, %v10879_v59  ;;  %vm2855_vm4 = vcmp.eq.s32.totalorder %v7818_v17, %v10879_v59 }
 0x168   :  { %v1271_v33 = vadd.f32 %v1270_v42, %v10538_v32  ;;  %v1367_v35 = vpop.f32.mrf.mxu1  ;;  %vm11552_vm2 = vmpackc.low %vm2856_vm14, %vm2852_vm9  ;;  %vm2853_vm9 = vcmp.eq.s32.totalorder %v7815_v16, %v10899_v61  ;;  %vm2857_vm14 = vcmp.eq.s32.totalorder %v7818_v17, %v10899_v61 }
 0x169   :  { %v1272_v46 = vpop.f32.mrf.mxu0  ;;  %vm11562_vm13 = vmpackc.low %vm2858_vm12, %vm2854_vm7  ;;  %vm3761_vm12 = vcmp.eq.s32.totalorder %v7898_v23, %v10920_v37 }
 0x16a   :  { %v11560_v55 = vadd.f32 %v1367_v35, %v1271_v33  ;;  %v1369_v41 = vpop.f32.mrf.mxu1  ;;  %vm11580_vm7 = vmpackc.low %vm3766_vm6, %vm3762_vm3  ;;  %vm3763_vm3 = vcmp.eq.s32.totalorder %v7898_v23, %v10936_v0 }
 0x16b   :  { %v1275_v38 = vpop.f32.mrf.mxu0  ;;  %6846 = vmatmul.mubr.msk.bf16.gmra.mxu0 %vm11490_vm15, %v7731_v15  ;;  %vm11597_vm15 = vmpackc.low %vm3768_vm11, %vm3764_vm1  ;;  %vm2864_vm1 = vcmp.eq.s32.totalorder %v7780_v12, %v10792_v43 }
 0x16c   :  { %v1276_v36 = vadd.f32 %v1275_v38, %v10584_v31  ;;  %v1372_v13 = vpop.f32.mrf.mxu1  ;;  %6910 = vmatmul.mubr.msk.bf16.gmra.mxu1 %vm11509_vm10, %v7731_v15  ;;  %7072 = vmatpush1.bf16.xpose.msk.msra.mxu0 %vm11529_vm5, %v7731_v15  ;;  %vm3765_vm10 = vcmp.eq.s32.totalorder %v7901_v24, %v10920_v37  ;;  %vm11617_vm5 = vmpackc.low %vm2855_vm4, %vm2851_vm0  ;;  %vm2866_vm0 = vcmp.eq.s32.totalorder %v7780_v12, %v10814_v10 }
 0x16d   :  { %7136 = vmatpush1.bf16.xpose.msk.msra.mxu1 %vm11544_vm8, %v7731_v15  ;;  %v1277_v31 = vpop.f32.mrf.mxu0  ;;  %6848 = vmatprep.mubr.msk.bf16.mxu0 %vm11552_vm2, %v7731_v15  ;;  %vm3767_vm8 = vcmp.eq.s32.totalorder %v7901_v24, %v10936_v0  ;;  %vm11636_vm6 = vmpackc.low %vm2857_vm14, %vm2853_vm9  ;;  %vm2860_vm2 = vcmp.eq.s32.totalorder %v7777_v11, %v10792_v43  ;;  %vm3754_vm9 = vcmp.eq.s32.totalorder %v7948_v29, %v10837_v52 }
 0x16e   :  { %v11625_v34 = vadd.f32 %v1372_v13, %v1276_v36  ;;  %v1374_v28 = vpop.f32.mrf.mxu1  ;;  %6912 = vmatprep.mubr.msk.bf16.mxu1 %vm11562_vm13, %v7731_v15  ;;  %7074 = vmatprep.subr.msk.bf16.mxu0 %vm11580_vm7, %v7731_v15  ;;  %vm11656_vm11 = vmpackc.low %vm3765_vm10, %vm3761_vm12  ;;  %vm2862_vm13 = vcmp.eq.s32.totalorder %v7777_v11, %v10814_v10  ;;  %vm3758_vm14 = vcmp.eq.s32.totalorder %v7951_v30, %v10837_v52 }
 0x16f   :  { %v1278_v40 = vpop.f32.mrf.mxu0  ;;  %7138 = vmatprep.subr.msk.bf16.mxu1 %vm11597_vm15, %v7731_v15  ;;  %vm11671_vm4 = vmpackc.low %vm3767_vm8, %vm3763_vm3  ;;  %vm3756_vm15 = vcmp.eq.s32.totalorder %v7948_v29, %v10860_v57  ;;  %vm3760_vm12 = vcmp.eq.s32.totalorder %v7951_v30, %v10860_v57  ;;  %vm2859_vm3 = vcmp.eq.s32.totalorder %v7777_v11, %v10879_v59  ;;  %vm2863_vm8 = vcmp.eq.s32.totalorder %v7780_v12, %v10879_v59 }
 0x170   :  { %v1279_v9 = vadd.f32 %v1278_v40, %v10651_v53  ;;  %v1375_v33 = vpop.f32.mrf.mxu1  ;;  %vm11679_vm7 = vmpackc.low %vm2864_vm1, %vm2860_vm2  ;;  %vm2861_vm2 = vcmp.eq.s32.totalorder %v7777_v11, %v10899_v61  ;;  %vm2865_vm1 = vcmp.eq.s32.totalorder %v7780_v12, %v10899_v61 }
 0x171   :  { %v1280_v44 = vpop.f32.mrf.mxu0  ;;  %vm11689_vm10 = vmpackc.low %vm2866_vm0, %vm2862_vm13  ;;  %vm3753_vm0 = vcmp.eq.s32.totalorder %v7948_v29, %v10920_v37 }
 0x172   :  { %v11687_v46 = vadd.f32 %v1375_v33, %v1279_v9  ;;  %v1377_v32 = vpop.f32.mrf.mxu1  ;;  %vm11707_vm13 = vmpackc.low %vm3758_vm14, %vm3754_vm9  ;;  %vm3755_vm9 = vcmp.eq.s32.totalorder %v7948_v29, %v10936_v0  ;;  %v7182_v44 = vld [vmem:[%s14443_s1 + $0x6] ss:$8 sm:$0xf] }
 0x173   :  { %v1283_v56 = vpop.f32.mrf.mxu0  ;;  %6850 = vmatmul.mubr.msk.bf16.gmra.mxu0 %vm11617_vm5, %v7731_v15  ;;  %vm11724_vm5 = vmpackc.low %vm3760_vm12, %vm3756_vm15  ;;  %vm2872_vm15 = vcmp.eq.s32.totalorder %v7756_v4, %v10792_v43 }
 0x174   :  { %v1284_v63 = vadd.f32 %v1283_v56, %v10697_v60  ;;  %v1380_v36 = vpop.f32.mrf.mxu1  ;;  %6914 = vmatmul.mubr.msk.bf16.gmra.mxu1 %vm11636_vm6, %v7731_v15  ;;  %7076 = vmatpush1.bf16.xpose.msk.msra.mxu0 %vm11656_vm11, %v7731_v15  ;;  %vm3757_vm6 = vcmp.eq.s32.totalorder %v7951_v30, %v10920_v37  ;;  %vm11744_vm11 = vmpackc.low %vm2863_vm8, %vm2859_vm3  ;;  %vm2874_vm3 = vcmp.eq.s32.totalorder %v7756_v4, %v10814_v10 }
 0x175   :  { %7140 = vmatpush1.bf16.xpose.msk.msra.mxu1 %vm11671_vm4, %v7731_v15  ;;  %v1285_v60 = vpop.f32.mrf.mxu0  ;;  %6852 = vmatprep.mubr.msk.bf16.mxu0 %vm11679_vm7, %v7731_v15  ;;  %vm3759_vm4 = vcmp.eq.s32.totalorder %v7951_v30, %v10936_v0  ;;  %vm11763_vm14 = vmpackc.low %vm2865_vm1, %vm2861_vm2  ;;  %vm2868_vm7 = vcmp.eq.s32.totalorder %v7753_v3, %v10792_v43  ;;  %v6923_v43 = vld [vmem:[%s14444_s0 + $0x5] ss:$8 sm:$0xf]  ;;  %vm3746_vm2 = vcmp.eq.s32.totalorder %v7747_v1, %v10837_v52 }
 0x176   :  { %v11752_v31 = vadd.f32 %v1380_v36, %v1284_v63  ;;  %v1382_v14 = vpop.f32.mrf.mxu1  ;;  %6916 = vmatprep.mubr.msk.bf16.mxu1 %vm11689_vm10, %v7731_v15  ;;  %7078 = vmatprep.subr.msk.bf16.mxu0 %vm11707_vm13, %v7731_v15  ;;  %vm11783_vm12 = vmpackc.low %vm3757_vm6, %vm3753_vm0  ;;  %vm2870_vm10 = vcmp.eq.s32.totalorder %v7753_v3, %v10814_v10  ;;  %vm3750_vm1 = vcmp.eq.s32.totalorder %v7921_v27, %v10837_v52 }
 0x177   :  { %v1286_v25 = vpop.f32.mrf.mxu0  ;;  %7142 = vmatprep.subr.msk.bf16.mxu1 %vm11724_vm5, %v7731_v15  ;;  %vm11801_vm8 = vmpackc.low %vm3759_vm4, %vm3755_vm9  ;;  %vm2867_vm5 = vcmp.eq.s32.totalorder %v7753_v3, %v10879_v59  ;;  %vm3748_vm0 = vcmp.eq.s32.totalorder %v7747_v1, %v10860_v57  ;;  %vm3752_vm6 = vcmp.eq.s32.totalorder %v7921_v27, %v10860_v57  ;;  %vm2871_vm4 = vcmp.eq.s32.totalorder %v7756_v4, %v10879_v59 }
 0x178   :  { %v1287_v42 = vadd.f32 %v1286_v25, %v10770_v39  ;;  %v1383_v9 = vpop.f32.mrf.mxu1  ;;  %vm11809_vm13 = vmpackc.low %vm2872_vm15, %vm2868_vm7  ;;  %v11839_v56 = vrot.slane %v6923_v43, %v7759_v5  ;;  %vm2873_vm15 = vcmp.eq.s32.totalorder %v7756_v4, %v10899_v61  ;;  %vm3749_vm7 = vcmp.eq.s32.totalorder %v7921_v27, %v10920_v37 }
 0x179   :  { %v1288_v35 = vpop.f32.mrf.mxu0  ;;  %vm11830_vm9 = vmpackc.low %vm2874_vm3, %vm2870_vm10  ;;  %vm3745_vm3 = vcmp.eq.s32.totalorder %v7747_v1, %v10920_v37  ;;  %v11861_v63 = vrot.slane %v6923_v43, %v7762_v6  ;;  %v11904_v51 = vrot.slane %v6923_v43, %v7765_v7  ;;  %v11907_v14 = vrot.slane %v7182_v44, %v7762_v6 }
 0x17a   :  { %v11822_v53 = vadd.f32 %v1383_v9, %v1287_v42  ;;  %v1385_v32 = vpop.f32.mrf.mxu1  ;;  %vm11852_vm10 = vmpackc.low %vm3750_vm1, %vm3746_vm2  ;;  %vm3747_vm2 = vcmp.eq.s32.totalorder %v7747_v1, %v10936_v0  ;;  %v11945_v42 = vrot.slane %v6923_v43, %v7768_v8  ;;  %v11967_v43 = vrot.slane %v7182_v44, %v7765_v7 }
 0x17b   :  { %v1291_v38 = vpop.f32.mrf.mxu0  ;;  %6854 = vmatmul.mubr.msk.bf16.gmra.mxu0 %vm11744_vm11, %v7731_v15  ;;  %vm11876_vm11 = vmpackc.low %vm3752_vm6, %vm3748_vm0  ;;  %vm3508_vm6 = vcmp.eq.s32.totalorder %v7747_v1, %v11861_v63 }
 0x17c   :  { %v1292_v36 = vadd.f32 %v1291_v38, %v10839_v54  ;;  %v1388_v13 = vpop.f32.mrf.mxu1  ;;  %6918 = vmatmul.mubr.msk.bf16.gmra.mxu1 %vm11763_vm14, %v7731_v15  ;;  %7080 = vmatpush1.bf16.xpose.msk.msra.mxu0 %vm11783_vm12, %v7731_v15  ;;  %v11883_v54 = vrot.slane %v7182_v44, %v7759_v5  ;;  %vm11897_vm14 = vmpackc.low %vm2871_vm4, %vm2867_vm5  ;;  %vm3751_vm12 = vcmp.eq.s32.totalorder %v7921_v27, %v10936_v0 }
 0x17d   :  { %7144 = vmatpush1.bf16.xpose.msk.msra.mxu1 %vm11801_vm8, %v7731_v15  ;;  %v1293_v60 = vpop.f32.mrf.mxu0  ;;  %6856 = vmatprep.mubr.msk.bf16.mxu0 %vm11809_vm13, %v7731_v15  ;;  %vm15011_vm8 = vcmp.eq.s32.totalorder %v7753_v3, %v10899_v61  ;;  %vm3506_vm13 = vcmp.eq.s32.totalorder %v7747_v1, %v11839_v56  ;;  %vm3510_vm5 = vcmp.eq.s32.totalorder %v7921_v27, %v11839_v56  ;;  %vm11940_vm0 = vmpackc.low %vm3749_vm7, %vm3745_vm3 }
 0x17e   :  { %v11909_v28 = vadd.f32 %v1388_v13, %v1292_v36  ;;  %v1390_v25 = vpop.f32.mrf.mxu1  ;;  %6920 = vmatprep.mubr.msk.bf16.mxu1 %vm11830_vm9, %v7731_v15  ;;  %vm11920_vm1 = vmpackc.low %vm2873_vm15, %vm15011_vm8  ;;  %7082 = vmatprep.subr.msk.bf16.mxu0 %vm11852_vm10, %v7731_v15  ;;  %vm3512_vm9 = vcmp.eq.s32.totalorder %v7921_v27, %v11861_v63  ;;  %vm4496_vm7 = vcmp.eq.s32.totalorder %v7753_v3, %v11883_v54 }
 0x17f   :  { %v1294_v40 = vpop.f32.mrf.mxu0  ;;  %7146 = vmatprep.subr.msk.bf16.mxu1 %vm11876_vm11, %v7731_v15  ;;  %vm11958_vm4 = vmpackc.low %vm3751_vm12, %vm3747_vm2  ;;  %vm4500_vm15 = vcmp.eq.s32.totalorder %v7756_v4, %v11883_v54  ;;  %vm4498_vm3 = vcmp.eq.s32.totalorder %v7753_v3, %v11907_v14  ;;  %vm4502_vm11 = vcmp.eq.s32.totalorder %v7756_v4, %v11907_v14  ;;  %v11981_v0 = vrot.slane %v7182_v44, %v7768_v8 }
 0x180   :  { %v1295_v9 = vadd.f32 %v1294_v40, %v10922_v50  ;;  %v1391_v33 = vpop.f32.mrf.mxu1  ;;  %vm11972_vm10 = vmpackc.low %vm3510_vm5, %vm3506_vm13  ;;  %vm3505_vm12 = vcmp.eq.s32.totalorder %v7747_v1, %v11904_v51  ;;  %vm3509_vm8 = vcmp.eq.s32.totalorder %v7921_v27, %v11904_v51  ;;  %vm3507_vm13 = vcmp.eq.s32.totalorder %v7747_v1, %v11945_v42 }
 0x181   :  { %v1296_v50 = vpop.f32.mrf.mxu0  ;;  %vm11988_vm2 = vmpackc.low %vm3512_vm9, %vm3508_vm6  ;;  %vm3511_vm5 = vcmp.eq.s32.totalorder %v7921_v27, %v11945_v42  ;;  %vm4495_vm9 = vcmp.eq.s32.totalorder %v7753_v3, %v11967_v43 }
 0x182   :  { %v11983_v39 = vadd.f32 %v1391_v33, %v1295_v9  ;;  %v1393_v32 = vpop.f32.mrf.mxu1  ;;  %vm12009_vm6 = vmpackc.low %vm4500_vm15, %vm4496_vm7  ;;  %vm4497_vm7 = vcmp.eq.s32.totalorder %v7753_v3, %v11981_v0 }
 0x183   :  { %v1299_v38 = vpop.f32.mrf.mxu0  ;;  %6858 = vmatmul.mubr.msk.bf16.gmra.mxu0 %vm11897_vm14, %v7731_v15  ;;  %vm12026_vm14 = vmpackc.low %vm4502_vm11, %vm4498_vm3  ;;  %vm3518_vm3 = vcmp.eq.s32.totalorder %v7951_v30, %v11839_v56 }
 0x184   :  { %v1300_v10 = vadd.f32 %v1299_v38, %v10980_v62  ;;  %v1396_v36 = vpop.f32.mrf.mxu1  ;;  %6922 = vmatmul.mubr.msk.bf16.gmra.mxu1 %vm11920_vm1, %v7731_v15  ;;  %7084 = vmatpush1.bf16.xpose.msk.msra.mxu0 %vm11940_vm0, %v7731_v15  ;;  %vm4499_vm1 = vcmp.eq.s32.totalorder %v7756_v4, %v11967_v43  ;;  %vm12046_vm0 = vmpackc.low %vm3509_vm8, %vm3505_vm12  ;;  %vm3520_vm12 = vcmp.eq.s32.totalorder %v7951_v30, %v11861_v63 }
 0x185   :  { %7148 = vmatpush1.bf16.xpose.msk.msra.mxu1 %vm11958_vm4, %v7731_v15  ;;  %v1301_v62 = vpop.f32.mrf.mxu0  ;;  %7086 = vmatprep.mubr.msk.bf16.mxu0 %vm11972_vm10, %v7731_v15  ;;  %vm4501_vm4 = vcmp.eq.s32.totalorder %v7756_v4, %v11981_v0  ;;  %vm12065_vm15 = vmpackc.low %vm3511_vm5, %vm3507_vm13  ;;  %vm3514_vm10 = vcmp.eq.s32.totalorder %v7948_v29, %v11839_v56  ;;  %vm4488_vm13 = vcmp.eq.s32.totalorder %v7777_v11, %v11883_v54 }
 0x186   :  { %v12054_v60 = vadd.f32 %v1396_v36, %v1300_v10  ;;  %v1398_v57 = vpop.f32.mrf.mxu1  ;;  %7150 = vmatprep.mubr.msk.bf16.mxu1 %vm11988_vm2, %v7731_v15  ;;  %7312 = vmatprep.subr.msk.bf16.mxu0 %vm12009_vm6, %v7731_v15  ;;  %vm12085_vm11 = vmpackc.low %vm4499_vm1, %vm4495_vm9  ;;  %vm3516_vm2 = vcmp.eq.s32.totalorder %v7948_v29, %v11861_v63  ;;  %vm4492_vm5 = vcmp.eq.s32.totalorder %v7780_v12, %v11883_v54 }
 0x187   :  { %v1302_v59 = vpop.f32.mrf.mxu0  ;;  %7376 = vmatprep.subr.msk.bf16.mxu1 %vm12026_vm14, %v7731_v15  ;;  %vm12100_vm8 = vmpackc.low %vm4501_vm4, %vm4497_vm7  ;;  %vm4490_vm14 = vcmp.eq.s32.totalorder %v7777_v11, %v11907_v14  ;;  %vm4494_vm9 = vcmp.eq.s32.totalorder %v7780_v12, %v11907_v14  ;;  %vm3513_vm7 = vcmp.eq.s32.totalorder %v7948_v29, %v11904_v51  ;;  %vm3517_vm4 = vcmp.eq.s32.totalorder %v7951_v30, %v11904_v51 }
 0x188   :  { %v1303_v61 = vadd.f32 %v1302_v59, %v11047_v45  ;;  %v1399_v9 = vpop.f32.mrf.mxu1  ;;  %vm12108_vm6 = vmpackc.low %vm3518_vm3, %vm3514_vm10  ;;  %vm3515_vm10 = vcmp.eq.s32.totalorder %v7948_v29, %v11945_v42  ;;  %vm3519_vm3 = vcmp.eq.s32.totalorder %v7951_v30, %v11945_v42 }
 0x189   :  { %v1304_v37 = vpop.f32.mrf.mxu0  ;;  %vm12118_vm1 = vmpackc.low %vm3520_vm12, %vm3516_vm2  ;;  %vm4487_vm12 = vcmp.eq.s32.totalorder %v7777_v11, %v11967_v43 }
 0x18a   :  { %v12116_v50 = vadd.f32 %v1399_v9, %v1303_v61  ;;  %v1401_v35 = vpop.f32.mrf.mxu1  ;;  %vm12136_vm2 = vmpackc.low %vm4492_vm5, %vm4488_vm13  ;;  %vm4491_vm13 = vcmp.eq.s32.totalorder %v7780_v12, %v11967_v43 }
 0x18b   :  { %v1921_v41 = vpop.f32.mrf.mxu0  ;;  %7088 = vmatmul.mubr.msk.bf16.vlgmr.msra.gmra.mxu0 %vm12046_vm0, %v7731_v15  ;;  %vm12149_vm0 = vmpackc.low %vm4494_vm9, %vm4490_vm14  ;;  %vm3526_vm14 = vcmp.eq.s32.totalorder %v7901_v24, %v11839_v56 }
 0x18c   :  { %v2018_v44 = vpop.f32.mrf.mxu1  ;;  %7152 = vmatmul.mubr.msk.bf16.vlgmr.msra.gmra.mxu1 %vm12065_vm15, %v7731_v15  ;;  %7314 = vmatpush1.bf16.xpose.msk.msra.mxu0 %vm12085_vm11, %v7731_v15  ;;  %vm12169_vm15 = vmpackc.low %vm3517_vm4, %vm3513_vm7  ;;  %vm4489_vm11 = vcmp.eq.s32.totalorder %v7777_v11, %v11981_v0  ;;  %vm3528_vm7 = vcmp.eq.s32.totalorder %v7901_v24, %v11861_v63 }
 0x18d   :  { %v2019_v36 = vadd.f32 %v2018_v44, %v1921_v41  ;;  %7378 = vmatpush1.bf16.xpose.msk.msra.mxu1 %vm12100_vm8, %v7731_v15  ;;  %v1923_v13 = vpop.f32.mrf.mxu0  ;;  %7090 = vmatprep.mubr.msk.bf16.mxu0 %vm12108_vm6, %v7731_v15  ;;  %vm4493_vm8 = vcmp.eq.s32.totalorder %v7780_v12, %v11981_v0  ;;  %vm12186_vm5 = vmpackc.low %vm3519_vm3, %vm3515_vm10  ;;  %vm3522_vm6 = vcmp.eq.s32.totalorder %v7898_v23, %v11839_v56 }
 0x18e   :  { %v2020_v52 = vpop.f32.mrf.mxu1  ;;  %7154 = vmatprep.mubr.msk.bf16.mxu1 %vm12118_vm1, %v7731_v15  ;;  %7316 = vmatprep.subr.msk.bf16.mxu0 %vm12136_vm2, %v7731_v15  ;;  %vm12209_vm9 = vmpackc.low %vm4491_vm13, %vm4487_vm12  ;;  %vm3524_vm1 = vcmp.eq.s32.totalorder %v7898_v23, %v11861_v63  ;;  %vm4480_vm10 = vcmp.eq.s32.totalorder %v7815_v16, %v11883_v54  ;;  %vm4484_vm3 = vcmp.eq.s32.totalorder %v7818_v17, %v11883_v54 }
 0x18f   :  { %v12198_v25 = vadd.f32 %v2019_v36, %v11117_v47  ;;  %v1924_v59 = vpop.f32.mrf.mxu0  ;;  %7380 = vmatprep.subr.msk.bf16.mxu1 %vm12149_vm0, %v7731_v15  ;;  %vm12220_vm4 = vmpackc.low %vm4493_vm8, %vm4489_vm11  ;;  %vm4482_vm0 = vcmp.eq.s32.totalorder %v7815_v16, %v11907_v14  ;;  %vm4486_vm12 = vcmp.eq.s32.totalorder %v7818_v17, %v11907_v14  ;;  %vm3521_vm11 = vcmp.eq.s32.totalorder %v7898_v23, %v11904_v51 }
 0x190   :  { %v2021_v47 = vpop.f32.mrf.mxu1  ;;  %vm12228_vm2 = vmpackc.low %vm3526_vm14, %vm3522_vm6  ;;  %vm3525_vm8 = vcmp.eq.s32.totalorder %v7901_v24, %v11904_v51  ;;  %vm3523_vm6 = vcmp.eq.s32.totalorder %v7898_v23, %v11945_v42  ;;  %vm3527_vm14 = vcmp.eq.s32.totalorder %v7901_v24, %v11945_v42 }
 0x191   :  { %v2022_v9 = vadd.f32 %v2021_v47, %v1924_v59  ;;  %v1926_v33 = vpop.f32.mrf.mxu0  ;;  %vm12236_vm13 = vmpackc.low %vm3528_vm7, %vm3524_vm1  ;;  %vm4479_vm7 = vcmp.eq.s32.totalorder %v7815_v16, %v11967_v43 }
 0x192   :  { %v2023_v45 = vpop.f32.mrf.mxu1  ;;  %vm12260_vm1 = vmpackc.low %vm4484_vm3, %vm4480_vm10  ;;  %vm4483_vm10 = vcmp.eq.s32.totalorder %v7818_v17, %v11967_v43 }
 0x193   :  { %v12245_v32 = vadd.f32 %v2022_v9, %v11179_v48  ;;  %v1929_v41 = vpop.f32.mrf.mxu0  ;;  %7092 = vmatmul.mubr.msk.bf16.gmra.mxu0 %vm12169_vm15, %v7731_v15  ;;  %vm12273_vm15 = vmpackc.low %vm4486_vm12, %vm4482_vm0  ;;  %vm3534_vm0 = vcmp.eq.s32.totalorder %v7870_v21, %v11839_v56 }
 0x194   :  { %v2026_v38 = vpop.f32.mrf.mxu1  ;;  %7156 = vmatmul.mubr.msk.bf16.gmra.mxu1 %vm12186_vm5, %v7731_v15  ;;  %7318 = vmatpush1.bf16.xpose.msk.msra.mxu0 %vm12209_vm9, %v7731_v15  ;;  %vm12293_vm5 = vmpackc.low %vm3525_vm8, %vm3521_vm11  ;;  %vm4481_vm9 = vcmp.eq.s32.totalorder %v7815_v16, %v11981_v0  ;;  %vm3536_vm11 = vcmp.eq.s32.totalorder %v7870_v21, %v11861_v63 }
 0x195   :  { %v2027_v10 = vadd.f32 %v2026_v38, %v1929_v41  ;;  %7382 = vmatpush1.bf16.xpose.msk.msra.mxu1 %vm12220_vm4, %v7731_v15  ;;  %v1931_v36 = vpop.f32.mrf.mxu0  ;;  %7094 = vmatprep.mubr.msk.bf16.mxu0 %vm12228_vm2, %v7731_v15  ;;  %vm4485_vm4 = vcmp.eq.s32.totalorder %v7818_v17, %v11981_v0  ;;  %vm12310_vm3 = vmpackc.low %vm3527_vm14, %vm3523_vm6  ;;  %vm3530_vm2 = vcmp.eq.s32.totalorder %v7867_v20, %v11839_v56 }
 0x196   :  { %v2028_v62 = vpop.f32.mrf.mxu1  ;;  %7158 = vmatprep.mubr.msk.bf16.mxu1 %vm12236_vm13, %v7731_v15  ;;  %7320 = vmatprep.subr.msk.bf16.mxu0 %vm12260_vm1, %v7731_v15  ;;  %vm12333_vm12 = vmpackc.low %vm4483_vm10, %vm4479_vm7  ;;  %vm3532_vm13 = vcmp.eq.s32.totalorder %v7867_v20, %v11861_v63  ;;  %vm4472_vm6 = vcmp.eq.s32.totalorder %v7841_v18, %v11883_v54  ;;  %vm4476_vm14 = vcmp.eq.s32.totalorder %v7844_v19, %v11883_v54 }
 0x197   :  { %v12322_v57 = vadd.f32 %v2027_v10, %v11244_v49  ;;  %v1932_v59 = vpop.f32.mrf.mxu0  ;;  %7384 = vmatprep.subr.msk.bf16.mxu1 %vm12273_vm15, %v7731_v15  ;;  %vm12344_vm8 = vmpackc.low %vm4485_vm4, %vm4481_vm9  ;;  %vm4474_vm15 = vcmp.eq.s32.totalorder %v7841_v18, %v11907_v14  ;;  %vm4478_vm7 = vcmp.eq.s32.totalorder %v7844_v19, %v11907_v14  ;;  %vm3529_vm9 = vcmp.eq.s32.totalorder %v7867_v20, %v11904_v51 }
 0x198   :  { %v2029_v49 = vpop.f32.mrf.mxu1  ;;  %vm12352_vm1 = vmpackc.low %vm3534_vm0, %vm3530_vm2  ;;  %vm3533_vm4 = vcmp.eq.s32.totalorder %v7870_v21, %v11904_v51  ;;  %vm3531_vm2 = vcmp.eq.s32.totalorder %v7867_v20, %v11945_v42  ;;  %vm3535_vm0 = vcmp.eq.s32.totalorder %v7870_v21, %v11945_v42 }
 0x199   :  { %v2030_v61 = vadd.f32 %v2029_v49, %v1932_v59  ;;  %v1934_v9 = vpop.f32.mrf.mxu0  ;;  %vm12360_vm10 = vmpackc.low %vm3536_vm11, %vm3532_vm13  ;;  %vm4471_vm11 = vcmp.eq.s32.totalorder %v7841_v18, %v11967_v43 }
 0x19a   :  { %v2031_v37 = vpop.f32.mrf.mxu1  ;;  %vm12384_vm13 = vmpackc.low %vm4476_vm14, %vm4472_vm6  ;;  %vm4475_vm6 = vcmp.eq.s32.totalorder %v7844_v19, %v11967_v43 }
 0x19b   :  { %v12369_v35 = vadd.f32 %v2030_v61, %v11306_v22  ;;  %v1937_v41 = vpop.f32.mrf.mxu0  ;;  %7096 = vmatmul.mubr.msk.bf16.gmra.mxu0 %vm12293_vm5, %v7731_v15  ;;  %vm12397_vm5 = vmpackc.low %vm4478_vm7, %vm4474_vm15  ;;  %vm3542_vm15 = vcmp.eq.s32.totalorder %v7844_v19, %v11839_v56 }
 0x19c   :  { %v2034_v48 = vpop.f32.mrf.mxu1  ;;  %7160 = vmatmul.mubr.msk.bf16.gmra.mxu1 %vm12310_vm3, %v7731_v15  ;;  %7322 = vmatpush1.bf16.xpose.msk.msra.mxu0 %vm12333_vm12, %v7731_v15  ;;  %vm12417_vm3 = vmpackc.low %vm3533_vm4, %vm3529_vm9  ;;  %vm4473_vm12 = vcmp.eq.s32.totalorder %v7841_v18, %v11981_v0  ;;  %vm3544_vm9 = vcmp.eq.s32.totalorder %v7844_v19, %v11861_v63 }
 0x19d   :  { %v2035_v44 = vadd.f32 %v2034_v48, %v1937_v41  ;;  %7386 = vmatpush1.bf16.xpose.msk.msra.mxu1 %vm12344_vm8, %v7731_v15  ;;  %v1939_v10 = vpop.f32.mrf.mxu0  ;;  %7098 = vmatprep.mubr.msk.bf16.mxu0 %vm12352_vm1, %v7731_v15  ;;  %vm4477_vm8 = vcmp.eq.s32.totalorder %v7844_v19, %v11981_v0  ;;  %vm12434_vm14 = vmpackc.low %vm3535_vm0, %vm3531_vm2  ;;  %vm3538_vm1 = vcmp.eq.s32.totalorder %v7841_v18, %v11839_v56 }
 0x19e   :  { %v2036_v13 = vpop.f32.mrf.mxu1  ;;  %7162 = vmatprep.mubr.msk.bf16.mxu1 %vm12360_vm10, %v7731_v15  ;;  %7324 = vmatprep.subr.msk.bf16.mxu0 %vm12384_vm13, %v7731_v15  ;;  %vm12457_vm7 = vmpackc.low %vm4475_vm6, %vm4471_vm11  ;;  %vm3540_vm10 = vcmp.eq.s32.totalorder %v7841_v18, %v11861_v63  ;;  %vm4464_vm2 = vcmp.eq.s32.totalorder %v7867_v20, %v11883_v54  ;;  %vm4468_vm0 = vcmp.eq.s32.totalorder %v7870_v21, %v11883_v54 }
 0x19f   :  { %v12446_v52 = vadd.f32 %v2035_v44, %v11371_v26  ;;  %v1940_v59 = vpop.f32.mrf.mxu0  ;;  %7388 = vmatprep.subr.msk.bf16.mxu1 %vm12397_vm5, %v7731_v15  ;;  %vm12468_vm4 = vmpackc.low %vm4477_vm8, %vm4473_vm12  ;;  %vm4466_vm5 = vcmp.eq.s32.totalorder %v7867_v20, %v11907_v14  ;;  %vm4470_vm11 = vcmp.eq.s32.totalorder %v7870_v21, %v11907_v14  ;;  %vm3537_vm12 = vcmp.eq.s32.totalorder %v7841_v18, %v11904_v51 }
 0x1a0   :  { %v2037_v26 = vpop.f32.mrf.mxu1  ;;  %vm12476_vm13 = vmpackc.low %vm3542_vm15, %vm3538_vm1  ;;  %vm3541_vm8 = vcmp.eq.s32.totalorder %v7844_v19, %v11904_v51  ;;  %vm3539_vm1 = vcmp.eq.s32.totalorder %v7841_v18, %v11945_v42  ;;  %vm3543_vm15 = vcmp.eq.s32.totalorder %v7844_v19, %v11945_v42 }
 0x1a1   :  { %v2038_v47 = vadd.f32 %v2037_v26, %v1940_v59  ;;  %v1942_v61 = vpop.f32.mrf.mxu0  ;;  %vm12484_vm6 = vmpackc.low %vm3544_vm9, %vm3540_vm10  ;;  %vm4463_vm9 = vcmp.eq.s32.totalorder %v7867_v20, %v11967_v43 }
 0x1a2   :  { %v2039_v33 = vpop.f32.mrf.mxu1  ;;  %vm12508_vm10 = vmpackc.low %vm4468_vm0, %vm4464_vm2  ;;  %vm4467_vm2 = vcmp.eq.s32.totalorder %v7870_v21, %v11967_v43 }
 0x1a3   :  { %v12493_v45 = vadd.f32 %v2038_v47, %v11433_v58  ;;  %v1945_v41 = vpop.f32.mrf.mxu0  ;;  %7100 = vmatmul.mubr.msk.bf16.gmra.mxu0 %vm12417_vm3, %v7731_v15  ;;  %vm12521_vm3 = vmpackc.low %vm4470_vm11, %vm4466_vm5  ;;  %vm3550_vm5 = vcmp.eq.s32.totalorder %v7818_v17, %v11839_v56 }
 0x1a4   :  { %v2042_v22 = vpop.f32.mrf.mxu1  ;;  %7164 = vmatmul.mubr.msk.bf16.gmra.mxu1 %vm12434_vm14, %v7731_v15  ;;  %7326 = vmatpush1.bf16.xpose.msk.msra.mxu0 %vm12457_vm7, %v7731_v15  ;;  %vm12541_vm14 = vmpackc.low %vm3541_vm8, %vm3537_vm12  ;;  %vm4465_vm7 = vcmp.eq.s32.totalorder %v7867_v20, %v11981_v0  ;;  %vm3552_vm12 = vcmp.eq.s32.totalorder %v7818_v17, %v11861_v63 }
 0x1a5   :  { %v2043_v38 = vadd.f32 %v2042_v22, %v1945_v41  ;;  %7390 = vmatpush1.bf16.xpose.msk.msra.mxu1 %vm12468_vm4, %v7731_v15  ;;  %v1947_v44 = vpop.f32.mrf.mxu0  ;;  %7102 = vmatprep.mubr.msk.bf16.mxu0 %vm12476_vm13, %v7731_v15  ;;  %vm4469_vm4 = vcmp.eq.s32.totalorder %v7870_v21, %v11981_v0  ;;  %vm12558_vm0 = vmpackc.low %vm3543_vm15, %vm3539_vm1  ;;  %vm3546_vm13 = vcmp.eq.s32.totalorder %v7815_v16, %v11839_v56 }
 0x1a6   :  { %v2044_v36 = vpop.f32.mrf.mxu1  ;;  %7166 = vmatprep.mubr.msk.bf16.mxu1 %vm12484_vm6, %v7731_v15  ;;  %7328 = vmatprep.subr.msk.bf16.mxu0 %vm12508_vm10, %v7731_v15  ;;  %vm12581_vm11 = vmpackc.low %vm4467_vm2, %vm4463_vm9  ;;  %vm3548_vm6 = vcmp.eq.s32.totalorder %v7815_v16, %v11861_v63  ;;  %vm4456_vm1 = vcmp.eq.s32.totalorder %v7898_v23, %v11883_v54  ;;  %vm4460_vm15 = vcmp.eq.s32.totalorder %v7901_v24, %v11883_v54 }
 0x1a7   :  { %v12570_v62 = vadd.f32 %v2043_v38, %v11498_v2  ;;  %v1948_v59 = vpop.f32.mrf.mxu0  ;;  %7392 = vmatprep.subr.msk.bf16.mxu1 %vm12521_vm3, %v7731_v15  ;;  %vm12592_vm8 = vmpackc.low %vm4469_vm4, %vm4465_vm7  ;;  %vm4458_vm3 = vcmp.eq.s32.totalorder %v7898_v23, %v11907_v14  ;;  %vm4462_vm9 = vcmp.eq.s32.totalorder %v7901_v24, %v11907_v14  ;;  %vm3545_vm7 = vcmp.eq.s32.totalorder %v7815_v16, %v11904_v51 }
 0x1a8   :  { %v2045_v2 = vpop.f32.mrf.mxu1  ;;  %vm12600_vm10 = vmpackc.low %vm3550_vm5, %vm3546_vm13  ;;  %vm3549_vm4 = vcmp.eq.s32.totalorder %v7818_v17, %v11904_v51  ;;  %vm3547_vm13 = vcmp.eq.s32.totalorder %v7815_v16, %v11945_v42  ;;  %vm3551_vm5 = vcmp.eq.s32.totalorder %v7818_v17, %v11945_v42 }
 0x1a9   :  { %v2046_v49 = vadd.f32 %v2045_v2, %v1948_v59  ;;  %v1950_v47 = vpop.f32.mrf.mxu0  ;;  %vm12608_vm2 = vmpackc.low %vm3552_vm12, %vm3548_vm6  ;;  %vm4455_vm12 = vcmp.eq.s32.totalorder %v7898_v23, %v11967_v43 }
 0x1aa   :  { %v2047_v9 = vpop.f32.mrf.mxu1  ;;  %vm12632_vm6 = vmpackc.low %vm4460_vm15, %vm4456_vm1  ;;  %vm4459_vm1 = vcmp.eq.s32.totalorder %v7901_v24, %v11967_v43  ;;  %v7440_v47 = vld [vmem:[%s14443_s1 + $0x7] ss:$8 sm:$0xf] }
 0x1ab   :  { %v12617_v37 = vadd.f32 %v2046_v49, %v11560_v55  ;;  %v1953_v41 = vpop.f32.mrf.mxu0  ;;  %7104 = vmatmul.mubr.msk.bf16.gmra.mxu0 %vm12541_vm14, %v7731_v15  ;;  %vm12645_vm14 = vmpackc.low %vm4462_vm9, %vm4458_vm3  ;;  %vm3558_vm3 = vcmp.eq.s32.totalorder %v7780_v12, %v11839_v56 }
 0x1ac   :  { %v2050_v58 = vpop.f32.mrf.mxu1  ;;  %7168 = vmatmul.mubr.msk.bf16.gmra.mxu1 %vm12558_vm0, %v7731_v15  ;;  %7330 = vmatpush1.bf16.xpose.msk.msra.mxu0 %vm12581_vm11, %v7731_v15  ;;  %vm12665_vm0 = vmpackc.low %vm3549_vm4, %vm3545_vm7  ;;  %vm4457_vm11 = vcmp.eq.s32.totalorder %v7898_v23, %v11981_v0  ;;  %vm3560_vm7 = vcmp.eq.s32.totalorder %v7780_v12, %v11861_v63 }
 0x1ad   :  { %v2051_v48 = vadd.f32 %v2050_v58, %v1953_v41  ;;  %7394 = vmatpush1.bf16.xpose.msk.msra.mxu1 %vm12592_vm8, %v7731_v15  ;;  %v1955_v38 = vpop.f32.mrf.mxu0  ;;  %7106 = vmatprep.mubr.msk.bf16.mxu0 %vm12600_vm10, %v7731_v15  ;;  %vm4461_vm8 = vcmp.eq.s32.totalorder %v7901_v24, %v11981_v0  ;;  %vm12682_vm15 = vmpackc.low %vm3551_vm5, %vm3547_vm13  ;;  %vm3554_vm10 = vcmp.eq.s32.totalorder %v7777_v11, %v11839_v56 }
 0x1ae   :  { %v2052_v10 = vpop.f32.mrf.mxu1  ;;  %7170 = vmatprep.mubr.msk.bf16.mxu1 %vm12608_vm2, %v7731_v15  ;;  %7332 = vmatprep.subr.msk.bf16.mxu0 %vm12632_vm6, %v7731_v15  ;;  %vm12705_vm9 = vmpackc.low %vm4459_vm1, %vm4455_vm12  ;;  %vm3556_vm2 = vcmp.eq.s32.totalorder %v7777_v11, %v11861_v63  ;;  %vm4448_vm13 = vcmp.eq.s32.totalorder %v7948_v29, %v11883_v54  ;;  %vm4452_vm5 = vcmp.eq.s32.totalorder %v7951_v30, %v11883_v54 }
 0x1af   :  { %v12694_v13 = vadd.f32 %v2051_v48, %v11625_v34  ;;  %v1956_v59 = vpop.f32.mrf.mxu0  ;;  %7396 = vmatprep.subr.msk.bf16.mxu1 %vm12645_vm14, %v7731_v15  ;;  %vm12716_vm4 = vmpackc.low %vm4461_vm8, %vm4457_vm11  ;;  %vm4450_vm14 = vcmp.eq.s32.totalorder %v7948_v29, %v11907_v14  ;;  %vm4454_vm12 = vcmp.eq.s32.totalorder %v7951_v30, %v11907_v14  ;;  %vm3553_vm11 = vcmp.eq.s32.totalorder %v7777_v11, %v11904_v51 }
 0x1b0   :  { %v2053_v34 = vpop.f32.mrf.mxu1  ;;  %vm12724_vm6 = vmpackc.low %vm3558_vm3, %vm3554_vm10  ;;  %vm3557_vm8 = vcmp.eq.s32.totalorder %v7780_v12, %v11904_v51  ;;  %vm3555_vm10 = vcmp.eq.s32.totalorder %v7777_v11, %v11945_v42  ;;  %vm3559_vm3 = vcmp.eq.s32.totalorder %v7780_v12, %v11945_v42 }
 0x1b1   :  { %v2054_v26 = vadd.f32 %v2053_v34, %v1956_v59  ;;  %v1958_v49 = vpop.f32.mrf.mxu0  ;;  %vm12732_vm1 = vmpackc.low %vm3560_vm7, %vm3556_vm2  ;;  %vm4447_vm7 = vcmp.eq.s32.totalorder %v7948_v29, %v11967_v43 }
 0x1b2   :  { %v2055_v61 = vpop.f32.mrf.mxu1  ;;  %vm12756_vm2 = vmpackc.low %vm4452_vm5, %vm4448_vm13  ;;  %vm4451_vm13 = vcmp.eq.s32.totalorder %v7951_v30, %v11967_v43  ;;  %v13026_v49 = vrot.slane %v7440_v47, %v7768_v8 }
 0x1b3   :  { %v12741_v33 = vadd.f32 %v2054_v26, %v11687_v46  ;;  %v1961_v41 = vpop.f32.mrf.mxu0  ;;  %7108 = vmatmul.mubr.msk.bf16.gmra.mxu0 %vm12665_vm0, %v7731_v15  ;;  %vm12769_vm0 = vmpackc.low %vm4454_vm12, %vm4450_vm14  ;;  %vm3566_vm14 = vcmp.eq.s32.totalorder %v7756_v4, %v11839_v56 }
 0x1b4   :  { %v2058_v55 = vpop.f32.mrf.mxu1  ;;  %7172 = vmatmul.mubr.msk.bf16.gmra.mxu1 %vm12682_vm15, %v7731_v15  ;;  %7334 = vmatpush1.bf16.xpose.msk.msra.mxu0 %vm12705_vm9, %v7731_v15  ;;  %vm12789_vm15 = vmpackc.low %vm3557_vm8, %vm3553_vm11  ;;  %vm4449_vm9 = vcmp.eq.s32.totalorder %v7948_v29, %v11981_v0  ;;  %vm3568_vm11 = vcmp.eq.s32.totalorder %v7756_v4, %v11861_v63 }
 0x1b5   :  { %v2059_v22 = vadd.f32 %v2058_v55, %v1961_v41  ;;  %7398 = vmatpush1.bf16.xpose.msk.msra.mxu1 %vm12716_vm4, %v7731_v15  ;;  %v1963_v48 = vpop.f32.mrf.mxu0  ;;  %7110 = vmatprep.mubr.msk.bf16.mxu0 %vm12724_vm6, %v7731_v15  ;;  %vm4453_vm4 = vcmp.eq.s32.totalorder %v7951_v30, %v11981_v0  ;;  %vm12806_vm5 = vmpackc.low %vm3559_vm3, %vm3555_vm10  ;;  %vm3562_vm6 = vcmp.eq.s32.totalorder %v7753_v3, %v11839_v56 }
 0x1b6   :  { %v2060_v44 = vpop.f32.mrf.mxu1  ;;  %7174 = vmatprep.mubr.msk.bf16.mxu1 %vm12732_vm1, %v7731_v15  ;;  %7336 = vmatprep.subr.msk.bf16.mxu0 %vm12756_vm2, %v7731_v15  ;;  %vm12829_vm12 = vmpackc.low %vm4451_vm13, %vm4447_vm7  ;;  %vm3564_vm1 = vcmp.eq.s32.totalorder %v7753_v3, %v11861_v63  ;;  %vm4440_vm10 = vcmp.eq.s32.totalorder %v7747_v1, %v11883_v54  ;;  %vm4444_vm3 = vcmp.eq.s32.totalorder %v7921_v27, %v11883_v54 }
 0x1b7   :  { %v12818_v36 = vadd.f32 %v2059_v22, %v11752_v31  ;;  %v1964_v59 = vpop.f32.mrf.mxu0  ;;  %7400 = vmatprep.subr.msk.bf16.mxu1 %vm12769_vm0, %v7731_v15  ;;  %v7181_v31 = vld [vmem:[%s14444_s0 + $0x6] ss:$8 sm:$0xf]  ;;  %vm12846_vm8 = vmpackc.low %vm4453_vm4, %vm4449_vm9  ;;  %vm4442_vm0 = vcmp.eq.s32.totalorder %v7747_v1, %v11907_v14  ;;  %vm4446_vm7 = vcmp.eq.s32.totalorder %v7921_v27, %v11907_v14  ;;  %vm3561_vm9 = vcmp.eq.s32.totalorder %v7753_v3, %v11904_v51 }
 0x1b8   :  { %v2061_v34 = vpop.f32.mrf.mxu1  ;;  %vm12857_vm2 = vmpackc.low %vm3566_vm14, %vm3562_vm6  ;;  %vm3565_vm4 = vcmp.eq.s32.totalorder %v7756_v4, %v11904_v51  ;;  %vm3563_vm6 = vcmp.eq.s32.totalorder %v7753_v3, %v11945_v42  ;;  %v12879_v56 = vrot.slane %v7181_v31, %v7759_v5  ;;  %vm3567_vm14 = vcmp.eq.s32.totalorder %v7756_v4, %v11945_v42 }
 0x1b9   :  { %v2062_v63 = vadd.f32 %v2061_v34, %v1964_v59  ;;  %v1966_v26 = vpop.f32.mrf.mxu0  ;;  %vm12868_vm13 = vmpackc.low %vm3568_vm11, %vm3564_vm1  ;;  %vm4439_vm11 = vcmp.eq.s32.totalorder %v7747_v1, %v11967_v43  ;;  %v12925_v22 = vrot.slane %v7440_v47, %v7759_v5  ;;  %v12946_v44 = vrot.slane %v7440_v47, %v7762_v6 }
 0x1ba   :  { %v2063_v61 = vpop.f32.mrf.mxu1  ;;  %vm12895_vm1 = vmpackc.low %vm4444_vm3, %vm4440_vm10  ;;  %vm4443_vm10 = vcmp.eq.s32.totalorder %v7921_v27, %v11967_v43  ;;  %vm4445_vm3 = vcmp.eq.s32.totalorder %v7921_v27, %v11981_v0  ;;  %v12965_v59 = vrot.slane %v7181_v31, %v7765_v7  ;;  %v12988_v2 = vrot.slane %v7181_v31, %v7768_v8 }
 0x1bb   :  { %v12882_v41 = vadd.f32 %v2062_v63, %v11822_v53  ;;  %v1969_v46 = vpop.f32.mrf.mxu0  ;;  %7112 = vmatmul.mubr.msk.bf16.gmra.mxu0 %vm12789_vm15, %v7731_v15  ;;  %v12902_v53 = vrot.slane %v7181_v31, %v7762_v6  ;;  %vm12916_vm15 = vmpackc.low %vm4446_vm7, %vm4442_vm0  ;;  %vm4204_vm0 = vcmp.eq.s32.totalorder %v7921_v27, %v12879_v56  ;;  %v13009_v31 = vrot.slane %v7440_v47, %v7765_v7 }
 0x1bc   :  { %v2066_v58 = vpop.f32.mrf.mxu1  ;;  %7176 = vmatmul.mubr.msk.bf16.gmra.mxu1 %vm12806_vm5, %v7731_v15  ;;  %7338 = vmatpush1.bf16.xpose.msk.msra.mxu0 %vm12829_vm12, %v7731_v15  ;;  %vm4441_vm5 = vcmp.eq.s32.totalorder %v7747_v1, %v11981_v0  ;;  %vm12939_vm12 = vmpackc.low %vm3565_vm4, %vm3561_vm9 }
 0x1bd   :  { %v2067_v48 = vadd.f32 %v2066_v58, %v1969_v46  ;;  %7402 = vmatpush1.bf16.xpose.msk.msra.mxu1 %vm12846_vm8, %v7731_v15  ;;  %v1971_v38 = vpop.f32.mrf.mxu0  ;;  %7114 = vmatprep.mubr.msk.bf16.mxu0 %vm12857_vm2, %v7731_v15  ;;  %vm12957_vm8 = vmpackc.low %vm3567_vm14, %vm3563_vm6  ;;  %vm4200_vm2 = vcmp.eq.s32.totalorder %v7747_v1, %v12879_v56  ;;  %vm4206_vm9 = vcmp.eq.s32.totalorder %v7921_v27, %v12902_v53 }
 0x1be   :  { %v2068_v10 = vpop.f32.mrf.mxu1  ;;  %7178 = vmatprep.mubr.msk.bf16.mxu1 %vm12868_vm13, %v7731_v15  ;;  %7340 = vmatprep.subr.msk.bf16.mxu0 %vm12895_vm1, %v7731_v15  ;;  %vm12983_vm7 = vmpackc.low %vm4443_vm10, %vm4439_vm11  ;;  %vm4202_vm13 = vcmp.eq.s32.totalorder %v7747_v1, %v12902_v53  ;;  %vm5190_vm6 = vcmp.eq.s32.totalorder %v7753_v3, %v12925_v22  ;;  %vm5194_vm14 = vcmp.eq.s32.totalorder %v7756_v4, %v12925_v22 }
 0x1bf   :  { %v12972_v40 = vadd.f32 %v2067_v48, %v11909_v28  ;;  %v1972_v42 = vpop.f32.mrf.mxu0  ;;  %7404 = vmatprep.subr.msk.bf16.mxu1 %vm12916_vm15, %v7731_v15  ;;  %vm13000_vm4 = vmpackc.low %vm4445_vm3, %vm4441_vm5  ;;  %vm5192_vm11 = vcmp.eq.s32.totalorder %v7753_v3, %v12946_v44  ;;  %vm5196_vm15 = vcmp.eq.s32.totalorder %v7756_v4, %v12946_v44  ;;  %vm4199_vm5 = vcmp.eq.s32.totalorder %v7747_v1, %v12965_v59 }
 0x1c0   :  { %v2069_v28 = vpop.f32.mrf.mxu1  ;;  %vm13017_vm1 = vmpackc.low %vm4204_vm0, %vm4200_vm2  ;;  %vm4203_vm3 = vcmp.eq.s32.totalorder %v7921_v27, %v12965_v59  ;;  %vm4201_vm2 = vcmp.eq.s32.totalorder %v7747_v1, %v12988_v2  ;;  %vm4205_vm0 = vcmp.eq.s32.totalorder %v7921_v27, %v12988_v2 }
 0x1c1   :  { %v2070_v63 = vadd.f32 %v2069_v28, %v1972_v42  ;;  %v1974_v26 = vpop.f32.mrf.mxu0  ;;  %vm13028_vm10 = vmpackc.low %vm4206_vm9, %vm4202_vm13  ;;  %vm5189_vm9 = vcmp.eq.s32.totalorder %v7753_v3, %v13009_v31 }
 0x1c2   :  { %v2071_v61 = vpop.f32.mrf.mxu1  ;;  %vm13052_vm13 = vmpackc.low %vm5194_vm14, %vm5190_vm6  ;;  %vm5191_vm6 = vcmp.eq.s32.totalorder %v7753_v3, %v13026_v49 }
 0x1c3   :  { %v13037_v46 = vadd.f32 %v2070_v63, %v11983_v39  ;;  %v1977_v55 = vpop.f32.mrf.mxu0  ;;  %7116 = vmatmul.mubr.msk.bf16.gmra.mxu0 %vm12939_vm12, %v7731_v15  ;;  %vm13068_vm12 = vmpackc.low %vm5196_vm15, %vm5192_vm11  ;;  %vm4212_vm11 = vcmp.eq.s32.totalorder %v7951_v30, %v12879_v56 }
 0x1c4   :  { %v2074_v47 = vpop.f32.mrf.mxu1  ;;  %7180 = vmatmul.mubr.msk.bf16.gmra.mxu1 %vm12957_vm8, %v7731_v15  ;;  %7342 = vmatpush1.bf16.xpose.msk.msra.mxu0 %vm12983_vm7, %v7731_v15  ;;  %vm5193_vm8 = vcmp.eq.s32.totalorder %v7756_v4, %v13009_v31  ;;  %vm13088_vm7 = vmpackc.low %vm4203_vm3, %vm4199_vm5  ;;  %vm4214_vm5 = vcmp.eq.s32.totalorder %v7951_v30, %v12902_v53 }
 0x1c5   :  { %v2075_v54 = vadd.f32 %v2074_v47, %v1977_v55  ;;  %7406 = vmatpush1.bf16.xpose.msk.msra.mxu1 %vm13000_vm4, %v7731_v15  ;;  %v1979_v48 = vpop.f32.mrf.mxu0  ;;  %7344 = vmatprep.mubr.msk.bf16.mxu0 %vm13017_vm1, %v7731_v15  ;;  %vm5195_vm4 = vcmp.eq.s32.totalorder %v7756_v4, %v13026_v49  ;;  %vm13105_vm14 = vmpackc.low %vm4205_vm0, %vm4201_vm2  ;;  %vm4208_vm1 = vcmp.eq.s32.totalorder %v7948_v29, %v12879_v56 }
 0x1c6   :  { %v2076_v14 = vpop.f32.mrf.mxu1  ;;  %7408 = vmatprep.mubr.msk.bf16.mxu1 %vm13028_vm10, %v7731_v15  ;;  %7570 = vmatprep.subr.msk.bf16.mxu0 %vm13052_vm13, %v7731_v15  ;;  %vm13128_vm15 = vmpackc.low %vm5193_vm8, %vm5189_vm9  ;;  %vm4210_vm10 = vcmp.eq.s32.totalorder %v7948_v29, %v12902_v53  ;;  %vm5182_vm2 = vcmp.eq.s32.totalorder %v7777_v11, %v12925_v22  ;;  %vm5186_vm0 = vcmp.eq.s32.totalorder %v7780_v12, %v12925_v22 }
 0x1c7   :  { %v13117_v51 = vadd.f32 %v2075_v54, %v12054_v60  ;;  %v1980_v42 = vpop.f32.mrf.mxu0  ;;  %7634 = vmatprep.subr.msk.bf16.mxu1 %vm13068_vm12, %v7731_v15  ;;  %vm13139_vm3 = vmpackc.low %vm5195_vm4, %vm5191_vm6  ;;  %vm5184_vm12 = vcmp.eq.s32.totalorder %v7777_v11, %v12946_v44  ;;  %vm5188_vm9 = vcmp.eq.s32.totalorder %v7780_v12, %v12946_v44  ;;  %vm4207_vm6 = vcmp.eq.s32.totalorder %v7948_v29, %v12965_v59 }
 0x1c8   :  { %v2077_v60 = vpop.f32.mrf.mxu1  ;;  %vm13147_vm13 = vmpackc.low %vm4212_vm11, %vm4208_vm1  ;;  %vm4211_vm4 = vcmp.eq.s32.totalorder %v7951_v30, %v12965_v59  ;;  %vm4209_vm1 = vcmp.eq.s32.totalorder %v7948_v29, %v12988_v2  ;;  %vm4213_vm11 = vcmp.eq.s32.totalorder %v7951_v30, %v12988_v2 }
 0x1c9   :  { %v2078_v43 = vadd.f32 %v2077_v60, %v1980_v42  ;;  %v1982_v63 = vpop.f32.mrf.mxu0  ;;  %vm13155_vm8 = vmpackc.low %vm4214_vm5, %vm4210_vm10  ;;  %vm5181_vm5 = vcmp.eq.s32.totalorder %v7777_v11, %v13009_v31 }
 0x1ca   :  { %v2079_v0 = vpop.f32.mrf.mxu1  ;;  %vm13179_vm10 = vmpackc.low %vm5186_vm0, %vm5182_vm2  ;;  %vm5185_vm2 = vcmp.eq.s32.totalorder %v7780_v12, %v13009_v31 }
 0x1cb   :  { %v13164_v9 = vadd.f32 %v2078_v43, %v12116_v50  ;;  %v2615_v55 = vpop.f32.mrf.mxu0  ;;  %7346 = vmatmul.mubr.msk.bf16.vlgmr.msra.gmra.mxu0 %vm13088_vm7, %v7731_v15  ;;  %vm13192_vm7 = vmpackc.low %vm5188_vm9, %vm5184_vm12  ;;  %vm4220_vm12 = vcmp.eq.s32.totalorder %v7901_v24, %v12879_v56 }
 0x1cc   :  { %v2712_v39 = vpop.f32.mrf.mxu1  ;;  %7410 = vmatmul.mubr.msk.bf16.vlgmr.msra.gmra.mxu1 %vm13105_vm14, %v7731_v15  ;;  %7572 = vmatpush1.bf16.xpose.msk.msra.mxu0 %vm13128_vm15, %v7731_v15  ;;  %vm13212_vm14 = vmpackc.low %vm4211_vm4, %vm4207_vm6  ;;  %vm5183_vm15 = vcmp.eq.s32.totalorder %v7777_v11, %v13026_v49  ;;  %vm4222_vm6 = vcmp.eq.s32.totalorder %v7901_v24, %v12902_v53 }
 0x1cd   :  { %v2713_v58 = vadd.f32 %v2712_v39, %v2615_v55  ;;  %7636 = vmatpush1.bf16.xpose.msk.msra.mxu1 %vm13139_vm3, %v7731_v15  ;;  %v2617_v54 = vpop.f32.mrf.mxu0  ;;  %7348 = vmatprep.mubr.msk.bf16.mxu0 %vm13147_vm13, %v7731_v15  ;;  %vm5187_vm3 = vcmp.eq.s32.totalorder %v7780_v12, %v13026_v49  ;;  %vm13229_vm0 = vmpackc.low %vm4213_vm11, %vm4209_vm1  ;;  %vm4216_vm13 = vcmp.eq.s32.totalorder %v7898_v23, %v12879_v56 }
 0x1ce   :  { %v2714_v38 = vpop.f32.mrf.mxu1  ;;  %7412 = vmatprep.mubr.msk.bf16.mxu1 %vm13155_vm8, %v7731_v15  ;;  %7574 = vmatprep.subr.msk.bf16.mxu0 %vm13179_vm10, %v7731_v15  ;;  %vm13252_vm9 = vmpackc.low %vm5185_vm2, %vm5181_vm5  ;;  %vm4218_vm8 = vcmp.eq.s32.totalorder %v7898_v23, %v12902_v53  ;;  %vm5174_vm1 = vcmp.eq.s32.totalorder %v7815_v16, %v12925_v22  ;;  %vm5178_vm11 = vcmp.eq.s32.totalorder %v7818_v17, %v12925_v22 }
 0x1cf   :  { %v13241_v10 = vadd.f32 %v2713_v58, %v12198_v25  ;;  %v2618_v42 = vpop.f32.mrf.mxu0  ;;  %7638 = vmatprep.subr.msk.bf16.mxu1 %vm13192_vm7, %v7731_v15  ;;  %vm13263_vm4 = vmpackc.low %vm5187_vm3, %vm5183_vm15  ;;  %vm5176_vm7 = vcmp.eq.s32.totalorder %v7815_v16, %v12946_v44  ;;  %vm5180_vm5 = vcmp.eq.s32.totalorder %v7818_v17, %v12946_v44  ;;  %vm4215_vm15 = vcmp.eq.s32.totalorder %v7898_v23, %v12965_v59 }
 0x1d0   :  { %v2715_v25 = vpop.f32.mrf.mxu1  ;;  %vm13271_vm10 = vmpackc.low %vm4220_vm12, %vm4216_vm13  ;;  %vm4219_vm3 = vcmp.eq.s32.totalorder %v7901_v24, %v12965_v59  ;;  %vm4217_vm13 = vcmp.eq.s32.totalorder %v7898_v23, %v12988_v2  ;;  %vm4221_vm12 = vcmp.eq.s32.totalorder %v7901_v24, %v12988_v2 }
 0x1d1   :  { %v2716_v28 = vadd.f32 %v2715_v25, %v2618_v42  ;;  %v2620_v43 = vpop.f32.mrf.mxu0  ;;  %vm13279_vm2 = vmpackc.low %vm4222_vm6, %vm4218_vm8  ;;  %vm5173_vm6 = vcmp.eq.s32.totalorder %v7815_v16, %v13009_v31 }
 0x1d2   :  { %v2717_v26 = vpop.f32.mrf.mxu1  ;;  %vm13303_vm8 = vmpackc.low %vm5178_vm11, %vm5174_vm1  ;;  %vm5177_vm1 = vcmp.eq.s32.totalorder %v7818_v17, %v13009_v31 }
 0x1d3   :  { %v13288_v61 = vadd.f32 %v2716_v28, %v12245_v32  ;;  %v2623_v55 = vpop.f32.mrf.mxu0  ;;  %7350 = vmatmul.mubr.msk.bf16.gmra.mxu0 %vm13212_vm14, %v7731_v15  ;;  %vm13316_vm14 = vmpackc.low %vm5180_vm5, %vm5176_vm7  ;;  %vm4228_vm7 = vcmp.eq.s32.totalorder %v7870_v21, %v12879_v56 }
 0x1d4   :  { %v2720_v50 = vpop.f32.mrf.mxu1  ;;  %7414 = vmatmul.mubr.msk.bf16.gmra.mxu1 %vm13229_vm0, %v7731_v15  ;;  %7576 = vmatpush1.bf16.xpose.msk.msra.mxu0 %vm13252_vm9, %v7731_v15  ;;  %vm13336_vm0 = vmpackc.low %vm4219_vm3, %vm4215_vm15  ;;  %vm5175_vm9 = vcmp.eq.s32.totalorder %v7815_v16, %v13026_v49  ;;  %vm4230_vm15 = vcmp.eq.s32.totalorder %v7870_v21, %v12902_v53 }
 0x1d5   :  { %v2721_v47 = vadd.f32 %v2720_v50, %v2623_v55  ;;  %7640 = vmatpush1.bf16.xpose.msk.msra.mxu1 %vm13263_vm4, %v7731_v15  ;;  %v2625_v58 = vpop.f32.mrf.mxu0  ;;  %7352 = vmatprep.mubr.msk.bf16.mxu0 %vm13271_vm10, %v7731_v15  ;;  %vm5179_vm4 = vcmp.eq.s32.totalorder %v7818_v17, %v13026_v49  ;;  %vm13353_vm11 = vmpackc.low %vm4221_vm12, %vm4217_vm13  ;;  %vm4224_vm10 = vcmp.eq.s32.totalorder %v7867_v20, %v12879_v56 }
 0x1d6   :  { %v2722_v48 = vpop.f32.mrf.mxu1  ;;  %7416 = vmatprep.mubr.msk.bf16.mxu1 %vm13279_vm2, %v7731_v15  ;;  %7578 = vmatprep.subr.msk.bf16.mxu0 %vm13303_vm8, %v7731_v15  ;;  %vm13376_vm5 = vmpackc.low %vm5177_vm1, %vm5173_vm6  ;;  %vm4226_vm2 = vcmp.eq.s32.totalorder %v7867_v20, %v12902_v53  ;;  %vm5166_vm13 = vcmp.eq.s32.totalorder %v7841_v18, %v12925_v22  ;;  %vm5170_vm12 = vcmp.eq.s32.totalorder %v7844_v19, %v12925_v22 }
 0x1d7   :  { %v13365_v14 = vadd.f32 %v2721_v47, %v12322_v57  ;;  %v2626_v42 = vpop.f32.mrf.mxu0  ;;  %7642 = vmatprep.subr.msk.bf16.mxu1 %vm13316_vm14, %v7731_v15  ;;  %vm13387_vm3 = vmpackc.low %vm5179_vm4, %vm5175_vm9  ;;  %vm5168_vm14 = vcmp.eq.s32.totalorder %v7841_v18, %v12946_v44  ;;  %vm5172_vm6 = vcmp.eq.s32.totalorder %v7844_v19, %v12946_v44  ;;  %vm4223_vm9 = vcmp.eq.s32.totalorder %v7867_v20, %v12965_v59 }
 0x1d8   :  { %v2723_v57 = vpop.f32.mrf.mxu1  ;;  %vm13395_vm8 = vmpackc.low %vm4228_vm7, %vm4224_vm10  ;;  %vm4227_vm4 = vcmp.eq.s32.totalorder %v7870_v21, %v12965_v59  ;;  %vm4225_vm10 = vcmp.eq.s32.totalorder %v7867_v20, %v12988_v2  ;;  %vm4229_vm7 = vcmp.eq.s32.totalorder %v7870_v21, %v12988_v2 }
 0x1d9   :  { %v2724_v60 = vadd.f32 %v2723_v57, %v2626_v42  ;;  %v2628_v28 = vpop.f32.mrf.mxu0  ;;  %vm13403_vm1 = vmpackc.low %vm4230_vm15, %vm4226_vm2  ;;  %vm5165_vm15 = vcmp.eq.s32.totalorder %v7841_v18, %v13009_v31 }
 0x1da   :  { %v2725_v63 = vpop.f32.mrf.mxu1  ;;  %vm13427_vm2 = vmpackc.low %vm5170_vm12, %vm5166_vm13  ;;  %vm5169_vm13 = vcmp.eq.s32.totalorder %v7844_v19, %v13009_v31 }
 0x1db   :  { %v13412_v0 = vadd.f32 %v2724_v60, %v12369_v35  ;;  %v2631_v55 = vpop.f32.mrf.mxu0  ;;  %7354 = vmatmul.mubr.msk.bf16.gmra.mxu0 %vm13336_vm0, %v7731_v15  ;;  %vm13440_vm0 = vmpackc.low %vm5172_vm6, %vm5168_vm14  ;;  %vm4236_vm14 = vcmp.eq.s32.totalorder %v7844_v19, %v12879_v56 }
 0x1dc   :  { %v2728_v32 = vpop.f32.mrf.mxu1  ;;  %7418 = vmatmul.mubr.msk.bf16.gmra.mxu1 %vm13353_vm11, %v7731_v15  ;;  %7580 = vmatpush1.bf16.xpose.msk.msra.mxu0 %vm13376_vm5, %v7731_v15  ;;  %vm13460_vm11 = vmpackc.low %vm4227_vm4, %vm4223_vm9  ;;  %vm5167_vm5 = vcmp.eq.s32.totalorder %v7841_v18, %v13026_v49  ;;  %vm4238_vm9 = vcmp.eq.s32.totalorder %v7844_v19, %v12902_v53 }
 0x1dd   :  { %v2729_v39 = vadd.f32 %v2728_v32, %v2631_v55  ;;  %7644 = vmatpush1.bf16.xpose.msk.msra.mxu1 %vm13387_vm3, %v7731_v15  ;;  %v2633_v47 = vpop.f32.mrf.mxu0  ;;  %7356 = vmatprep.mubr.msk.bf16.mxu0 %vm13395_vm8, %v7731_v15  ;;  %vm5171_vm3 = vcmp.eq.s32.totalorder %v7844_v19, %v13026_v49  ;;  %vm13477_vm12 = vmpackc.low %vm4229_vm7, %vm4225_vm10  ;;  %vm4232_vm8 = vcmp.eq.s32.totalorder %v7841_v18, %v12879_v56 }
 0x1de   :  { %v2730_v54 = vpop.f32.mrf.mxu1  ;;  %7420 = vmatprep.mubr.msk.bf16.mxu1 %vm13403_vm1, %v7731_v15  ;;  %7582 = vmatprep.subr.msk.bf16.mxu0 %vm13427_vm2, %v7731_v15  ;;  %vm13500_vm6 = vmpackc.low %vm5169_vm13, %vm5165_vm15  ;;  %vm4234_vm1 = vcmp.eq.s32.totalorder %v7841_v18, %v12902_v53  ;;  %vm5158_vm10 = vcmp.eq.s32.totalorder %v7867_v20, %v12925_v22  ;;  %vm5162_vm7 = vcmp.eq.s32.totalorder %v7870_v21, %v12925_v22 }
 0x1df   :  { %v13489_v38 = vadd.f32 %v2729_v39, %v12446_v52  ;;  %v2634_v42 = vpop.f32.mrf.mxu0  ;;  %7646 = vmatprep.subr.msk.bf16.mxu1 %vm13440_vm0, %v7731_v15  ;;  %vm13511_vm4 = vmpackc.low %vm5171_vm3, %vm5167_vm5  ;;  %vm5160_vm0 = vcmp.eq.s32.totalorder %v7867_v20, %v12946_v44  ;;  %vm5164_vm15 = vcmp.eq.s32.totalorder %v7870_v21, %v12946_v44  ;;  %vm4231_vm5 = vcmp.eq.s32.totalorder %v7841_v18, %v12965_v59 }
 0x1e0   :  { %v2731_v52 = vpop.f32.mrf.mxu1  ;;  %vm13519_vm2 = vmpackc.low %vm4236_vm14, %vm4232_vm8  ;;  %vm4235_vm3 = vcmp.eq.s32.totalorder %v7844_v19, %v12965_v59  ;;  %vm4233_vm8 = vcmp.eq.s32.totalorder %v7841_v18, %v12988_v2  ;;  %vm4237_vm14 = vcmp.eq.s32.totalorder %v7844_v19, %v12988_v2 }
 0x1e1   :  { %v2732_v25 = vadd.f32 %v2731_v52, %v2634_v42  ;;  %v2636_v60 = vpop.f32.mrf.mxu0  ;;  %vm13527_vm13 = vmpackc.low %vm4238_vm9, %vm4234_vm1  ;;  %vm5157_vm9 = vcmp.eq.s32.totalorder %v7867_v20, %v13009_v31 }
 0x1e2   :  { %v2733_v43 = vpop.f32.mrf.mxu1  ;;  %vm13551_vm1 = vmpackc.low %vm5162_vm7, %vm5158_vm10  ;;  %vm5161_vm10 = vcmp.eq.s32.totalorder %v7870_v21, %v13009_v31 }
 0x1e3   :  { %v13536_v26 = vadd.f32 %v2732_v25, %v12493_v45  ;;  %v2639_v55 = vpop.f32.mrf.mxu0  ;;  %7358 = vmatmul.mubr.msk.bf16.gmra.mxu0 %vm13460_vm11, %v7731_v15  ;;  %vm13564_vm11 = vmpackc.low %vm5164_vm15, %vm5160_vm0  ;;  %vm4244_vm0 = vcmp.eq.s32.totalorder %v7818_v17, %v12879_v56 }
 0x1e4   :  { %v2736_v35 = vpop.f32.mrf.mxu1  ;;  %7422 = vmatmul.mubr.msk.bf16.gmra.mxu1 %vm13477_vm12, %v7731_v15  ;;  %7584 = vmatpush1.bf16.xpose.msk.msra.mxu0 %vm13500_vm6, %v7731_v15  ;;  %vm13584_vm12 = vmpackc.low %vm4235_vm3, %vm4231_vm5  ;;  %vm5159_vm6 = vcmp.eq.s32.totalorder %v7867_v20, %v13026_v49  ;;  %vm4246_vm5 = vcmp.eq.s32.totalorder %v7818_v17, %v12902_v53 }
 0x1e5   :  { %v2737_v50 = vadd.f32 %v2736_v35, %v2639_v55  ;;  %7648 = vmatpush1.bf16.xpose.msk.msra.mxu1 %vm13511_vm4, %v7731_v15  ;;  %v2641_v39 = vpop.f32.mrf.mxu0  ;;  %7360 = vmatprep.mubr.msk.bf16.mxu0 %vm13519_vm2, %v7731_v15  ;;  %vm5163_vm4 = vcmp.eq.s32.totalorder %v7870_v21, %v13026_v49  ;;  %vm13601_vm7 = vmpackc.low %vm4237_vm14, %vm4233_vm8  ;;  %vm4240_vm2 = vcmp.eq.s32.totalorder %v7815_v16, %v12879_v56 }
 0x1e6   :  { %v2738_v58 = vpop.f32.mrf.mxu1  ;;  %7424 = vmatprep.mubr.msk.bf16.mxu1 %vm13527_vm13, %v7731_v15  ;;  %7586 = vmatprep.subr.msk.bf16.mxu0 %vm13551_vm1, %v7731_v15  ;;  %vm13624_vm15 = vmpackc.low %vm5161_vm10, %vm5157_vm9  ;;  %vm4242_vm13 = vcmp.eq.s32.totalorder %v7815_v16, %v12902_v53  ;;  %vm5150_vm8 = vcmp.eq.s32.totalorder %v7898_v23, %v12925_v22  ;;  %vm5154_vm14 = vcmp.eq.s32.totalorder %v7901_v24, %v12925_v22 }
 0x1e7   :  { %v13613_v48 = vadd.f32 %v2737_v50, %v12570_v62  ;;  %v2642_v42 = vpop.f32.mrf.mxu0  ;;  %7650 = vmatprep.subr.msk.bf16.mxu1 %vm13564_vm11, %v7731_v15  ;;  %vm13635_vm3 = vmpackc.low %vm5163_vm4, %vm5159_vm6  ;;  %vm5152_vm11 = vcmp.eq.s32.totalorder %v7898_v23, %v12946_v44  ;;  %vm5156_vm9 = vcmp.eq.s32.totalorder %v7901_v24, %v12946_v44  ;;  %vm4239_vm6 = vcmp.eq.s32.totalorder %v7815_v16, %v12965_v59 }
 0x1e8   :  { %v2739_v62 = vpop.f32.mrf.mxu1  ;;  %vm13643_vm1 = vmpackc.low %vm4244_vm0, %vm4240_vm2  ;;  %vm4243_vm4 = vcmp.eq.s32.totalorder %v7818_v17, %v12965_v59  ;;  %vm4241_vm2 = vcmp.eq.s32.totalorder %v7815_v16, %v12988_v2  ;;  %vm4245_vm0 = vcmp.eq.s32.totalorder %v7818_v17, %v12988_v2 }
 0x1e9   :  { %v2740_v57 = vadd.f32 %v2739_v62, %v2642_v42  ;;  %v2644_v25 = vpop.f32.mrf.mxu0  ;;  %vm13651_vm10 = vmpackc.low %vm4246_vm5, %vm4242_vm13  ;;  %vm5149_vm5 = vcmp.eq.s32.totalorder %v7898_v23, %v13009_v31  ;;  %v7439_v62 = vld [vmem:[%s14444_s0 + $0x7] ss:$8 sm:$0xf] }
 0x1ea   :  { %v2741_v28 = vpop.f32.mrf.mxu1  ;;  %vm13675_vm13 = vmpackc.low %vm5154_vm14, %vm5150_vm8  ;;  %vm5153_vm8 = vcmp.eq.s32.totalorder %v7901_v24, %v13009_v31 }
 0x1eb   :  { %v13660_v63 = vadd.f32 %v2740_v57, %v12617_v37  ;;  %v2647_v55 = vpop.f32.mrf.mxu0  ;;  %7362 = vmatmul.mubr.msk.bf16.gmra.mxu0 %vm13584_vm12, %v7731_v15  ;;  %vm13688_vm12 = vmpackc.low %vm5156_vm9, %vm5152_vm11  ;;  %vm4252_vm11 = vcmp.eq.s32.totalorder %v7780_v12, %v12879_v56 }
 0x1ec   :  { %v2744_v45 = vpop.f32.mrf.mxu1  ;;  %7426 = vmatmul.mubr.msk.bf16.gmra.mxu1 %vm13601_vm7, %v7731_v15  ;;  %7588 = vmatpush1.bf16.xpose.msk.msra.mxu0 %vm13624_vm15, %v7731_v15  ;;  %vm13708_vm7 = vmpackc.low %vm4243_vm4, %vm4239_vm6  ;;  %vm5151_vm15 = vcmp.eq.s32.totalorder %v7898_v23, %v13026_v49  ;;  %vm4254_vm6 = vcmp.eq.s32.totalorder %v7780_v12, %v12902_v53 }
 0x1ed   :  { %v2745_v32 = vadd.f32 %v2744_v45, %v2647_v55  ;;  %7652 = vmatpush1.bf16.xpose.msk.msra.mxu1 %vm13635_vm3, %v7731_v15  ;;  %v2649_v50 = vpop.f32.mrf.mxu0  ;;  %7364 = vmatprep.mubr.msk.bf16.mxu0 %vm13643_vm1, %v7731_v15  ;;  %vm5155_vm3 = vcmp.eq.s32.totalorder %v7901_v24, %v13026_v49  ;;  %vm13725_vm14 = vmpackc.low %vm4245_vm0, %vm4241_vm2  ;;  %vm4248_vm1 = vcmp.eq.s32.totalorder %v7777_v11, %v12879_v56 }
 0x1ee   :  { %v2746_v47 = vpop.f32.mrf.mxu1  ;;  %7428 = vmatprep.mubr.msk.bf16.mxu1 %vm13651_vm10, %v7731_v15  ;;  %7590 = vmatprep.subr.msk.bf16.mxu0 %vm13675_vm13, %v7731_v15  ;;  %vm13748_vm9 = vmpackc.low %vm5153_vm8, %vm5149_vm5  ;;  %vm4250_vm10 = vcmp.eq.s32.totalorder %v7777_v11, %v12902_v53  ;;  %vm5142_vm2 = vcmp.eq.s32.totalorder %v7948_v29, %v12925_v22  ;;  %vm5146_vm0 = vcmp.eq.s32.totalorder %v7951_v30, %v12925_v22 }
 0x1ef   :  { %v13737_v54 = vadd.f32 %v2745_v32, %v12694_v13  ;;  %v2650_v42 = vpop.f32.mrf.mxu0  ;;  %7654 = vmatprep.subr.msk.bf16.mxu1 %vm13688_vm12, %v7731_v15  ;;  %vm13759_vm4 = vmpackc.low %vm5155_vm3, %vm5151_vm15  ;;  %vm5144_vm12 = vcmp.eq.s32.totalorder %v7948_v29, %v12946_v44  ;;  %vm5148_vm5 = vcmp.eq.s32.totalorder %v7951_v30, %v12946_v44  ;;  %vm4247_vm15 = vcmp.eq.s32.totalorder %v7777_v11, %v12965_v59 }
 0x1f0   :  { %v2747_v13 = vpop.f32.mrf.mxu1  ;;  %vm13767_vm13 = vmpackc.low %vm4252_vm11, %vm4248_vm1  ;;  %vm4251_vm3 = vcmp.eq.s32.totalorder %v7780_v12, %v12965_v59  ;;  %vm4249_vm1 = vcmp.eq.s32.totalorder %v7777_v11, %v12988_v2  ;;  %vm4253_vm11 = vcmp.eq.s32.totalorder %v7780_v12, %v12988_v2  ;;  %v14010_v50 = vrot.slane %v7439_v62, %v7765_v7 }
 0x1f1   :  { %v2748_v52 = vadd.f32 %v2747_v13, %v2650_v42  ;;  %v2652_v57 = vpop.f32.mrf.mxu0  ;;  %vm13775_vm8 = vmpackc.low %vm4254_vm6, %vm4250_vm10  ;;  %vm5141_vm6 = vcmp.eq.s32.totalorder %v7948_v29, %v13009_v31 }
 0x1f2   :  { %v2749_v60 = vpop.f32.mrf.mxu1  ;;  %vm13799_vm10 = vmpackc.low %vm5146_vm0, %vm5142_vm2  ;;  %vm5145_vm2 = vcmp.eq.s32.totalorder %v7951_v30, %v13009_v31 }
 0x1f3   :  { %v13784_v43 = vadd.f32 %v2748_v52, %v12741_v33  ;;  %v2655_v55 = vpop.f32.mrf.mxu0  ;;  %7366 = vmatmul.mubr.msk.bf16.gmra.mxu0 %vm13708_vm7, %v7731_v15  ;;  %vm13812_vm7 = vmpackc.low %vm5148_vm5, %vm5144_vm12  ;;  %vm4260_vm12 = vcmp.eq.s32.totalorder %v7756_v4, %v12879_v56 }
 0x1f4   :  { %v2752_v37 = vpop.f32.mrf.mxu1  ;;  %7430 = vmatmul.mubr.msk.bf16.gmra.mxu1 %vm13725_vm14, %v7731_v15  ;;  %7592 = vmatpush1.bf16.xpose.msk.msra.mxu0 %vm13748_vm9, %v7731_v15  ;;  %vm13832_vm14 = vmpackc.low %vm4251_vm3, %vm4247_vm15  ;;  %vm5143_vm9 = vcmp.eq.s32.totalorder %v7948_v29, %v13026_v49  ;;  %vm4262_vm15 = vcmp.eq.s32.totalorder %v7756_v4, %v12902_v53 }
 0x1f5   :  { %v2753_v35 = vadd.f32 %v2752_v37, %v2655_v55  ;;  %7656 = vmatpush1.bf16.xpose.msk.msra.mxu1 %vm13759_vm4, %v7731_v15  ;;  %v2657_v32 = vpop.f32.mrf.mxu0  ;;  %7368 = vmatprep.mubr.msk.bf16.mxu0 %vm13767_vm13, %v7731_v15  ;;  %vm5147_vm4 = vcmp.eq.s32.totalorder %v7951_v30, %v13026_v49  ;;  %vm13849_vm0 = vmpackc.low %vm4253_vm11, %vm4249_vm1  ;;  %vm4256_vm13 = vcmp.eq.s32.totalorder %v7753_v3, %v12879_v56 }
 0x1f6   :  { %v2754_v39 = vpop.f32.mrf.mxu1  ;;  %7432 = vmatprep.mubr.msk.bf16.mxu1 %vm13775_vm8, %v7731_v15  ;;  %7594 = vmatprep.subr.msk.bf16.mxu0 %vm13799_vm10, %v7731_v15  ;;  %vm13872_vm5 = vmpackc.low %vm5145_vm2, %vm5141_vm6  ;;  %vm4258_vm8 = vcmp.eq.s32.totalorder %v7753_v3, %v12902_v53  ;;  %vm5134_vm1 = vcmp.eq.s32.totalorder %v7747_v1, %v12925_v22  ;;  %vm5138_vm11 = vcmp.eq.s32.totalorder %v7921_v27, %v12925_v22 }
 0x1f7   :  { %v13861_v58 = vadd.f32 %v2753_v35, %v12818_v36  ;;  %v2658_v42 = vpop.f32.mrf.mxu0  ;;  %7658 = vmatprep.subr.msk.bf16.mxu1 %vm13812_vm7, %v7731_v15  ;;  %vm13883_vm3 = vmpackc.low %vm5147_vm4, %vm5143_vm9  ;;  %vm5136_vm7 = vcmp.eq.s32.totalorder %v7747_v1, %v12946_v44  ;;  %vm5140_vm6 = vcmp.eq.s32.totalorder %v7921_v27, %v12946_v44  ;;  %vm4255_vm9 = vcmp.eq.s32.totalorder %v7753_v3, %v12965_v59 }
 0x1f8   :  { %v2755_v36 = vpop.f32.mrf.mxu1  ;;  %vm13897_vm10 = vmpackc.low %vm4260_vm12, %vm4256_vm13  ;;  %vm4259_vm4 = vcmp.eq.s32.totalorder %v7756_v4, %v12965_v59  ;;  %vm4261_vm12 = vcmp.eq.s32.totalorder %v7756_v4, %v12988_v2  ;;  %v13950_v22 = vrot.slane %v7439_v62, %v7762_v6 }
 0x1f9   :  { %v2756_v52 = vadd.f32 %v2755_v36, %v2658_v42  ;;  %v2660_v53 = vpop.f32.mrf.mxu0  ;;  %vm13905_vm2 = vmpackc.low %vm4262_vm15, %vm4258_vm8 }
 0x1fa   :  { %v2757_v25 = vpop.f32.mrf.mxu1  ;;  %vm13922_vm13 = vmpackc.low %vm5138_vm11, %vm5134_vm1  ;;  %vm5139_vm1 = vcmp.eq.s32.totalorder %v7921_v27, %v13026_v49 }
 0x1fb   :  { %v13910_v28 = vadd.f32 %v2756_v52, %v12882_v41  ;;  %v2663_v55 = vpop.f32.mrf.mxu0  ;;  %7370 = vmatmul.mubr.msk.bf16.gmra.mxu0 %vm13832_vm14, %v7731_v15  ;;  %v13927_v41 = vrot.slane %v7439_v62, %v7759_v5  ;;  %vm4257_vm14 = vcmp.eq.s32.totalorder %v7753_v3, %v12988_v2  ;;  %vm13945_vm8 = vmpackc.low %vm5140_vm6, %vm5136_vm7 }
 0x1fc   :  { %v2760_v33 = vpop.f32.mrf.mxu1  ;;  %7434 = vmatmul.mubr.msk.bf16.gmra.mxu1 %vm13849_vm0, %v7731_v15  ;;  %7596 = vmatpush1.bf16.xpose.msk.msra.mxu0 %vm13872_vm5, %v7731_v15  ;;  %vm5133_vm0 = vcmp.eq.s32.totalorder %v7747_v1, %v13009_v31  ;;  %vm5137_vm5 = vcmp.eq.s32.totalorder %v7921_v27, %v13009_v31  ;;  %vm13971_vm15 = vmpackc.low %vm4259_vm4, %vm4255_vm9  ;;  %vm4900_vm9 = vcmp.eq.s32.totalorder %v7921_v27, %v13950_v22 }
 0x1fd   :  { %v2761_v37 = vadd.f32 %v2760_v33, %v2663_v55  ;;  %7660 = vmatpush1.bf16.xpose.msk.msra.mxu1 %vm13883_vm3, %v7731_v15  ;;  %v2665_v45 = vpop.f32.mrf.mxu0  ;;  %7372 = vmatprep.mubr.msk.bf16.mxu0 %vm13897_vm10, %v7731_v15  ;;  %vm5135_vm3 = vcmp.eq.s32.totalorder %v7747_v1, %v13026_v49  ;;  %vm13991_vm11 = vmpackc.low %vm4261_vm12, %vm4257_vm14  ;;  %vm4894_vm10 = vcmp.eq.s32.totalorder %v7747_v1, %v13927_v41 }
 0x1fe   :  { %v2762_v44 = vpop.f32.mrf.mxu1  ;;  %7436 = vmatprep.mubr.msk.bf16.mxu1 %vm13905_vm2, %v7731_v15  ;;  %7598 = vmatprep.subr.msk.bf16.mxu0 %vm13922_vm13, %v7731_v15  ;;  %vm4898_vm7 = vcmp.eq.s32.totalorder %v7921_v27, %v13927_v41  ;;  %vm14005_vm6 = vmpackc.low %vm5137_vm5, %vm5133_vm0  ;;  %vm4896_vm2 = vcmp.eq.s32.totalorder %v7747_v1, %v13950_v22  ;;  %v14020_v31 = vrot.slane %v7439_v62, %v7768_v8 }
 0x1ff   :  { %v13983_v35 = vadd.f32 %v2761_v37, %v12972_v40  ;;  %v2666_v32 = vpop.f32.mrf.mxu0  ;;  %7662 = vmatprep.subr.msk.bf16.mxu1 %vm13945_vm8, %v7731_v15  ;;  %vm7663_vm4 = vmpackc.low %vm5139_vm1, %vm5135_vm3  ;;  %vm4893_vm12 = vcmp.eq.s32.totalorder %v7747_v1, %v14010_v50  ;;  %vm4897_vm8 = vcmp.eq.s32.totalorder %v7921_v27, %v14010_v50  ;;  %vm4906_vm3 = vcmp.eq.s32.totalorder %v7951_v30, %v13927_v41 }
 0x200   :  { %v2763_v40 = vpop.f32.mrf.mxu1  ;;  %vm7601_vm13 = vmpackc.low %vm4898_vm7, %vm4894_vm10  ;;  %vm4895_vm0 = vcmp.eq.s32.totalorder %v7747_v1, %v14020_v31  ;;  %vm4899_vm5 = vcmp.eq.s32.totalorder %v7921_v27, %v14020_v31  ;;  %vm4908_vm10 = vcmp.eq.s32.totalorder %v7951_v30, %v13950_v22 }
 0x201   :  { %v2764_v39 = vadd.f32 %v2763_v40, %v2666_v32  ;;  %v2668_v47 = vpop.f32.mrf.mxu0  ;;  %vm7665_vm14 = vmpackc.low %vm4900_vm9, %vm4896_vm2  ;;  %vm4901_vm9 = vcmp.eq.s32.totalorder %v7948_v29, %v14010_v50 }
 0x202   :  { %v2765_v42 = vpop.f32.mrf.mxu1  ;;  %vm7603_vm1 = vmpackc.low %vm4897_vm8, %vm4893_vm12  ;;  %vm4910_vm12 = vcmp.eq.s32.totalorder %v7898_v23, %v13927_v41  ;;  %vm4914_vm8 = vcmp.eq.s32.totalorder %v7901_v24, %v13927_v41 }
 0x203   :  { %v14023_v7 = vadd.f32 %v2764_v39, %v13037_v46  ;;  %v2671_v34 = vpop.f32.mrf.mxu0  ;;  %7374 = vmatmul.mubr.msk.bf16.gmra.mxu0 %vm13971_vm15, %v7731_v15  ;;  %vm4902_vm15 = vcmp.eq.s32.totalorder %v7948_v29, %v13927_v41  ;;  %vm7667_vm7 = vmpackc.low %vm4899_vm5, %vm4895_vm0  ;;  %vm4912_vm5 = vcmp.eq.s32.totalorder %v7898_v23, %v13950_v22 }
 0x204   :  { %v2768_v36 = vpop.f32.mrf.mxu1  ;;  %7438 = vmatmul.mubr.msk.bf16.gmra.mxu1 %vm13991_vm11, %v7731_v15  ;;  %7600 = vmatpush1.bf16.xpose.msk.msra.mxu0 %vm14005_vm6, %v7731_v15  ;;  %vm4904_vm11 = vcmp.eq.s32.totalorder %v7948_v29, %v13950_v22  ;;  %vm7605_vm6 = vmpackc.low %vm4906_vm3, %vm4902_vm15  ;;  %vm4916_vm15 = vcmp.eq.s32.totalorder %v7901_v24, %v13950_v22 }
 0x205   :  { %v2769_v8 = vadd.f32 %v2768_v36, %v2671_v34  ;;  %7664 = vmatpush1.bf16.xpose.msk.msra.mxu1 %vm7663_vm4, %v7731_v15  ;;  %v2673_v49 = vpop.f32.mrf.mxu0  ;;  %7602 = vmatprep.mubr.msk.bf16.mxu0 %vm7601_vm13, %v7731_v15  ;;  %vm7669_vm2 = vmpackc.low %vm4908_vm10, %vm4904_vm11  ;;  %vm4905_vm4 = vcmp.eq.s32.totalorder %v7951_v30, %v14010_v50  ;;  %vm4903_vm13 = vcmp.eq.s32.totalorder %v7948_v29, %v14020_v31 }
 0x206   :  { %v2770_v46 = vpop.f32.mrf.mxu1  ;;  %7666 = vmatprep.mubr.msk.bf16.mxu1 %vm7665_vm14, %v7731_v15  ;;  %vm4907_vm14 = vcmp.eq.s32.totalorder %v7951_v30, %v14020_v31  ;;  %vm7607_vm0 = vmpackc.low %vm4905_vm4, %vm4901_vm9  ;;  %vm4909_vm10 = vcmp.eq.s32.totalorder %v7898_v23, %v14010_v50  ;;  %vm4918_vm9 = vcmp.eq.s32.totalorder %v7867_v20, %v13927_v41  ;;  %vm4922_vm4 = vcmp.eq.s32.totalorder %v7870_v21, %v13927_v41 }
 0x207   :  { %v14050_v13 = vadd.f32 %v2769_v8, %v13117_v51  ;;  %v2674_v62 = vpop.f32.mrf.mxu0  ;;  %vm7671_vm3 = vmpackc.low %vm4907_vm14, %vm4903_vm13  ;;  %vm4920_vm14 = vcmp.eq.s32.totalorder %v7867_v20, %v13950_v22 }
 0x208   :  { %v2771_v1 = vpop.f32.mrf.mxu1  ;;  %vm7673_vm11 = vmpackc.low %vm4916_vm15, %vm4912_vm5  ;;  %vm4917_vm15 = vcmp.eq.s32.totalorder %v7867_v20, %v14010_v50 }
 0x209   :  { %v2772_v27 = vadd.f32 %v2771_v1, %v2674_v62  ;;  %v2676_v52 = vpop.f32.mrf.mxu0 }
 0x20a   :  { %v2773_v53 = vpop.f32.mrf.mxu1 }
 0x20b   :  { %v14057_v57 = vadd.f32 %v2772_v27, %v13164_v9  ;;  %v3309_v51 = vpop.f32.mrf.mxu0  ;;  %7604 = vmatmul.mubr.msk.bf16.vlgmr.msra.gmra.mxu0 %vm7603_vm1, %v7731_v15  ;;  %vm7609_vm1 = vmpackc.low %vm4914_vm8, %vm4910_vm12  ;;  %vm4924_vm12 = vcmp.eq.s32.totalorder %v7870_v21, %v13950_v22 }
 0x20c   :  { %v3406_v25 = vpop.f32.mrf.mxu1  ;;  %7668 = vmatmul.mubr.msk.bf16.vlgmr.msra.gmra.mxu1 %vm7667_vm7, %v7731_v15  ;;  %7606 = vmatprep.mubr.msk.bf16.mxu0 %vm7605_vm6, %v7731_v15  ;;  %vm4913_vm7 = vcmp.eq.s32.totalorder %v7901_v24, %v14010_v50  ;;  %vm4911_vm6 = vcmp.eq.s32.totalorder %v7898_v23, %v14020_v31  ;;  %vm7677_vm5 = vmpackc.low %vm4924_vm12, %vm4920_vm14  ;;  %vm4925_vm12 = vcmp.eq.s32.totalorder %v7841_v18, %v14010_v50 }
 0x20d   :  { %v3407_v60 = vadd.f32 %v3406_v25, %v3309_v51  ;;  %v3311_v55 = vpop.f32.mrf.mxu0  ;;  %7670 = vmatprep.mubr.msk.bf16.mxu1 %vm7669_vm2, %v7731_v15  ;;  %vm4915_vm2 = vcmp.eq.s32.totalorder %v7901_v24, %v14020_v31  ;;  %vm7611_vm13 = vmpackc.low %vm4913_vm7, %vm4909_vm10  ;;  %vm4926_vm10 = vcmp.eq.s32.totalorder %v7841_v18, %v13927_v41  ;;  %vm4930_vm7 = vcmp.eq.s32.totalorder %v7844_v19, %v13927_v41 }
 0x20e   :  { %v3408_v9 = vpop.f32.mrf.mxu1  ;;  %vm7675_vm8 = vmpackc.low %vm4915_vm2, %vm4911_vm6  ;;  %vm4928_vm2 = vcmp.eq.s32.totalorder %v7841_v18, %v13950_v22 }
 0x20f   :  { %v14076_v56 = vadd.f32 %v3407_v60, %v13241_v10  ;;  %v3312_v33 = vpop.f32.mrf.mxu0 }
 0x210   :  { %v3409_v29 = vpop.f32.mrf.mxu1 }
 0x211   :  { %v3410_v30 = vadd.f32 %v3409_v29, %v3312_v33  ;;  %v3314_v5 = vpop.f32.mrf.mxu0 }
 0x212   :  { %v3411_v37 = vpop.f32.mrf.mxu1 }
 0x213   :  { %v14083_v45 = vadd.f32 %v3410_v30, %v13288_v61  ;;  %v3317_v10 = vpop.f32.mrf.mxu0  ;;  %7608 = vmatmul.mubr.msk.bf16.gmra.mxu0 %vm7607_vm0, %v7731_v15  ;;  %vm7613_vm0 = vmpackc.low %vm4922_vm4, %vm4918_vm9  ;;  %vm4932_vm9 = vcmp.eq.s32.totalorder %v7844_v19, %v13950_v22 }
 0x214   :  { %v3414_v44 = vpop.f32.mrf.mxu1  ;;  %7672 = vmatmul.mubr.msk.bf16.gmra.mxu1 %vm7671_vm3, %v7731_v15  ;;  %7610 = vmatprep.mubr.msk.bf16.mxu0 %vm7609_vm1, %v7731_v15  ;;  %vm4921_vm3 = vcmp.eq.s32.totalorder %v7870_v21, %v14010_v50  ;;  %vm4919_vm1 = vcmp.eq.s32.totalorder %v7867_v20, %v14020_v31  ;;  %vm7681_vm14 = vmpackc.low %vm4932_vm9, %vm4928_vm2  ;;  %vm4933_vm9 = vcmp.eq.s32.totalorder %v7815_v16, %v14010_v50 }
 0x215   :  { %v3415_v6 = vadd.f32 %v3414_v44, %v3317_v10  ;;  %v3319_v32 = vpop.f32.mrf.mxu0  ;;  %7674 = vmatprep.mubr.msk.bf16.mxu1 %vm7673_vm11, %v7731_v15  ;;  %vm4923_vm11 = vcmp.eq.s32.totalorder %v7870_v21, %v14020_v31  ;;  %vm7615_vm6 = vmpackc.low %vm4921_vm3, %vm4917_vm15  ;;  %vm4934_vm15 = vcmp.eq.s32.totalorder %v7815_v16, %v13927_v41  ;;  %vm4938_vm3 = vcmp.eq.s32.totalorder %v7818_v17, %v13927_v41 }
 0x216   :  { %v3416_v61 = vpop.f32.mrf.mxu1  ;;  %vm7679_vm4 = vmpackc.low %vm4923_vm11, %vm4919_vm1  ;;  %vm4936_vm11 = vcmp.eq.s32.totalorder %v7815_v16, %v13950_v22 }
 0x217   :  { %v14102_v59 = vadd.f32 %v3415_v6, %v13365_v14  ;;  %v3320_v40 = vpop.f32.mrf.mxu0 }
 0x218   :  { %v3417_v23 = vpop.f32.mrf.mxu1 }
 0x219   :  { %v3418_v24 = vadd.f32 %v3417_v23, %v3320_v40  ;;  %v3322_v2 = vpop.f32.mrf.mxu0 }
 0x21a   :  { %v3419_v39 = vpop.f32.mrf.mxu1 }
 0x21b   :  { %v14109_v47 = vadd.f32 %v3418_v24, %v13412_v0  ;;  %v3325_v14 = vpop.f32.mrf.mxu0  ;;  %7612 = vmatmul.mubr.msk.bf16.gmra.mxu0 %vm7611_vm13, %v7731_v15  ;;  %vm7617_vm13 = vmpackc.low %vm4930_vm7, %vm4926_vm10  ;;  %vm4940_vm10 = vcmp.eq.s32.totalorder %v7818_v17, %v13950_v22 }
 0x21c   :  { %v3422_v42 = vpop.f32.mrf.mxu1  ;;  %7676 = vmatmul.mubr.msk.bf16.gmra.mxu1 %vm7675_vm8, %v7731_v15  ;;  %7614 = vmatprep.mubr.msk.bf16.mxu0 %vm7613_vm0, %v7731_v15  ;;  %vm4929_vm8 = vcmp.eq.s32.totalorder %v7844_v19, %v14010_v50  ;;  %vm4927_vm0 = vcmp.eq.s32.totalorder %v7841_v18, %v14020_v31  ;;  %vm7685_vm2 = vmpackc.low %vm4940_vm10, %vm4936_vm11  ;;  %vm4941_vm10 = vcmp.eq.s32.totalorder %v7777_v11, %v14010_v50 }
 0x21d   :  { %v3423_v34 = vadd.f32 %v3422_v42, %v3325_v14  ;;  %v3327_v36 = vpop.f32.mrf.mxu0  ;;  %7678 = vmatprep.mubr.msk.bf16.mxu1 %vm7677_vm5, %v7731_v15  ;;  %vm4931_vm5 = vcmp.eq.s32.totalorder %v7844_v19, %v14020_v31  ;;  %vm7619_vm1 = vmpackc.low %vm4929_vm8, %vm4925_vm12  ;;  %vm4942_vm12 = vcmp.eq.s32.totalorder %v7777_v11, %v13927_v41  ;;  %vm4946_vm8 = vcmp.eq.s32.totalorder %v7780_v12, %v13927_v41 }
 0x21e   :  { %v3424_v0 = vpop.f32.mrf.mxu1  ;;  %vm7683_vm7 = vmpackc.low %vm4931_vm5, %vm4927_vm0  ;;  %vm4944_vm5 = vcmp.eq.s32.totalorder %v7777_v11, %v13950_v22 }
 0x21f   :  { %v14128_v8 = vadd.f32 %v3423_v34, %v13489_v38  ;;  %v3328_v49 = vpop.f32.mrf.mxu0 }
 0x220   :  { %v3425_v20 = vpop.f32.mrf.mxu1 }
 0x221   :  { %v3426_v21 = vadd.f32 %v3425_v20, %v3328_v49  ;;  %v3330_v46 = vpop.f32.mrf.mxu0 }
 0x222   :  { %v3427_v62 = vpop.f32.mrf.mxu1 }
 0x223   :  { %v14135_v1 = vadd.f32 %v3426_v21, %v13536_v26  ;;  %v3333_v38 = vpop.f32.mrf.mxu0  ;;  %7616 = vmatmul.mubr.msk.bf16.gmra.mxu0 %vm7615_vm6, %v7731_v15  ;;  %vm7621_vm6 = vmpackc.low %vm4938_vm3, %vm4934_vm15  ;;  %vm4948_vm15 = vcmp.eq.s32.totalorder %v7780_v12, %v13950_v22 }
 0x224   :  { %v3430_v27 = vpop.f32.mrf.mxu1  ;;  %7680 = vmatmul.mubr.msk.bf16.gmra.mxu1 %vm7679_vm4, %v7731_v15  ;;  %7618 = vmatprep.mubr.msk.bf16.mxu0 %vm7617_vm13, %v7731_v15  ;;  %vm4937_vm4 = vcmp.eq.s32.totalorder %v7818_v17, %v14010_v50  ;;  %vm4935_vm13 = vcmp.eq.s32.totalorder %v7815_v16, %v14020_v31  ;;  %vm7689_vm11 = vmpackc.low %vm4948_vm15, %vm4944_vm5  ;;  %vm4949_vm15 = vcmp.eq.s32.totalorder %v7753_v3, %v14010_v50 }
 0x225   :  { %v3431_v52 = vadd.f32 %v3430_v27, %v3333_v38  ;;  %v3335_v53 = vpop.f32.mrf.mxu0  ;;  %7682 = vmatprep.mubr.msk.bf16.mxu1 %vm7681_vm14, %v7731_v15  ;;  %vm4939_vm14 = vcmp.eq.s32.totalorder %v7818_v17, %v14020_v31  ;;  %vm7623_vm0 = vmpackc.low %vm4937_vm4, %vm4933_vm9  ;;  %vm4950_vm9 = vcmp.eq.s32.totalorder %v7753_v3, %v13927_v41  ;;  %vm4954_vm4 = vcmp.eq.s32.totalorder %v7756_v4, %v13927_v41 }
 0x226   :  { %v3432_v26 = vpop.f32.mrf.mxu1  ;;  %vm7687_vm3 = vmpackc.low %vm4939_vm14, %vm4935_vm13  ;;  %vm4952_vm14 = vcmp.eq.s32.totalorder %v7753_v3, %v13950_v22 }
 0x227   :  { %v14154_v51 = vadd.f32 %v3431_v52, %v13613_v48  ;;  %v3336_v25 = vpop.f32.mrf.mxu0 }
 0x228   :  { %v3433_v18 = vpop.f32.mrf.mxu1 }
 0x229   :  { %v3434_v19 = vadd.f32 %v3433_v18, %v3336_v25  ;;  %v3338_v60 = vpop.f32.mrf.mxu0 }
 0x22a   :  { %v3435_v55 = vpop.f32.mrf.mxu1 }
 0x22b   :  { %v14161_v9 = vadd.f32 %v3434_v19, %v13660_v63  ;;  %v3341_v48 = vpop.f32.mrf.mxu0  ;;  %7620 = vmatmul.mubr.msk.bf16.gmra.mxu0 %vm7619_vm1, %v7731_v15  ;;  %vm7625_vm1 = vmpackc.low %vm4946_vm8, %vm4942_vm12  ;;  %vm4956_vm12 = vcmp.eq.s32.totalorder %v7756_v4, %v13950_v22 }
 0x22c   :  { %v3438_v33 = vpop.f32.mrf.mxu1  ;;  %7684 = vmatmul.mubr.msk.bf16.gmra.mxu1 %vm7683_vm7, %v7731_v15  ;;  %7622 = vmatprep.mubr.msk.bf16.mxu0 %vm7621_vm6, %v7731_v15  ;;  %vm4945_vm7 = vcmp.eq.s32.totalorder %v7780_v12, %v14010_v50  ;;  %vm4943_vm6 = vcmp.eq.s32.totalorder %v7777_v11, %v14020_v31  ;;  %vm7693_vm5 = vmpackc.low %vm4956_vm12, %vm4952_vm14 }
 0x22d   :  { %v3439_v29 = vadd.f32 %v3438_v33, %v3341_v48  ;;  %v3343_v30 = vpop.f32.mrf.mxu0  ;;  %7686 = vmatprep.mubr.msk.bf16.mxu1 %vm7685_vm2, %v7731_v15  ;;  %vm4947_vm2 = vcmp.eq.s32.totalorder %v7780_v12, %v14020_v31  ;;  %vm7627_vm13 = vmpackc.low %vm4945_vm7, %vm4941_vm10 }
 0x22e   :  { %v3440_v63 = vpop.f32.mrf.mxu1  ;;  %vm7691_vm8 = vmpackc.low %vm4947_vm2, %vm4943_vm6 }
 0x22f   :  { %v14180_v5 = vadd.f32 %v3439_v29, %v13737_v54  ;;  %v3344_v37 = vpop.f32.mrf.mxu0 }
 0x230   :  { %v3441_v16 = vpop.f32.mrf.mxu1 }
 0x231   :  { %v3442_v17 = vadd.f32 %v3441_v16, %v3344_v37  ;;  %v3346_v10 = vpop.f32.mrf.mxu0 }
 0x232   :  { %v3443_v44 = vpop.f32.mrf.mxu1 }
 0x233   :  { %v14187_v6 = vadd.f32 %v3442_v17, %v13784_v43  ;;  %v3349_v54 = vpop.f32.mrf.mxu0  ;;  %7624 = vmatmul.mubr.msk.bf16.gmra.mxu0 %vm7623_vm0, %v7731_v15  ;;  %vm7629_vm0 = vmpackc.low %vm4954_vm4, %vm4950_vm9 }
 0x234   :  { %v3446_v32 = vpop.f32.mrf.mxu1  ;;  %7688 = vmatmul.mubr.msk.bf16.gmra.mxu1 %vm7687_vm3, %v7731_v15  ;;  %7626 = vmatprep.mubr.msk.bf16.mxu0 %vm7625_vm1, %v7731_v15  ;;  %vm4953_vm3 = vcmp.eq.s32.totalorder %v7756_v4, %v14010_v50  ;;  %vm4951_vm1 = vcmp.eq.s32.totalorder %v7753_v3, %v14020_v31 }
 0x235   :  { %v3447_v61 = vadd.f32 %v3446_v32, %v3349_v54  ;;  %v3351_v40 = vpop.f32.mrf.mxu0  ;;  %7690 = vmatprep.mubr.msk.bf16.mxu1 %vm7689_vm11, %v7731_v15  ;;  %vm4955_vm11 = vcmp.eq.s32.totalorder %v7756_v4, %v14020_v31  ;;  %vm7631_vm10 = vmpackc.low %vm4953_vm3, %vm4949_vm15 }
 0x236   :  { %v3448_v43 = vpop.f32.mrf.mxu1  ;;  %vm7695_vm7 = vmpackc.low %vm4955_vm11, %vm4951_vm1 }
 0x237   :  { %v14206_v23 = vadd.f32 %v3447_v61, %v13861_v58  ;;  %v3352_v24 = vpop.f32.mrf.mxu0 }
 0x238   :  { %v3449_v11 = vpop.f32.mrf.mxu1 }
 0x239   :  { %v3450_v12 = vadd.f32 %v3449_v11, %v3352_v24  ;;  %v3354_v2 = vpop.f32.mrf.mxu0 }
 0x23a   :  { %v3451_v39 = vpop.f32.mrf.mxu1 }
 0x23b   :  { %v14213_v41 = vadd.f32 %v3450_v12, %v13910_v28  ;;  %v3357_v58 = vpop.f32.mrf.mxu0  ;;  %7628 = vmatmul.mubr.msk.bf16.gmra.mxu0 %vm7627_vm13, %v7731_v15 }
 0x23c   :  { %v3454_v14 = vpop.f32.mrf.mxu1  ;;  %7692 = vmatmul.mubr.msk.bf16.gmra.mxu1 %vm7691_vm8, %v7731_v15  ;;  %7630 = vmatprep.mubr.msk.bf16.mxu0 %vm7629_vm0, %v7731_v15 }
 0x23d   :  { %v3455_v42 = vadd.f32 %v3454_v14, %v3357_v58  ;;  %v3359_v22 = vpop.f32.mrf.mxu0  ;;  %7694 = vmatprep.mubr.msk.bf16.mxu1 %vm7693_vm5, %v7731_v15 }
 0x23e   :  { %v3456_v28 = vpop.f32.mrf.mxu1 }
 0x23f   :  { %v14228_v34 = vadd.f32 %v3455_v42, %v13983_v35  ;;  %v3360_v36 = vpop.f32.mrf.mxu0 }
 0x240   :  { %v3457_v0 = vpop.f32.mrf.mxu1 }
 0x241   :  { %v3458_v49 = vadd.f32 %v3457_v0, %v3360_v36  ;;  %v3362_v20 = vpop.f32.mrf.mxu0 }
 0x242   :  { %v3459_v21 = vpop.f32.mrf.mxu1 }
 0x243   :  { %v14231_v46 = vadd.f32 %v3458_v49, %v14023_v7  ;;  %v3365_v50 = vpop.f32.mrf.mxu0  ;;  %7632 = vmatmul.mubr.msk.bf16.gmra.mxu0 %vm7631_vm10, %v7731_v15 }
 0x244   :  { %v3462_v3 = vpop.f32.mrf.mxu1  ;;  %7696 = vmatmul.mubr.msk.bf16.gmra.mxu1 %vm7695_vm7, %v7731_v15 }
 0x245   :  { %v3463_v4 = vadd.f32 %v3462_v3, %v3365_v50  ;;  %v3367_v31 = vpop.f32.mrf.mxu0 }
 0x246   :  { %v3464_v35 = vpop.f32.mrf.mxu1 }
 0x247   :  { %v14236_v62 = vadd.f32 %v3463_v4, %v14050_v13  ;;  %v3368_v38 = vpop.f32.mrf.mxu0 }
 0x248   :  { %v3465_v27 = vpop.f32.mrf.mxu1 }
 0x249   :  { %v3466_v52 = vadd.f32 %v3465_v27, %v3368_v38  ;;  %v3370_v53 = vpop.f32.mrf.mxu0 }
 0x24a   :  { %v3467_v26 = vpop.f32.mrf.mxu1 }
 0x24b   :  { %v14239_v7 = vadd.f32 %v3466_v52, %v14057_v57  ;;  %v4003_v25 = vpop.f32.mrf.mxu0 }
 0x24c   :  { %v4100_v18 = vpop.f32.mrf.mxu1 }
 0x24d   :  { %v4101_v19 = vadd.f32 %v4100_v18, %v4003_v25  ;;  %v4005_v60 = vpop.f32.mrf.mxu0 }
 0x24e   :  { %v4102_v55 = vpop.f32.mrf.mxu1 }
 0x24f   :  { %v14242_v15 = vadd.f32 %v4101_v19, %v14076_v56  ;;  %v4006_v48 = vpop.f32.mrf.mxu0 }
 0x250   :  { %v4103_v33 = vpop.f32.mrf.mxu1 }
 0x251   :  { %v4104_v13 = vadd.f32 %v4103_v33, %v4006_v48  ;;  %v4008_v29 = vpop.f32.mrf.mxu0 }
 0x252   :  { %v4105_v30 = vpop.f32.mrf.mxu1 }
 0x253   :  { %v14245_v63 = vadd.f32 %v4104_v13, %v14083_v45  ;;  %v4011_v37 = vpop.f32.mrf.mxu0 }
 0x254   :  { %v4108_v16 = vpop.f32.mrf.mxu1 }
 0x255   :  { %v4109_v57 = vadd.f32 %v4108_v16, %v4011_v37  ;;  %v4013_v17 = vpop.f32.mrf.mxu0 }
 0x256   :  { %v4110_v10 = vpop.f32.mrf.mxu1 }
 0x257   :  { %v14248_v44 = vadd.f32 %v4109_v57, %v14102_v59  ;;  %v4014_v54 = vpop.f32.mrf.mxu0 }
 0x258   :  { %v4111_v32 = vpop.f32.mrf.mxu1 }
 0x259   :  { %v4112_v56 = vadd.f32 %v4111_v32, %v4014_v54  ;;  %v4016_v61 = vpop.f32.mrf.mxu0 }
 0x25a   :  { %v4113_v40 = vpop.f32.mrf.mxu1 }
 0x25b   :  { %v14251_v43 = vadd.f32 %v4112_v56, %v14109_v47  ;;  %v4019_v24 = vpop.f32.mrf.mxu0 }
 0x25c   :  { %v4116_v11 = vpop.f32.mrf.mxu1 }
 0x25d   :  { %v4117_v45 = vadd.f32 %v4116_v11, %v4019_v24  ;;  %v4021_v12 = vpop.f32.mrf.mxu0 }
 0x25e   :  { %v4118_v2 = vpop.f32.mrf.mxu1 }
 0x25f   :  { %v14254_v39 = vadd.f32 %v4117_v45, %v14128_v8  ;;  %v4022_v58 = vpop.f32.mrf.mxu0 }
 0x260   :  { %v4119_v14 = vpop.f32.mrf.mxu1 }
 0x261   :  { %v4120_v59 = vadd.f32 %v4119_v14, %v4022_v58  ;;  %v4024_v42 = vpop.f32.mrf.mxu0 }
 0x262   :  { %v4121_v22 = vpop.f32.mrf.mxu1 }
 0x263   :  { %v14257_v28 = vadd.f32 %v4120_v59, %v14135_v1  ;;  %v4027_v36 = vpop.f32.mrf.mxu0 }
 0x264   :  { %v4124_v0 = vpop.f32.mrf.mxu1 }
 0x265   :  { %v4125_v47 = vadd.f32 %v4124_v0, %v4027_v36  ;;  %v4029_v49 = vpop.f32.mrf.mxu0 }
 0x266   :  { %v4126_v20 = vpop.f32.mrf.mxu1 }
 0x267   :  { %v14260_v21 = vadd.f32 %v4125_v47, %v14154_v51  ;;  %v4030_v50 = vpop.f32.mrf.mxu0 }
 0x268   :  { %v4127_v3 = vpop.f32.mrf.mxu1 }
 0x269   :  { %v4128_v8 = vadd.f32 %v4127_v3, %v4030_v50  ;;  %v4032_v4 = vpop.f32.mrf.mxu0 }
 0x26a   :  { %v4129_v31 = vpop.f32.mrf.mxu1 }
 0x26b   :  { %v14263_v35 = vadd.f32 %v4128_v8, %v14161_v9  ;;  %v4035_v38 = vpop.f32.mrf.mxu0 }
 0x26c   :  { %v4132_v27 = vpop.f32.mrf.mxu1 }
 0x26d   :  { %v4133_v1 = vadd.f32 %v4132_v27, %v4035_v38  ;;  %v4037_v52 = vpop.f32.mrf.mxu0 }
 0x26e   :  { %v4134_v53 = vpop.f32.mrf.mxu1 }
 0x26f   :  { %v14266_v26 = vadd.f32 %v4133_v1, %v14180_v5  ;;  %v4038_v25 = vpop.f32.mrf.mxu0 }
 0x270   :  { %v4135_v18 = vpop.f32.mrf.mxu1 }
 0x271   :  { %v4136_v51 = vadd.f32 %v4135_v18, %v4038_v25  ;;  %v4040_v19 = vpop.f32.mrf.mxu0 }
 0x272   :  { %v4137_v60 = vpop.f32.mrf.mxu1 }
 0x273   :  { %v14269_v55 = vadd.f32 %v4136_v51, %v14187_v6  ;;  %v4043_v48 = vpop.f32.mrf.mxu0 }
 0x274   :  { %v4140_v33 = vpop.f32.mrf.mxu1 }
 0x275   :  { %v4141_v9 = vadd.f32 %v4140_v33, %v4043_v48  ;;  %v4045_v13 = vpop.f32.mrf.mxu0 }
 0x276   :  { %v4142_v29 = vpop.f32.mrf.mxu1 }
 0x277   :  { %v14272_v30 = vadd.f32 %v4141_v9, %v14206_v23  ;;  %v4046_v37 = vpop.f32.mrf.mxu0 }
 0x278   :  { %v4143_v16 = vpop.f32.mrf.mxu1 }
 0x279   :  { %v4144_v5 = vadd.f32 %v4143_v16, %v4046_v37  ;;  %v4048_v57 = vpop.f32.mrf.mxu0 }
 0x27a   :  { %v4145_v17 = vpop.f32.mrf.mxu1 }
 0x27b   :  { %v14275_v10 = vadd.f32 %v4144_v5, %v14213_v41  ;;  %v4051_v54 = vpop.f32.mrf.mxu0 }
 0x27c   :  { %v4148_v32 = vpop.f32.mrf.mxu1 }
 0x27d   :  { %v4149_v6 = vadd.f32 %v4148_v32, %v4051_v54  ;;  %v4053_v56 = vpop.f32.mrf.mxu0 }
 0x27e   :  { %v4150_v61 = vpop.f32.mrf.mxu1 }
 0x27f   :  { %v14278_v40 = vadd.f32 %v4149_v6, %v14228_v34  ;;  %v4054_v24 = vpop.f32.mrf.mxu0 }
 0x280   :  { %v4151_v11 = vpop.f32.mrf.mxu1 }
 0x281   :  { %v4152_v23 = vadd.f32 %v4151_v11, %v4054_v24  ;;  %v4056_v45 = vpop.f32.mrf.mxu0 }
 0x282   :  { %v4153_v12 = vpop.f32.mrf.mxu1 }
 0x283   :  { %v14281_v2 = vadd.f32 %v4152_v23, %v14231_v46  ;;  %v4059_v58 = vpop.f32.mrf.mxu0 }
 0x284   :  { %v4156_v14 = vpop.f32.mrf.mxu1 }
 0x285   :  { %v4157_v41 = vadd.f32 %v4156_v14, %v4059_v58  ;;  %v4061_v59 = vpop.f32.mrf.mxu0 }
 0x286   :  { %v4158_v42 = vpop.f32.mrf.mxu1 }
 0x287   :  { %v14284_v22 = vadd.f32 %v4157_v41, %v14236_v62  ;;  %v4062_v36 = vpop.f32.mrf.mxu0 }
 0x288   :  { %v4159_v0 = vpop.f32.mrf.mxu1 }
 0x289   :  { %v4160_v34 = vadd.f32 %v4159_v0, %v4062_v36  ;;  %v4064_v47 = vpop.f32.mrf.mxu0 }
 0x28a   :  { %v4161_v49 = vpop.f32.mrf.mxu1 }
 0x28b   :  { %v14287_v20 = vadd.f32 %v4160_v34, %v14239_v7  ;;  %v4697_v50 = vpop.f32.mrf.mxu0 }
 0x28c   :  { %v4794_v3 = vpop.f32.mrf.mxu1 }
 0x28d   :  { %v4699_v46 = vpop.f32.mrf.mxu0 }
 0x28e   :  { %v4796_v8 = vpop.f32.mrf.mxu1 }
 0x28f   :  { %v14289_v4 = vpop.f32.mrf.mxu0 }
 0x290   :  { %v14291_v31 = vpop.f32.mrf.mxu1 }
 0x291   :  { %v4702_v38 = vpop.f32.mrf.mxu0 }
 0x292   :  { %v4799_v27 = vpop.f32.mrf.mxu1 }
 0x293   :  { %v14293_v62 = vpop.f32.mrf.mxu0 }
 0x294   :  { %v14295_v1 = vpop.f32.mrf.mxu1 }
 0x295   :  { %v4707_v52 = vpop.f32.mrf.mxu0 }
 0x296   :  { %v4804_v53 = vpop.f32.mrf.mxu1 }
 0x297   :  { %v14297_v25 = vpop.f32.mrf.mxu0 }
 0x298   :  { %v14299_v7 = vpop.f32.mrf.mxu1 }
 0x299   :  { %v4710_v18 = vpop.f32.mrf.mxu0 }
 0x29a   :  { %v4807_v51 = vpop.f32.mrf.mxu1 }
 0x29b   :  { %v14301_v19 = vpop.f32.mrf.mxu0 }
 0x29c   :  { %v14303_v60 = vpop.f32.mrf.mxu1 }
 0x29d   :  { %v4715_v48 = vpop.f32.mrf.mxu0 }
 0x29e   :  { %v4812_v33 = vpop.f32.mrf.mxu1 }
 0x29f   :  { %v14305_v9 = vpop.f32.mrf.mxu0 }
 0x2a0   :  { %v14307_v13 = vpop.f32.mrf.mxu1 }
 0x2a1   :  { %v4718_v29 = vpop.f32.mrf.mxu0 }
 0x2a2   :  { %v4815_v37 = vpop.f32.mrf.mxu1 }
 0x2a3   :  { %v14309_v16 = vpop.f32.mrf.mxu0 }
 0x2a4   :  { %v14311_v5 = vpop.f32.mrf.mxu1 }
 0x2a5   :  { %v4723_v57 = vpop.f32.mrf.mxu0 }
 0x2a6   :  { %v4820_v17 = vpop.f32.mrf.mxu1 }
 0x2a7   :  { %v14313_v54 = vpop.f32.mrf.mxu0 }
 0x2a8   :  { %v14315_v32 = vpop.f32.mrf.mxu1 }
 0x2a9   :  { %v4726_v6 = vpop.f32.mrf.mxu0 }
 0x2aa   :  { %v4823_v56 = vpop.f32.mrf.mxu1  ;;  %v4795_v6 = vadd.f32 %v4794_v3, %v4697_v50 }
 0x2ab   :  { %v14317_v61 = vpop.f32.mrf.mxu0 }
 0x2ac   :  { %v14319_v24 = vpop.f32.mrf.mxu1 }
 0x2ad   :  { %v4731_v11 = vpop.f32.mrf.mxu0 }
 0x2ae   :  { %v4828_v23 = vpop.f32.mrf.mxu1 }
 0x2af   :  { %v14321_v45 = vpop.f32.mrf.mxu0 }
 0x2b0   :  { %v14323_v12 = vpop.f32.mrf.mxu1 }
 0x2b1   :  { %v4734_v58 = vpop.f32.mrf.mxu0 }
 0x2b2   :  { %v4831_v14 = vpop.f32.mrf.mxu1 }
 0x2b3   :  { %v14325_v41 = vpop.f32.mrf.mxu0  ;;  %v4857_v14 = vadd.f32 %v4795_v6, %v14242_v15 }
 0x2b4   :  { %v14327_v59 = vpop.f32.mrf.mxu1 }
 0x2b5   :  { %v4739_v42 = vpop.f32.mrf.mxu0 }
 0x2b6   :  { %v4836_v36 = vpop.f32.mrf.mxu1  ;;  %v4798_v42 = vadd.f32 %v14291_v31, %v14289_v4 }
 0x2b7   :  { %v14329_v0 = vpop.f32.mrf.mxu0 }
 0x2b8   :  { %v14331_v34 = vpop.f32.mrf.mxu1  ;;  %v4858_v50 = vadd.f32 %v4798_v42, %v14245_v63 }
 0x2b9   :  { %v4742_v47 = vpop.f32.mrf.mxu0 }
 0x2ba   :  { %v4839_v49 = vpop.f32.mrf.mxu1 }
 0x2bb   :  { %v14333_v46 = vpop.f32.mrf.mxu0 }
 0x2bc   :  { %v14335_v8 = vpop.f32.mrf.mxu1 }
 0x2bd   :  { %v4747_v38 = vpop.f32.mrf.mxu0 }
 0x2be   :  { %v4844_v27 = vpop.f32.mrf.mxu1 }
 0x2bf   :  { %v14337_v52 = vpop.f32.mrf.mxu0 }
 0x2c0   :  { %v14339_v53 = vpop.f32.mrf.mxu1 }
 0x2c1   :  { %v4750_v18 = vpop.f32.mrf.mxu0 }
 0x2c2   :  { %v4847_v51 = vpop.f32.mrf.mxu1  ;;  %v4803_v18 = vadd.f32 %v14295_v1, %v14293_v62 }
 0x2c3   :  { %v14341_v48 = vpop.f32.mrf.mxu0 }
 0x2c4   :  { %v14343_v33 = vpop.f32.mrf.mxu1  ;;  %v4859_v4 = vadd.f32 %v4803_v18, %v14248_v44 }
 0x2c5   :  { %v4755_v29 = vpop.f32.mrf.mxu0 }
 0x2c6   :  { %v4852_v37 = vpop.f32.mrf.mxu1 }
 0x2c7   :  { %v14345_v57 = vpop.f32.mrf.mxu0 }
 0x2c8   :  { %v14347_v17 = vpop.f32.mrf.mxu1 }
 0x2c9   :  { %v4758_v56 = vpop.f32.mrf.mxu0 }
 0x2ca   :  { %v4855_v11 = vpop.f32.mrf.mxu1 }
 0x2cb   :  { %v5391_v23 = vpop.f32.mrf.mxu0 }
 0x2cc   :  { %v5488_v58 = vpop.f32.mrf.mxu1 }
 0x2cd   :  { %v5489_v36 = vadd.f32 %v5488_v58, %v5391_v23  ;;  %v5393_v47 = vpop.f32.mrf.mxu0  ;;  %v4806_v23 = vadd.f32 %v14299_v7, %v14297_v25 }
 0x2ce   :  { %v5490_v49 = vpop.f32.mrf.mxu1  ;;  %v4811_v47 = vadd.f32 %v14303_v60, %v14301_v19  ;;  %v4814_v19 = vadd.f32 %v14307_v13, %v14305_v9 }
 0x2cf   :  { %v5551_v38 = vadd.f32 %v5489_v36, %v4857_v14  ;;  %v5394_v27 = vpop.f32.mrf.mxu0  ;;  %v4860_v44 = vadd.f32 %v4806_v23, %v14251_v43 }
 0x2d0   :  { %v5491_v51 = vpop.f32.mrf.mxu1 }
 0x2d1   :  { %v7697_v3 = vtrunc.f32 %v5551_v38  ;;  %v5492_v29 = vadd.f32 %v5491_v51, %v5394_v27  ;;  %v5396_v37 = vpop.f32.mrf.mxu0 }
 0x2d2   :  { %v5493_v56 = vpop.f32.mrf.mxu1 }
 0x2d3   :  { %v7698_v11 = vcvt.f32.s32 %v7697_v3  ;;  %v5552_v15 = vadd.f32 %v5492_v29, %v4858_v50  ;;  %v5399_v6 = vpop.f32.mrf.mxu0  ;;  %v4861_v3 = vadd.f32 %v4811_v47, %v14254_v39  ;;  %v4862_v39 = vadd.f32 %v4814_v19, %v14257_v28 }
 0x2d4   :  { %v5496_v31 = vpop.f32.mrf.mxu1 }
 0x2d5   :  { %v7699_v58 = vtrunc.f32 %v5552_v15  ;;  %v5497_v14 = vadd.f32 %v5496_v31, %v5399_v6  ;;  %v5401_v36 = vpop.f32.mrf.mxu0  ;;  %5615 = vst [vmem:[%s14445_s2] sm:$0xff] %v7698_v11 }
 0x2d6   :  { %v5498_v62 = vpop.f32.mrf.mxu1 }
 0x2d7   :  { %v7700_v63 = vcvt.f32.s32 %v7699_v58  ;;  %v5553_v1 = vadd.f32 %v5497_v14, %v4859_v4  ;;  %v5402_v42 = vpop.f32.mrf.mxu0  ;;  %v4819_v4 = vadd.f32 %v14311_v5, %v14309_v16  ;;  %v4822_v16 = vadd.f32 %v14315_v32, %v14313_v54 }
 0x2d8   :  { %v5499_v49 = vpop.f32.mrf.mxu1 }
 0x2d9   :  { %v7701_v38 = vtrunc.f32 %v5553_v1  ;;  %v5500_v27 = vadd.f32 %v5499_v49, %v5402_v42  ;;  %v5404_v25 = vpop.f32.mrf.mxu0  ;;  %5616 = vst [vmem:[%s14445_s2 + $0x8] sm:$0xff] %v7700_v63  ;;  %v4863_v63 = vadd.f32 %v4819_v4, %v14260_v21  ;;  %v4864_v21 = vadd.f32 %v4822_v16, %v14263_v35 }
 0x2da   :  { %v5501_v7 = vpop.f32.mrf.mxu1  ;;  %v4843_v16 = vadd.f32 %v14335_v8, %v14333_v46  ;;  %v4846_v46 = vadd.f32 %v14339_v53, %v14337_v52 }
 0x2db   :  { %v7702_v18 = vcvt.f32.s32 %v7701_v38  ;;  %v5554_v51 = vadd.f32 %v5500_v27, %v4860_v44  ;;  %v5407_v50 = vpop.f32.mrf.mxu0  ;;  %v4827_v27 = vadd.f32 %v14319_v24, %v14317_v61  ;;  %v4830_v61 = vadd.f32 %v14323_v12, %v14321_v45 }
 0x2dc   :  { %v5504_v29 = vpop.f32.mrf.mxu1 }
 0x2dd   :  { %v7703_v60 = vtrunc.f32 %v5554_v51  ;;  %v5505_v37 = vadd.f32 %v5504_v29, %v5407_v50  ;;  %v5409_v43 = vpop.f32.mrf.mxu0  ;;  %5617 = vst [vmem:[%s14445_s2 + $0x10] sm:$0xff] %v7702_v18  ;;  %v4865_v29 = vadd.f32 %v4827_v27, %v14266_v26  ;;  %v4866_v26 = vadd.f32 %v4830_v61, %v14269_v55 }
 0x2de   :  { %v5506_v56 = vpop.f32.mrf.mxu1 }
 0x2df   :  { %v7704_v11 = vcvt.f32.s32 %v7703_v60  ;;  %v5555_v15 = vadd.f32 %v5505_v37, %v4861_v3  ;;  %v5410_v6 = vpop.f32.mrf.mxu0 }
 0x2e0   :  { %v5507_v31 = vpop.f32.mrf.mxu1 }
 0x2e1   :  { %v7705_v23 = vtrunc.f32 %v5555_v15  ;;  %v5508_v58 = vadd.f32 %v5507_v31, %v5410_v6  ;;  %v5412_v9 = vpop.f32.mrf.mxu0  ;;  %5618 = vst [vmem:[%s14445_s2 + $0x18] sm:$0xff] %v7704_v11  ;;  %v4835_v15 = vadd.f32 %v14327_v59, %v14325_v41  ;;  %v4838_v41 = vadd.f32 %v14331_v34, %v14329_v0 }
 0x2e2   :  { %v5509_v13 = vpop.f32.mrf.mxu1 }
 0x2e3   :  { %v7706_v14 = vcvt.f32.s32 %v7705_v23  ;;  %v5556_v36 = vadd.f32 %v5508_v58, %v4862_v39  ;;  %v5415_v62 = vpop.f32.mrf.mxu0  ;;  %v4867_v9 = vadd.f32 %v4835_v15, %v14272_v30  ;;  %v4868_v30 = vadd.f32 %v4838_v41, %v14275_v10 }
 0x2e4   :  { %v5512_v1 = vpop.f32.mrf.mxu1 }
 0x2e5   :  { %v7707_v5 = vtrunc.f32 %v5556_v36  ;;  %v5513_v42 = vadd.f32 %v5512_v1, %v5415_v62  ;;  %v5417_v28 = vpop.f32.mrf.mxu0  ;;  %5619 = vst [vmem:[%s14445_s2 + $0x20] sm:$0xff] %v7706_v14 }
 0x2e6   :  { %v5514_v47 = vpop.f32.mrf.mxu1 }
 0x2e7   :  { %v7708_v49 = vcvt.f32.s32 %v7707_v5  ;;  %v5557_v44 = vadd.f32 %v5513_v42, %v4863_v63  ;;  %v5418_v38 = vpop.f32.mrf.mxu0 }
 0x2e8   :  { %v5515_v25 = vpop.f32.mrf.mxu1 }
 0x2e9   :  { %v7709_v7 = vtrunc.f32 %v5557_v44  ;;  %v5516_v18 = vadd.f32 %v5515_v25, %v5418_v38  ;;  %v5420_v54 = vpop.f32.mrf.mxu0  ;;  %5620 = vst [vmem:[%s14445_s2 + $0x28] sm:$0xff] %v7708_v49  ;;  %v4869_v38 = vadd.f32 %v4843_v16, %v14278_v40  ;;  %v4870_v40 = vadd.f32 %v4846_v46, %v14281_v2 }
 0x2ea   :  { %v5517_v32 = vpop.f32.mrf.mxu1 }
 0x2eb   :  { %v7710_v51 = vcvt.f32.s32 %v7709_v7  ;;  %v5558_v50 = vadd.f32 %v5516_v18, %v4864_v21  ;;  %v5423_v3 = vpop.f32.mrf.mxu0  ;;  %v4851_v32 = vadd.f32 %v14343_v33, %v14341_v48  ;;  %v4854_v48 = vadd.f32 %v14347_v17, %v14345_v57 }
 0x2ec   :  { %v5520_v19 = vpop.f32.mrf.mxu1 }
 0x2ed   :  { %v7711_v24 = vtrunc.f32 %v5558_v50  ;;  %v5521_v60 = vadd.f32 %v5520_v19, %v5423_v3  ;;  %v5425_v35 = vpop.f32.mrf.mxu0  ;;  %5621 = vst [vmem:[%s14445_s2 + $0x30] sm:$0xff] %v7710_v51 }
 0x2ee   :  { %v5522_v37 = vpop.f32.mrf.mxu1 }
 0x2ef   :  { %v7712_v43 = vcvt.f32.s32 %v7711_v24  ;;  %v5559_v56 = vadd.f32 %v5521_v60, %v4865_v29  ;;  %v5426_v11 = vpop.f32.mrf.mxu0  ;;  %v4871_v24 = vadd.f32 %v4851_v32, %v14284_v22 }
 0x2f0   :  { %v5523_v6 = vpop.f32.mrf.mxu1 }
 0x2f1   :  { %v7713_v4 = vtrunc.f32 %v5559_v56  ;;  %v5524_v31 = vadd.f32 %v5523_v6, %v5426_v11  ;;  %v5428_v45 = vpop.f32.mrf.mxu0  ;;  %5622 = vst [vmem:[%s14445_s2 + $0x38] sm:$0xff] %v7712_v43  ;;  %v4872_v6 = vadd.f32 %v4854_v48, %v14287_v20 }
 0x2f2   :  { %v5525_v12 = vpop.f32.mrf.mxu1 }
 0x2f3   :  { %v7714_v39 = vcvt.f32.s32 %v7713_v4  ;;  %v5560_v23 = vadd.f32 %v5524_v31, %v4866_v26  ;;  %v5431_v58 = vpop.f32.mrf.mxu0 }
 0x2f4   :  { %v5528_v13 = vpop.f32.mrf.mxu1 }
 0x2f5   :  { %v7715_v59 = vtrunc.f32 %v5560_v23  ;;  %v5529_v14 = vadd.f32 %v5528_v13, %v5431_v58  ;;  %v5433_v55 = vpop.f32.mrf.mxu0  ;;  %5623 = vst [vmem:[%s14445_s2 + $0x40] sm:$0xff] %v7714_v39 }
 0x2f6   :  { %v5530_v36 = vpop.f32.mrf.mxu1 }
 0x2f7   :  { %v7716_v62 = vcvt.f32.s32 %v7715_v59  ;;  %v5561_v63 = vadd.f32 %v5529_v14, %v4867_v9  ;;  %v5434_v1 = vpop.f32.mrf.mxu0 }
 0x2f8   :  { %v5531_v5 = vpop.f32.mrf.mxu1 }
 0x2f9   :  { %v7717_v42 = vtrunc.f32 %v5561_v63  ;;  %v5532_v28 = vadd.f32 %v5531_v5, %v5434_v1  ;;  %v5436_v0 = vpop.f32.mrf.mxu0  ;;  %5624 = vst [vmem:[%s14445_s2 + $0x48] sm:$0xff] %v7716_v62 }
 0x2fa   :  { %v5533_v34 = vpop.f32.mrf.mxu1 }
 0x2fb   :  { %v7718_v47 = vcvt.f32.s32 %v7717_v42  ;;  %v5562_v49 = vadd.f32 %v5532_v28, %v4868_v30  ;;  %v5439_v44 = vpop.f32.mrf.mxu0 }
 0x2fc   :  { %v5536_v27 = vpop.f32.mrf.mxu1 }
 0x2fd   :  { %v7719_v8 = vtrunc.f32 %v5562_v49  ;;  %v5537_v25 = vadd.f32 %v5536_v27, %v5439_v44  ;;  %v5441_v10 = vpop.f32.mrf.mxu0  ;;  %5625 = vst [vmem:[%s14445_s2 + $0x50] sm:$0xff] %v7718_v47 }
 0x2fe   :  { %v5538_v21 = vpop.f32.mrf.mxu1 }
 0x2ff   :  { %v7720_v7 = vcvt.f32.s32 %v7719_v8  ;;  %v5563_v18 = vadd.f32 %v5537_v25, %v4869_v38  ;;  %v5442_v54 = vpop.f32.mrf.mxu0 }
 0x300   :  { %v5539_v51 = vpop.f32.mrf.mxu1 }
 0x301   :  { %v7721_v50 = vtrunc.f32 %v5563_v18  ;;  %v5540_v3 = vadd.f32 %v5539_v51, %v5442_v54  ;;  %v5444_v52 = vpop.f32.mrf.mxu0  ;;  %5626 = vst [vmem:[%s14445_s2 + $0x58] sm:$0xff] %v7720_v7 }
 0x302   :  { %v5541_v53 = vpop.f32.mrf.mxu1 }
 0x303   :  { %v7722_v29 = vcvt.f32.s32 %v7721_v50  ;;  %v5564_v19 = vadd.f32 %v5540_v3, %v4870_v40  ;;  %v5447_v61 = vpop.f32.mrf.mxu0 }
 0x304   :  { %v5544_v60 = vpop.f32.mrf.mxu1 }
 0x305   :  { %v7723_v33 = vtrunc.f32 %v5564_v19  ;;  %v5545_v35 = vadd.f32 %v5544_v60, %v5447_v61  ;;  %v5449_v2 = vpop.f32.mrf.mxu0  ;;  %5627 = vst [vmem:[%s14445_s2 + $0x60] sm:$0xff] %v7722_v29 }
 0x306   :  { %v5546_v37 = vpop.f32.mrf.mxu1 }
 0x307   :  { %v7724_v43 = vcvt.f32.s32 %v7723_v33  ;;  %v5565_v56 = vadd.f32 %v5545_v35, %v4871_v24  ;;  %v5450_v11 = vpop.f32.mrf.mxu0 }
 0x308   :  { %v5547_v15 = vpop.f32.mrf.mxu1 }
 0x309   :  { %v7725_v26 = vtrunc.f32 %v5565_v56  ;;  %v5548_v22 = vadd.f32 %v5547_v15, %v5450_v11  ;;  %v5452_v4 = vpop.f32.mrf.mxu0  ;;  %5628 = vst [vmem:[%s14445_s2 + $0x68] sm:$0xff] %v7724_v43 }
 0x30a   :  { %v5549_v31 = vpop.f32.mrf.mxu1 }
 0x30b   :  { %v7726_v57 = vcvt.f32.s32 %v7725_v26  ;;  %v5566_v17 = vadd.f32 %v5548_v22, %v4872_v6 }
 0x30d   :  { %v7727_v45 = vtrunc.f32 %v5566_v17  ;;  %5629 = vst [vmem:[%s14445_s2 + $0x70] sm:$0xff] %v7726_v57 }
 0x30f   :  { %v7728_v12 = vcvt.f32.s32 %v7727_v45 }
 0x311   :  { %5630 = vst [vmem:[%s14445_s2 + $0x78] sm:$0xff] %v7728_v12 }

</bundles_post_ra>
